<compile_context>
chip_gen: v7x
topology: tpu7x:2x2x1
jax: 0.10.0
libtpu: 0.0.40
codegen_flags: <defaults>
</compile_context>

<pallas_src>
import functools
import math

import jax
import jax.numpy as jnp
from jax.experimental import pallas as pl
from jax.experimental.pallas import tpu as pltpu

# ---------------- hyperparameters (small, consistent with module __init__) ----
B = 2            # batch
S_ITEM = 8       # padded attr sequence length, item side
S_USER = 8       # padded attr sequence length, user side
VOCAB = 128      # vocab_obj.vocab_size
USER_NUM = 16    # vocab_obj.user_num
ITEM_NUM = 16    # vocab_obj.item_num
ATTR_EMB = 32    # args.attr_emb_size
USER_EMB = 32    # args.user_emb_size
ITEM_EMB = 32    # args.item_emb_size
HEADS = 4        # args.attn_head_num
LAYERS = 1       # args.attn_layer_num
HIDDEN = 32      # args.output_hidden_size
FFN = 2048       # PyTorch TransformerEncoderLayer default dim_feedforward
LN_EPS = 1e-5
GAMMA = 1.0
MASK_MAX_LEN = S_ITEM   # static width for the returned `lens` mask


# =============================== fused Pallas kernel ==========================

def fused_attr_kernel(x_ref, bias_ref, side_ref, tf_ref, keep_ref, idx_ref,
                      in_w_ref, in_b_ref, ow_ref, ob_ref,
                      l1w_ref, l1b_ref, l2w_ref, l2b_ref,
                      g1_ref, be1_ref, g2_ref, be2_ref,
                      aw_ref, ab_ref,
                      scores_ref, logits_ref, attn_scr):
    """Single-invocation fused kernel (no grid); everything stays in VMEM.

    x_ref:    (Bc*S, E)   token embeddings, both branches concatenated on batch
    bias_ref: (Bc, S)     additive key-padding bias (0 or -1e30)
    side_ref: (Bc, HID)   user/item side vector (already through its Linear)
    tf_ref:   (Bc, S)     tf * w + b  (the Linear(1,1) logits, precomputed)
    keep_ref: (Bc, S)     1.0 for valid attr positions, 0.0 for padding
    idx_ref:  (Bc, S)     int32 vocab indices for the scatter-add
    weights:  stacked with a leading LAYERS dim
    scores_ref: (Bc, S)   per-position logits (item rows first, user rows last)
    logits_ref: (B, V)    scatter-added vocab logits
    attn_scr: VMEM (Bc*S, E) scratch for the multi-head attention output
    """
    Bc, S = bias_ref.shape
    E = x_ref.shape[1]
    dh = E // HEADS
    scale = 1.0 / math.sqrt(dh)

    x = x_ref[...]                       # (Bc*S, E)
    kbias = bias_ref[...]                # (Bc, S)

    def layer_norm(y, g, b):
        mu = jnp.mean(y, axis=-1, keepdims=True)
        d = y - mu
        var = jnp.mean(d * d, axis=-1, keepdims=True)
        return d * jax.lax.rsqrt(var + LN_EPS) * g + b

    for l in range(LAYERS):
        # ---- self attention (post-norm PyTorch TransformerEncoderLayer) ----
        qkv = jnp.dot(x, in_w_ref[l], preferred_element_type=jnp.float32) + in_b_ref[l]
        q = qkv[:, 0 * E:1 * E]
        k = qkv[:, 1 * E:2 * E]
        v = qkv[:, 2 * E:3 * E]
        for h in range(HEADS):
            lo, hi = h * dh, (h + 1) * dh
            qh = q[:, lo:hi].reshape(Bc, S, dh)
            kh = k[:, lo:hi].reshape(Bc, S, dh)
            vh = v[:, lo:hi].reshape(Bc, S, dh)
            s = jnp.einsum("bqd,bkd->bqk", qh, kh,
                           preferred_element_type=jnp.float32) * scale
            s = s + kbias[:, None, :]                       # key-padding mask
            m = jnp.max(s, axis=-1, keepdims=True)
            p = jnp.exp(s - m)
            p = p / jnp.sum(p, axis=-1, keepdims=True)
            oh = jnp.einsum("bqk,bkd->bqd", p, vh,
                            preferred_element_type=jnp.float32)
            attn_scr[:, lo:hi] = oh.reshape(Bc * S, dh)
        attn = jnp.dot(attn_scr[...], ow_ref[l],
                       preferred_element_type=jnp.float32) + ob_ref[l]
        y = layer_norm(attn + x, g1_ref[l], be1_ref[l])     # norm1(x + sa(x))
        # ---- feed-forward ----
        ff = jnp.dot(y, l1w_ref[l], preferred_element_type=jnp.float32) + l1b_ref[l]
        ff = jnp.maximum(ff, 0.0)
        ff = jnp.dot(ff, l2w_ref[l], preferred_element_type=jnp.float32) + l2b_ref[l]
        x = layer_norm(ff + y, g2_ref[l], be2_ref[l])       # norm2(y + ff(y))

    # ---- attr_linear + score: dot(attr_h, side_vec) + tf Linear(1,1) logit ----
    attr_h = jnp.dot(x, aw_ref[...], preferred_element_type=jnp.float32) + ab_ref[...]
    attr_h3 = attr_h.reshape(Bc, S, aw_ref.shape[1])
    dot = jnp.sum(attr_h3 * side_ref[...][:, None, :], axis=-1)      # (Bc, S)
    scores = dot + tf_ref[...]
    scores_ref[...] = scores.astype(scores_ref.dtype)

    # ---- scatter-add both branches into vocab logits via one-hot matmul ----
    Bo, V = logits_ref.shape
    idx = idx_ref[...]
    iota_v = jax.lax.broadcasted_iota(jnp.int32, (Bc, S, V), 2)
    onehot = (idx[:, :, None] == iota_v).astype(jnp.float32)          # (Bc, S, V)
    weighted = (scores * keep_ref[...])[:, None, :]                   # (Bc, 1, S)
    contrib = jnp.einsum("bqs,bsv->bqv", weighted, onehot,
                         preferred_element_type=jnp.float32).reshape(Bc, V)
    logits_ref[...] = (contrib[:Bo, :] + GAMMA * contrib[Bo:, :]).astype(logits_ref.dtype)


def fused_attr_forward(x_flat, kbias, side_vec, tf_logit, keep, attr_idx,
                       layers, attr_w, attr_b, *, out_batch, vocab):
    BcS, E = x_flat.shape
    Bc, S = kbias.shape
    return pl.pallas_call(
        fused_attr_kernel,
        out_shape=(jax.ShapeDtypeStruct((Bc, S), jnp.float32),
                   jax.ShapeDtypeStruct((out_batch, vocab), jnp.float32)),
        scratch_shapes=[pltpu.VMEM((BcS, E), jnp.float32)],
    )(x_flat, kbias, side_vec, tf_logit, keep, attr_idx,
      layers["in_proj_w"], layers["in_proj_b"],
      layers["out_proj_w"], layers["out_proj_b"],
      layers["lin1_w"], layers["lin1_b"],
      layers["lin2_w"], layers["lin2_b"],
      layers["ln1_g"], layers["ln1_b"],
      layers["ln2_g"], layers["ln2_b"],
      attr_w, attr_b)


# ========================== model (jitted glue + kernel) ======================

def init_params(key):
    keys = iter(jax.random.split(key, 32))

    def nrm(shape, scale=0.05):
        return scale * jax.random.normal(next(keys), shape, dtype=jnp.float32)

    L = LAYERS
    params = {
        "attr_emb": nrm((VOCAB, ATTR_EMB), 0.1),
        "user_emb": nrm((USER_NUM, USER_EMB), 0.1),
        "item_emb": nrm((ITEM_NUM, ITEM_EMB), 0.1),
        "attr_lin_w": nrm((ATTR_EMB, HIDDEN)), "attr_lin_b": nrm((1, HIDDEN)),
        "user_lin_w": nrm((USER_EMB, HIDDEN)), "user_lin_b": nrm((HIDDEN,)),
        "item_lin_w": nrm((ITEM_EMB, HIDDEN)), "item_lin_b": nrm((HIDDEN,)),
        # Linear(1,1) layers -> plain scalars (folded into glue elementwise ops)
        "attr_item_w": jnp.float32(0.30), "attr_item_b": jnp.float32(0.10),
        "attr_user_w": jnp.float32(-0.20), "attr_user_b": jnp.float32(0.05),
        "layers": {
            "in_proj_w": nrm((L, ATTR_EMB, 3 * ATTR_EMB)),
            "in_proj_b": nrm((L, 1, 3 * ATTR_EMB)),
            "out_proj_w": nrm((L, ATTR_EMB, ATTR_EMB)),
            "out_proj_b": nrm((L, 1, ATTR_EMB)),
            "lin1_w": nrm((L, ATTR_EMB, FFN)), "lin1_b": nrm((L, 1, FFN)),
            "lin2_w": nrm((L, FFN, ATTR_EMB)), "lin2_b": nrm((L, 1, ATTR_EMB)),
            "ln1_g": jnp.ones((L, 1, ATTR_EMB), jnp.float32),
            "ln1_b": jnp.zeros((L, 1, ATTR_EMB), jnp.float32),
            "ln2_g": jnp.ones((L, 1, ATTR_EMB), jnp.float32),
            "ln2_b": jnp.zeros((L, 1, ATTR_EMB), jnp.float32),
        },
    }
    return params


def _pad_mask(lengths, max_len):
    # PyTorch f_generate_mask semantics: True == padding position (static width)
    ar = jnp.arange(max_len, dtype=lengths.dtype)[None, :]
    return ar >= lengths[:, None]


@jax.jit
def attr_network_forward(params, attr_item, attr_tf_item, attr_lens_item, attr_index_item,
                         item_ids, attr_user, attr_tf_user, attr_lens_user, attr_index_user,
                         user_ids, lens, logits):
    Bn, S = attr_item.shape
    assert attr_user.shape == (Bn, S), "branches are batched together; lengths must match"

    mask = _pad_mask(lens, MASK_MAX_LEN)                    # returned only
    attr_item_mask = _pad_mask(attr_lens_item, S)           # (B, S) bool
    attr_user_mask = _pad_mask(attr_lens_user, S)           # (B, S) bool

    # ---- combine both branches along batch (shared transformer / attr_linear) ----
    attr_ids = jnp.concatenate([attr_item, attr_user], axis=0)            # (2B, S)
    pad = jnp.concatenate([attr_item_mask, attr_user_mask], axis=0)       # (2B, S)
    kbias = jnp.where(pad, jnp.float32(-1e30), jnp.float32(0.0))
    keep = jnp.logical_not(pad).astype(jnp.float32)

    x = params["attr_emb"][attr_ids]                                      # (2B, S, E) gather
    x_flat = x.reshape(2 * Bn * S, ATTR_EMB)

    user_vec = params["user_emb"][user_ids] @ params["user_lin_w"] + params["user_lin_b"]
    item_vec = params["item_emb"][item_ids] @ params["item_lin_w"] + params["item_lin_b"]
    side_vec = jnp.concatenate([user_vec, item_vec], axis=0)              # (2B, HIDDEN)

    tf_logit = jnp.concatenate(
        [attr_tf_item * params["attr_item_w"] + params["attr_item_b"],
         attr_tf_user * params["attr_user_w"] + params["attr_user_b"]], axis=0)

    attr_idx = jnp.concatenate([attr_index_item, attr_index_user], axis=0).astype(jnp.int32)

    scores, out_logits = fused_attr_forward(
        x_flat, kbias, side_vec, tf_logit, keep, attr_idx,
        params["layers"], params["attr_lin_w"], params["attr_lin_b"],
        out_batch=Bn, vocab=logits.shape[1])

    user_attr_item_logits = scores[:Bn]                                   # (B, S)
    return (user_attr_item_logits, attr_item_mask, None, None, out_logits, mask)


# ==================================== main ====================================

if __name__ == "__main__":
    root = jax.random.PRNGKey(0)
    pkey, dkey = jax.random.split(root)
    params = init_params(pkey)

    ks = jax.random.split(dkey, 8)
    attr_item = jax.random.randint(ks[0], (B, S_ITEM), 0, VOCAB)
    attr_tf_item = jax.random.uniform(ks[1], (B, S_ITEM), dtype=jnp.float32)
    attr_lens_item = jnp.array([S_ITEM, 5], dtype=jnp.int32)     # max == padded length
    attr_index_item = jax.random.randint(ks[2], (B, S_ITEM), 0, VOCAB)
    item_ids = jax.random.randint(ks[3], (B,), 0, ITEM_NUM)

    attr_user = jax.random.randint(ks[4], (B, S_USER), 0, VOCAB)
    attr_tf_user = jax.random.uniform(ks[5], (B, S_USER), dtype=jnp.float32)
    attr_lens_user = jnp.array([6, S_USER], dtype=jnp.int32)
    attr_index_user = jax.random.randint(ks[6], (B, S_USER), 0, VOCAB)
    user_ids = jax.random.randint(ks[7], (B,), 0, USER_NUM)

    lens = jnp.array([5, 8], dtype=jnp.int32)
    logits = jnp.zeros((B, VOCAB), dtype=jnp.float32)

    outs = attr_network_forward(params, attr_item, attr_tf_item, attr_lens_item, attr_index_item,
                                item_ids, attr_user, attr_tf_user, attr_lens_user, attr_index_user,
                                user_ids, lens, logits)
    user_attr_item_logits, attr_item_mask, _, _, out_logits, mask = outs
    jax.block_until_ready((user_attr_item_logits, attr_item_mask, out_logits, mask))
    print("KERNEL_OK")
</pallas_src>

<mosaic_0001>
module attributes {stable_mosaic.version = 11 : i64} {
  func.func @fused_attr_kernel(%arg0: memref<32x32xf32, #tpu.memory_space<vmem>>, %arg1: memref<4x8xf32, #tpu.memory_space<vmem>>, %arg2: memref<4x32xf32, #tpu.memory_space<vmem>>, %arg3: memref<4x8xf32, #tpu.memory_space<vmem>>, %arg4: memref<4x8xf32, #tpu.memory_space<vmem>>, %arg5: memref<4x8xi32, #tpu.memory_space<vmem>>, %arg6: memref<1x32x96xf32, #tpu.memory_space<vmem>>, %arg7: memref<1x1x96xf32, #tpu.memory_space<vmem>>, %arg8: memref<1x32x32xf32, #tpu.memory_space<vmem>>, %arg9: memref<1x1x32xf32, #tpu.memory_space<vmem>>, %arg10: memref<1x32x2048xf32, #tpu.memory_space<vmem>>, %arg11: memref<1x1x2048xf32, #tpu.memory_space<vmem>>, %arg12: memref<1x2048x32xf32, #tpu.memory_space<vmem>>, %arg13: memref<1x1x32xf32, #tpu.memory_space<vmem>>, %arg14: memref<1x1x32xf32, #tpu.memory_space<vmem>>, %arg15: memref<1x1x32xf32, #tpu.memory_space<vmem>>, %arg16: memref<1x1x32xf32, #tpu.memory_space<vmem>>, %arg17: memref<1x1x32xf32, #tpu.memory_space<vmem>>, %arg18: memref<32x32xf32, #tpu.memory_space<vmem>>, %arg19: memref<1x32xf32, #tpu.memory_space<vmem>>, %arg20: memref<4x8xf32, #tpu.memory_space<vmem>>, %arg21: memref<2x128xf32, #tpu.memory_space<vmem>>, %arg22: memref<32x32xf32, #tpu.memory_space<vmem>>) attributes {dimension_semantics = [], scalar_prefetch = 0 : i64, scratch_operands = 1 : i64, tpu.core_type = #tpu.core_type<tc>} {
    %c0 = arith.constant 0 : index
    %c0_0 = arith.constant 0 : index
    %0 = vector.load %arg0[%c0, %c0_0] : memref<32x32xf32, #tpu.memory_space<vmem>>, vector<32x32xf32>
    %c0_1 = arith.constant 0 : index
    %c0_2 = arith.constant 0 : index
    %1 = vector.load %arg1[%c0_1, %c0_2] : memref<4x8xf32, #tpu.memory_space<vmem>>, vector<4x8xf32>
    %c0_3 = arith.constant 0 : index
    %c0_4 = arith.constant 0 : index
    %c0_5 = arith.constant 0 : index
    %2 = vector.load %arg6[%c0_3, %c0_4, %c0_5] : memref<1x32x96xf32, #tpu.memory_space<vmem>>, vector<1x32x96xf32>
    %3 = vector.shape_cast %2 : vector<1x32x96xf32> to vector<32x96xf32>
    %cst = arith.constant dense<0.000000e+00> : vector<32x96xf32>
    %4 = tpu.matmul %0, %3, %cst {dimension_numbers = #tpu.dot_dimension_numbers<[1], [0], [0], [1], [0, 0, 1, 1], [], []>} : vector<32x32xf32>, vector<32x96xf32>, vector<32x96xf32> -> vector<32x96xf32>
    %c0_6 = arith.constant 0 : index
    %c0_7 = arith.constant 0 : index
    %c0_8 = arith.constant 0 : index
    %5 = vector.load %arg7[%c0_6, %c0_7, %c0_8] : memref<1x1x96xf32, #tpu.memory_space<vmem>>, vector<1x1x96xf32>
    %6 = vector.shape_cast %5 : vector<1x1x96xf32> to vector<1x96xf32>
    %7 = vector.broadcast %6 : vector<1x96xf32> to vector<32x96xf32>
    %8 = arith.addf %4, %7 : vector<32x96xf32>
    %9 = vector.extract_strided_slice %8 {offsets = [0, 0], sizes = [32, 32], strides = [1, 1]} : vector<32x96xf32> to vector<32x32xf32>
    %10 = vector.extract_strided_slice %8 {offsets = [0, 32], sizes = [32, 32], strides = [1, 1]} : vector<32x96xf32> to vector<32x32xf32>
    %11 = vector.extract_strided_slice %8 {offsets = [0, 64], sizes = [32, 32], strides = [1, 1]} : vector<32x96xf32> to vector<32x32xf32>
    %12 = vector.extract_strided_slice %9 {offsets = [0, 0], sizes = [32, 8], strides = [1, 1]} : vector<32x32xf32> to vector<32x8xf32>
    %13 = vector.shape_cast %12 : vector<32x8xf32> to vector<4x8x8xf32>
    %14 = vector.extract_strided_slice %10 {offsets = [0, 0], sizes = [32, 8], strides = [1, 1]} : vector<32x32xf32> to vector<32x8xf32>
    %15 = vector.shape_cast %14 : vector<32x8xf32> to vector<4x8x8xf32>
    %16 = vector.extract_strided_slice %11 {offsets = [0, 0], sizes = [32, 8], strides = [1, 1]} : vector<32x32xf32> to vector<32x8xf32>
    %17 = vector.shape_cast %16 : vector<32x8xf32> to vector<4x8x8xf32>
    "tpu.trace_start"() <{level = 10 : i32, message = "bqd,bkd->bqk"}> : () -> ()
    %cst_9 = arith.constant dense<0.000000e+00> : vector<4x8x8xf32>
    %18 = tpu.matmul %13, %15, %cst_9 {dimension_numbers = #tpu.dot_dimension_numbers<[2], [2], [1], [1], [0, 0, 0, 1, 1, 1], [0], [0]>} : vector<4x8x8xf32>, vector<4x8x8xf32>, vector<4x8x8xf32> -> vector<4x8x8xf32>
    "tpu.trace_stop"() : () -> ()
    %cst_10 = arith.constant 0.353553385 : f32
    %19 = vector.broadcast %cst_10 : f32 to vector<4x8x8xf32>
    %20 = arith.mulf %18, %19 : vector<4x8x8xf32>
    %21 = vector.shape_cast %1 : vector<4x8xf32> to vector<4x1x8xf32>
    %22 = vector.broadcast %21 : vector<4x1x8xf32> to vector<4x8x8xf32>
    %23 = arith.addf %20, %22 : vector<4x8x8xf32>
    %cst_11 = arith.constant dense<0xFF800000> : vector<4x8xf32>
    %24 = vector.multi_reduction <maximumf>, %23, %cst_11 [2] : vector<4x8x8xf32> to vector<4x8xf32>
    %25 = vector.shape_cast %24 : vector<4x8xf32> to vector<4x8x1xf32>
    %26 = vector.broadcast %25 : vector<4x8x1xf32> to vector<4x8x8xf32>
    %27 = arith.subf %23, %26 : vector<4x8x8xf32>
    %28 = math.exp %27 : vector<4x8x8xf32>
    %cst_12 = arith.constant dense<0.000000e+00> : vector<4x8xf32>
    %29 = vector.multi_reduction <add>, %28, %cst_12 [2] : vector<4x8x8xf32> to vector<4x8xf32>
    %30 = vector.shape_cast %29 : vector<4x8xf32> to vector<4x8x1xf32>
    %31 = vector.broadcast %30 : vector<4x8x1xf32> to vector<4x8x8xf32>
    %32 = arith.divf %28, %31 : vector<4x8x8xf32>
    "tpu.trace_start"() <{level = 10 : i32, message = "bqk,bkd->bqd"}> : () -> ()
    %cst_13 = arith.constant dense<0.000000e+00> : vector<4x8x8xf32>
    %33 = tpu.matmul %32, %17, %cst_13 {dimension_numbers = #tpu.dot_dimension_numbers<[2], [1], [1], [2], [0, 0, 0, 1, 1, 2], [0], [0]>} : vector<4x8x8xf32>, vector<4x8x8xf32>, vector<4x8x8xf32> -> vector<4x8x8xf32>
    "tpu.trace_stop"() : () -> ()
    %34 = vector.shape_cast %33 : vector<4x8x8xf32> to vector<32x8xf32>
    %c0_14 = arith.constant 0 : index
    %c0_15 = arith.constant 0 : index
    %35 = vector.load %arg22[%c0_14, %c0_15] : memref<32x32xf32, #tpu.memory_space<vmem>>, vector<32x8xf32>
    tpu.vector_store %arg22[%c0_14, %c0_15], %34 {strides = array<i32>} : memref<32x32xf32, #tpu.memory_space<vmem>>, vector<32x8xf32>,
    %36 = vector.extract_strided_slice %9 {offsets = [0, 8], sizes = [32, 8], strides = [1, 1]} : vector<32x32xf32> to vector<32x8xf32>
    %37 = vector.shape_cast %36 : vector<32x8xf32> to vector<4x8x8xf32>
    %38 = vector.extract_strided_slice %10 {offsets = [0, 8], sizes = [32, 8], strides = [1, 1]} : vector<32x32xf32> to vector<32x8xf32>
    %39 = vector.shape_cast %38 : vector<32x8xf32> to vector<4x8x8xf32>
    %40 = vector.extract_strided_slice %11 {offsets = [0, 8], sizes = [32, 8], strides = [1, 1]} : vector<32x32xf32> to vector<32x8xf32>
    %41 = vector.shape_cast %40 : vector<32x8xf32> to vector<4x8x8xf32>
    "tpu.trace_start"() <{level = 10 : i32, message = "bqd,bkd->bqk"}> : () -> ()
    %cst_16 = arith.constant dense<0.000000e+00> : vector<4x8x8xf32>
    %42 = tpu.matmul %37, %39, %cst_16 {dimension_numbers = #tpu.dot_dimension_numbers<[2], [2], [1], [1], [0, 0, 0, 1, 1, 1], [0], [0]>} : vector<4x8x8xf32>, vector<4x8x8xf32>, vector<4x8x8xf32> -> vector<4x8x8xf32>
    "tpu.trace_stop"() : () -> ()
    %cst_17 = arith.constant 0.353553385 : f32
    %43 = vector.broadcast %cst_17 : f32 to vector<4x8x8xf32>
    %44 = arith.mulf %42, %43 : vector<4x8x8xf32>
    %45 = vector.shape_cast %1 : vector<4x8xf32> to vector<4x1x8xf32>
    %46 = vector.broadcast %45 : vector<4x1x8xf32> to vector<4x8x8xf32>
    %47 = arith.addf %44, %46 : vector<4x8x8xf32>
    %cst_18 = arith.constant dense<0xFF800000> : vector<4x8xf32>
    %48 = vector.multi_reduction <maximumf>, %47, %cst_18 [2] : vector<4x8x8xf32> to vector<4x8xf32>
    %49 = vector.shape_cast %48 : vector<4x8xf32> to vector<4x8x1xf32>
    %50 = vector.broadcast %49 : vector<4x8x1xf32> to vector<4x8x8xf32>
    %51 = arith.subf %47, %50 : vector<4x8x8xf32>
    %52 = math.exp %51 : vector<4x8x8xf32>
    %cst_19 = arith.constant dense<0.000000e+00> : vector<4x8xf32>
    %53 = vector.multi_reduction <add>, %52, %cst_19 [2] : vector<4x8x8xf32> to vector<4x8xf32>
    %54 = vector.shape_cast %53 : vector<4x8xf32> to vector<4x8x1xf32>
    %55 = vector.broadcast %54 : vector<4x8x1xf32> to vector<4x8x8xf32>
    %56 = arith.divf %52, %55 : vector<4x8x8xf32>
    "tpu.trace_start"() <{level = 10 : i32, message = "bqk,bkd->bqd"}> : () -> ()
    %cst_20 = arith.constant dense<0.000000e+00> : vector<4x8x8xf32>
    %57 = tpu.matmul %56, %41, %cst_20 {dimension_numbers = #tpu.dot_dimension_numbers<[2], [1], [1], [2], [0, 0, 0, 1, 1, 2], [0], [0]>} : vector<4x8x8xf32>, vector<4x8x8xf32>, vector<4x8x8xf32> -> vector<4x8x8xf32>
    "tpu.trace_stop"() : () -> ()
    %58 = vector.shape_cast %57 : vector<4x8x8xf32> to vector<32x8xf32>
    %c0_21 = arith.constant 0 : index
    %c8 = arith.constant 8 : index
    %59 = vector.load %arg22[%c0_21, %c8] : memref<32x32xf32, #tpu.memory_space<vmem>>, vector<32x8xf32>
    tpu.vector_store %arg22[%c0_21, %c8], %58 {strides = array<i32>} : memref<32x32xf32, #tpu.memory_space<vmem>>, vector<32x8xf32>,
    %60 = vector.extract_strided_slice %9 {offsets = [0, 16], sizes = [32, 8], strides = [1, 1]} : vector<32x32xf32> to vector<32x8xf32>
    %61 = vector.shape_cast %60 : vector<32x8xf32> to vector<4x8x8xf32>
    %62 = vector.extract_strided_slice %10 {offsets = [0, 16], sizes = [32, 8], strides = [1, 1]} : vector<32x32xf32> to vector<32x8xf32>
    %63 = vector.shape_cast %62 : vector<32x8xf32> to vector<4x8x8xf32>
    %64 = vector.extract_strided_slice %11 {offsets = [0, 16], sizes = [32, 8], strides = [1, 1]} : vector<32x32xf32> to vector<32x8xf32>
    %65 = vector.shape_cast %64 : vector<32x8xf32> to vector<4x8x8xf32>
    "tpu.trace_start"() <{level = 10 : i32, message = "bqd,bkd->bqk"}> : () -> ()
    %cst_22 = arith.constant dense<0.000000e+00> : vector<4x8x8xf32>
    %66 = tpu.matmul %61, %63, %cst_22 {dimension_numbers = #tpu.dot_dimension_numbers<[2], [2], [1], [1], [0, 0, 0, 1, 1, 1], [0], [0]>} : vector<4x8x8xf32>, vector<4x8x8xf32>, vector<4x8x8xf32> -> vector<4x8x8xf32>
    "tpu.trace_stop"() : () -> ()
    %cst_23 = arith.constant 0.353553385 : f32
    %67 = vector.broadcast %cst_23 : f32 to vector<4x8x8xf32>
    %68 = arith.mulf %66, %67 : vector<4x8x8xf32>
    %69 = vector.shape_cast %1 : vector<4x8xf32> to vector<4x1x8xf32>
    %70 = vector.broadcast %69 : vector<4x1x8xf32> to vector<4x8x8xf32>
    %71 = arith.addf %68, %70 : vector<4x8x8xf32>
    %cst_24 = arith.constant dense<0xFF800000> : vector<4x8xf32>
    %72 = vector.multi_reduction <maximumf>, %71, %cst_24 [2] : vector<4x8x8xf32> to vector<4x8xf32>
    %73 = vector.shape_cast %72 : vector<4x8xf32> to vector<4x8x1xf32>
    %74 = vector.broadcast %73 : vector<4x8x1xf32> to vector<4x8x8xf32>
    %75 = arith.subf %71, %74 : vector<4x8x8xf32>
    %76 = math.exp %75 : vector<4x8x8xf32>
    %cst_25 = arith.constant dense<0.000000e+00> : vector<4x8xf32>
    %77 = vector.multi_reduction <add>, %76, %cst_25 [2] : vector<4x8x8xf32> to vector<4x8xf32>
    %78 = vector.shape_cast %77 : vector<4x8xf32> to vector<4x8x1xf32>
    %79 = vector.broadcast %78 : vector<4x8x1xf32> to vector<4x8x8xf32>
    %80 = arith.divf %76, %79 : vector<4x8x8xf32>
    "tpu.trace_start"() <{level = 10 : i32, message = "bqk,bkd->bqd"}> : () -> ()
    %cst_26 = arith.constant dense<0.000000e+00> : vector<4x8x8xf32>
    %81 = tpu.matmul %80, %65, %cst_26 {dimension_numbers = #tpu.dot_dimension_numbers<[2], [1], [1], [2], [0, 0, 0, 1, 1, 2], [0], [0]>} : vector<4x8x8xf32>, vector<4x8x8xf32>, vector<4x8x8xf32> -> vector<4x8x8xf32>
    "tpu.trace_stop"() : () -> ()
    %82 = vector.shape_cast %81 : vector<4x8x8xf32> to vector<32x8xf32>
    %c0_27 = arith.constant 0 : index
    %c16 = arith.constant 16 : index
    %83 = vector.load %arg22[%c0_27, %c16] : memref<32x32xf32, #tpu.memory_space<vmem>>, vector<32x8xf32>
    tpu.vector_store %arg22[%c0_27, %c16], %82 {strides = array<i32>} : memref<32x32xf32, #tpu.memory_space<vmem>>, vector<32x8xf32>,
    %84 = vector.extract_strided_slice %9 {offsets = [0, 24], sizes = [32, 8], strides = [1, 1]} : vector<32x32xf32> to vector<32x8xf32>
    %85 = vector.shape_cast %84 : vector<32x8xf32> to vector<4x8x8xf32>
    %86 = vector.extract_strided_slice %10 {offsets = [0, 24], sizes = [32, 8], strides = [1, 1]} : vector<32x32xf32> to vector<32x8xf32>
    %87 = vector.shape_cast %86 : vector<32x8xf32> to vector<4x8x8xf32>
    %88 = vector.extract_strided_slice %11 {offsets = [0, 24], sizes = [32, 8], strides = [1, 1]} : vector<32x32xf32> to vector<32x8xf32>
    %89 = vector.shape_cast %88 : vector<32x8xf32> to vector<4x8x8xf32>
    "tpu.trace_start"() <{level = 10 : i32, message = "bqd,bkd->bqk"}> : () -> ()
    %cst_28 = arith.constant dense<0.000000e+00> : vector<4x8x8xf32>
    %90 = tpu.matmul %85, %87, %cst_28 {dimension_numbers = #tpu.dot_dimension_numbers<[2], [2], [1], [1], [0, 0, 0, 1, 1, 1], [0], [0]>} : vector<4x8x8xf32>, vector<4x8x8xf32>, vector<4x8x8xf32> -> vector<4x8x8xf32>
    "tpu.trace_stop"() : () -> ()
    %cst_29 = arith.constant 0.353553385 : f32
    %91 = vector.broadcast %cst_29 : f32 to vector<4x8x8xf32>
    %92 = arith.mulf %90, %91 : vector<4x8x8xf32>
    %93 = vector.shape_cast %1 : vector<4x8xf32> to vector<4x1x8xf32>
    %94 = vector.broadcast %93 : vector<4x1x8xf32> to vector<4x8x8xf32>
    %95 = arith.addf %92, %94 : vector<4x8x8xf32>
    %cst_30 = arith.constant dense<0xFF800000> : vector<4x8xf32>
    %96 = vector.multi_reduction <maximumf>, %95, %cst_30 [2] : vector<4x8x8xf32> to vector<4x8xf32>
    %97 = vector.shape_cast %96 : vector<4x8xf32> to vector<4x8x1xf32>
    %98 = vector.broadcast %97 : vector<4x8x1xf32> to vector<4x8x8xf32>
    %99 = arith.subf %95, %98 : vector<4x8x8xf32>
    %100 = math.exp %99 : vector<4x8x8xf32>
    %cst_31 = arith.constant dense<0.000000e+00> : vector<4x8xf32>
    %101 = vector.multi_reduction <add>, %100, %cst_31 [2] : vector<4x8x8xf32> to vector<4x8xf32>
    %102 = vector.shape_cast %101 : vector<4x8xf32> to vector<4x8x1xf32>
    %103 = vector.broadcast %102 : vector<4x8x1xf32> to vector<4x8x8xf32>
    %104 = arith.divf %100, %103 : vector<4x8x8xf32>
    "tpu.trace_start"() <{level = 10 : i32, message = "bqk,bkd->bqd"}> : () -> ()
    %cst_32 = arith.constant dense<0.000000e+00> : vector<4x8x8xf32>
    %105 = tpu.matmul %104, %89, %cst_32 {dimension_numbers = #tpu.dot_dimension_numbers<[2], [1], [1], [2], [0, 0, 0, 1, 1, 2], [0], [0]>} : vector<4x8x8xf32>, vector<4x8x8xf32>, vector<4x8x8xf32> -> vector<4x8x8xf32>
    "tpu.trace_stop"() : () -> ()
    %106 = vector.shape_cast %105 : vector<4x8x8xf32> to vector<32x8xf32>
    %c0_33 = arith.constant 0 : index
    %c24 = arith.constant 24 : index
    %107 = vector.load %arg22[%c0_33, %c24] : memref<32x32xf32, #tpu.memory_space<vmem>>, vector<32x8xf32>
    tpu.vector_store %arg22[%c0_33, %c24], %106 {strides = array<i32>} : memref<32x32xf32, #tpu.memory_space<vmem>>, vector<32x8xf32>,
    %c0_34 = arith.constant 0 : index
    %c0_35 = arith.constant 0 : index
    %108 = vector.load %arg22[%c0_34, %c0_35] : memref<32x32xf32, #tpu.memory_space<vmem>>, vector<32x32xf32>
    %c0_36 = arith.constant 0 : index
    %c0_37 = arith.constant 0 : index
    %c0_38 = arith.constant 0 : index
    %109 = vector.load %arg8[%c0_36, %c0_37, %c0_38] : memref<1x32x32xf32, #tpu.memory_space<vmem>>, vector<1x32x32xf32>
    %110 = vector.shape_cast %109 : vector<1x32x32xf32> to vector<32x32xf32>
    %cst_39 = arith.constant dense<0.000000e+00> : vector<32x32xf32>
    %111 = tpu.matmul %108, %110, %cst_39 {dimension_numbers = #tpu.dot_dimension_numbers<[1], [0], [0], [1], [0, 0, 1, 1], [], []>} : vector<32x32xf32>, vector<32x32xf32>, vector<32x32xf32> -> vector<32x32xf32>
    %c0_40 = arith.constant 0 : index
    %c0_41 = arith.constant 0 : index
    %c0_42 = arith.constant 0 : index
    %112 = vector.load %arg9[%c0_40, %c0_41, %c0_42] : memref<1x1x32xf32, #tpu.memory_space<vmem>>, vector<1x1x32xf32>
    %113 = vector.shape_cast %112 : vector<1x1x32xf32> to vector<1x32xf32>
    %114 = vector.broadcast %113 : vector<1x32xf32> to vector<32x32xf32>
    %115 = arith.addf %111, %114 : vector<32x32xf32>
    %116 = arith.addf %115, %0 : vector<32x32xf32>
    %c0_43 = arith.constant 0 : index
    %c0_44 = arith.constant 0 : index
    %c0_45 = arith.constant 0 : index
    %117 = vector.load %arg14[%c0_43, %c0_44, %c0_45] : memref<1x1x32xf32, #tpu.memory_space<vmem>>, vector<1x1x32xf32>
    %118 = vector.shape_cast %117 : vector<1x1x32xf32> to vector<1x32xf32>
    %c0_46 = arith.constant 0 : index
    %c0_47 = arith.constant 0 : index
    %c0_48 = arith.constant 0 : index
    %119 = vector.load %arg15[%c0_46, %c0_47, %c0_48] : memref<1x1x32xf32, #tpu.memory_space<vmem>>, vector<1x1x32xf32>
    %120 = vector.shape_cast %119 : vector<1x1x32xf32> to vector<1x32xf32>
    %cst_49 = arith.constant dense<0.000000e+00> : vector<32xf32>
    %121 = vector.multi_reduction <add>, %116, %cst_49 [1] : vector<32x32xf32> to vector<32xf32>
    %122 = vector.shape_cast %121 : vector<32xf32> to vector<32x1xf32>
    %cst_50 = arith.constant 3.200000e+01 : f32
    %123 = vector.broadcast %cst_50 : f32 to vector<32x1xf32>
    %124 = arith.divf %122, %123 : vector<32x1xf32>
    %125 = vector.broadcast %124 : vector<32x1xf32> to vector<32x32xf32>
    %126 = arith.subf %116, %125 : vector<32x32xf32>
    %127 = arith.mulf %126, %126 : vector<32x32xf32>
    %cst_51 = arith.constant dense<0.000000e+00> : vector<32xf32>
    %128 = vector.multi_reduction <add>, %127, %cst_51 [1] : vector<32x32xf32> to vector<32xf32>
    %129 = vector.shape_cast %128 : vector<32xf32> to vector<32x1xf32>
    %cst_52 = arith.constant 3.200000e+01 : f32
    %130 = vector.broadcast %cst_52 : f32 to vector<32x1xf32>
    %131 = arith.divf %129, %130 : vector<32x1xf32>
    %cst_53 = arith.constant 9.99999974E-6 : f32
    %132 = vector.broadcast %cst_53 : f32 to vector<32x1xf32>
    %133 = arith.addf %131, %132 : vector<32x1xf32>
    %134 = math.rsqrt %133 : vector<32x1xf32>
    %135 = vector.broadcast %134 : vector<32x1xf32> to vector<32x32xf32>
    %136 = arith.mulf %126, %135 : vector<32x32xf32>
    %137 = vector.broadcast %118 : vector<1x32xf32> to vector<32x32xf32>
    %138 = arith.mulf %136, %137 : vector<32x32xf32>
    %139 = vector.broadcast %120 : vector<1x32xf32> to vector<32x32xf32>
    %140 = arith.addf %138, %139 : vector<32x32xf32>
    %c0_54 = arith.constant 0 : index
    %c0_55 = arith.constant 0 : index
    %c0_56 = arith.constant 0 : index
    %141 = vector.load %arg10[%c0_54, %c0_55, %c0_56] : memref<1x32x2048xf32, #tpu.memory_space<vmem>>, vector<1x32x2048xf32>
    %142 = vector.shape_cast %141 : vector<1x32x2048xf32> to vector<32x2048xf32>
    %cst_57 = arith.constant dense<0.000000e+00> : vector<32x2048xf32>
    %143 = tpu.matmul %140, %142, %cst_57 {dimension_numbers = #tpu.dot_dimension_numbers<[1], [0], [0], [1], [0, 0, 1, 1], [], []>} : vector<32x32xf32>, vector<32x2048xf32>, vector<32x2048xf32> -> vector<32x2048xf32>
    %c0_58 = arith.constant 0 : index
    %c0_59 = arith.constant 0 : index
    %c0_60 = arith.constant 0 : index
    %144 = vector.load %arg11[%c0_58, %c0_59, %c0_60] : memref<1x1x2048xf32, #tpu.memory_space<vmem>>, vector<1x1x2048xf32>
    %145 = vector.shape_cast %144 : vector<1x1x2048xf32> to vector<1x2048xf32>
    %146 = vector.broadcast %145 : vector<1x2048xf32> to vector<32x2048xf32>
    %147 = arith.addf %143, %146 : vector<32x2048xf32>
    %cst_61 = arith.constant 0.000000e+00 : f32
    %148 = vector.broadcast %cst_61 : f32 to vector<32x2048xf32>
    %149 = arith.maximumf %147, %148 : vector<32x2048xf32>
    %c0_62 = arith.constant 0 : index
    %c0_63 = arith.constant 0 : index
    %c0_64 = arith.constant 0 : index
    %150 = vector.load %arg12[%c0_62, %c0_63, %c0_64] : memref<1x2048x32xf32, #tpu.memory_space<vmem>>, vector<1x2048x32xf32>
    %151 = vector.shape_cast %150 : vector<1x2048x32xf32> to vector<2048x32xf32>
    %cst_65 = arith.constant dense<0.000000e+00> : vector<32x32xf32>
    %152 = tpu.matmul %149, %151, %cst_65 {dimension_numbers = #tpu.dot_dimension_numbers<[1], [0], [0], [1], [0, 0, 1, 1], [], []>} : vector<32x2048xf32>, vector<2048x32xf32>, vector<32x32xf32> -> vector<32x32xf32>
    %c0_66 = arith.constant 0 : index
    %c0_67 = arith.constant 0 : index
    %c0_68 = arith.constant 0 : index
    %153 = vector.load %arg13[%c0_66, %c0_67, %c0_68] : memref<1x1x32xf32, #tpu.memory_space<vmem>>, vector<1x1x32xf32>
    %154 = vector.shape_cast %153 : vector<1x1x32xf32> to vector<1x32xf32>
    %155 = vector.broadcast %154 : vector<1x32xf32> to vector<32x32xf32>
    %156 = arith.addf %152, %155 : vector<32x32xf32>
    %157 = arith.addf %156, %140 : vector<32x32xf32>
    %c0_69 = arith.constant 0 : index
    %c0_70 = arith.constant 0 : index
    %c0_71 = arith.constant 0 : index
    %158 = vector.load %arg16[%c0_69, %c0_70, %c0_71] : memref<1x1x32xf32, #tpu.memory_space<vmem>>, vector<1x1x32xf32>
    %159 = vector.shape_cast %158 : vector<1x1x32xf32> to vector<1x32xf32>
    %c0_72 = arith.constant 0 : index
    %c0_73 = arith.constant 0 : index
    %c0_74 = arith.constant 0 : index
    %160 = vector.load %arg17[%c0_72, %c0_73, %c0_74] : memref<1x1x32xf32, #tpu.memory_space<vmem>>, vector<1x1x32xf32>
    %161 = vector.shape_cast %160 : vector<1x1x32xf32> to vector<1x32xf32>
    %cst_75 = arith.constant dense<0.000000e+00> : vector<32xf32>
    %162 = vector.multi_reduction <add>, %157, %cst_75 [1] : vector<32x32xf32> to vector<32xf32>
    %163 = vector.shape_cast %162 : vector<32xf32> to vector<32x1xf32>
    %cst_76 = arith.constant 3.200000e+01 : f32
    %164 = vector.broadcast %cst_76 : f32 to vector<32x1xf32>
    %165 = arith.divf %163, %164 : vector<32x1xf32>
    %166 = vector.broadcast %165 : vector<32x1xf32> to vector<32x32xf32>
    %167 = arith.subf %157, %166 : vector<32x32xf32>
    %168 = arith.mulf %167, %167 : vector<32x32xf32>
    %cst_77 = arith.constant dense<0.000000e+00> : vector<32xf32>
    %169 = vector.multi_reduction <add>, %168, %cst_77 [1] : vector<32x32xf32> to vector<32xf32>
    %170 = vector.shape_cast %169 : vector<32xf32> to vector<32x1xf32>
    %cst_78 = arith.constant 3.200000e+01 : f32
    %171 = vector.broadcast %cst_78 : f32 to vector<32x1xf32>
    %172 = arith.divf %170, %171 : vector<32x1xf32>
    %cst_79 = arith.constant 9.99999974E-6 : f32
    %173 = vector.broadcast %cst_79 : f32 to vector<32x1xf32>
    %174 = arith.addf %172, %173 : vector<32x1xf32>
    %175 = math.rsqrt %174 : vector<32x1xf32>
    %176 = vector.broadcast %175 : vector<32x1xf32> to vector<32x32xf32>
    %177 = arith.mulf %167, %176 : vector<32x32xf32>
    %178 = vector.broadcast %159 : vector<1x32xf32> to vector<32x32xf32>
    %179 = arith.mulf %177, %178 : vector<32x32xf32>
    %180 = vector.broadcast %161 : vector<1x32xf32> to vector<32x32xf32>
    %181 = arith.addf %179, %180 : vector<32x32xf32>
    %c0_80 = arith.constant 0 : index
    %c0_81 = arith.constant 0 : index
    %182 = vector.load %arg18[%c0_80, %c0_81] : memref<32x32xf32, #tpu.memory_space<vmem>>, vector<32x32xf32>
    %cst_82 = arith.constant dense<0.000000e+00> : vector<32x32xf32>
    %183 = tpu.matmul %181, %182, %cst_82 {dimension_numbers = #tpu.dot_dimension_numbers<[1], [0], [0], [1], [0, 0, 1, 1], [], []>} : vector<32x32xf32>, vector<32x32xf32>, vector<32x32xf32> -> vector<32x32xf32>
    %c0_83 = arith.constant 0 : index
    %c0_84 = arith.constant 0 : index
    %184 = vector.load %arg19[%c0_83, %c0_84] : memref<1x32xf32, #tpu.memory_space<vmem>>, vector<1x32xf32>
    %185 = vector.broadcast %184 : vector<1x32xf32> to vector<32x32xf32>
    %186 = arith.addf %183, %185 : vector<32x32xf32>
    %187 = vector.shape_cast %186 : vector<32x32xf32> to vector<4x8x32xf32>
    %c0_85 = arith.constant 0 : index
    %c0_86 = arith.constant 0 : index
    %188 = vector.load %arg2[%c0_85, %c0_86] : memref<4x32xf32, #tpu.memory_space<vmem>>, vector<4x32xf32>
    %189 = vector.shape_cast %188 : vector<4x32xf32> to vector<4x1x32xf32>
    %190 = vector.broadcast %189 : vector<4x1x32xf32> to vector<4x8x32xf32>
    %191 = arith.mulf %187, %190 : vector<4x8x32xf32>
    %cst_87 = arith.constant dense<0.000000e+00> : vector<4x8xf32>
    %192 = vector.multi_reduction <add>, %191, %cst_87 [2] : vector<4x8x32xf32> to vector<4x8xf32>
    %c0_88 = arith.constant 0 : index
    %c0_89 = arith.constant 0 : index
    %193 = vector.load %arg3[%c0_88, %c0_89] : memref<4x8xf32, #tpu.memory_space<vmem>>, vector<4x8xf32>
    %194 = arith.addf %192, %193 : vector<4x8xf32>
    %c0_90 = arith.constant 0 : index
    %c0_91 = arith.constant 0 : index
    %195 = vector.load %arg20[%c0_90, %c0_91] : memref<4x8xf32, #tpu.memory_space<vmem>>, vector<4x8xf32>
    tpu.vector_store %arg20[%c0_90, %c0_91], %194 {strides = array<i32>} : memref<4x8xf32, #tpu.memory_space<vmem>>, vector<4x8xf32>,
    %c0_92 = arith.constant 0 : index
    %c0_93 = arith.constant 0 : index
    %196 = vector.load %arg5[%c0_92, %c0_93] : memref<4x8xi32, #tpu.memory_space<vmem>>, vector<4x8xi32>
    %197 = tpu.iota {dimensions = array<i32: 2>} : vector<4x8x128xi32>
    %198 = vector.shape_cast %196 : vector<4x8xi32> to vector<4x8x1xi32>
    %199 = vector.broadcast %198 : vector<4x8x1xi32> to vector<4x8x128xi32>
    %200 = arith.cmpi eq, %199, %197 : vector<4x8x128xi32>
    %201 = arith.extui %200 : vector<4x8x128xi1> to vector<4x8x128xi32>
    %202 = arith.sitofp %201 : vector<4x8x128xi32> to vector<4x8x128xf32>
    %c0_94 = arith.constant 0 : index
    %c0_95 = arith.constant 0 : index
    %203 = vector.load %arg4[%c0_94, %c0_95] : memref<4x8xf32, #tpu.memory_space<vmem>>, vector<4x8xf32>
    %204 = arith.mulf %194, %203 : vector<4x8xf32>
    %205 = vector.shape_cast %204 : vector<4x8xf32> to vector<4x1x8xf32>
    "tpu.trace_start"() <{level = 10 : i32, message = "bqs,bsv->bqv"}> : () -> ()
    %cst_96 = arith.constant dense<0.000000e+00> : vector<4x1x128xf32>
    %206 = tpu.matmul %205, %202, %cst_96 {dimension_numbers = #tpu.dot_dimension_numbers<[2], [1], [1], [2], [0, 0, 0, 1, 1, 2], [0], [0]>} : vector<4x1x8xf32>, vector<4x8x128xf32>, vector<4x1x128xf32> -> vector<4x1x128xf32>
    "tpu.trace_stop"() : () -> ()
    %207 = vector.shape_cast %206 : vector<4x1x128xf32> to vector<4x128xf32>
    %208 = vector.extract_strided_slice %207 {offsets = [0, 0], sizes = [2, 128], strides = [1, 1]} : vector<4x128xf32> to vector<2x128xf32>
    %209 = vector.extract_strided_slice %207 {offsets = [2, 0], sizes = [2, 128], strides = [1, 1]} : vector<4x128xf32> to vector<2x128xf32>
    %cst_97 = arith.constant 1.000000e+00 : f32
    %210 = vector.broadcast %cst_97 : f32 to vector<2x128xf32>
    %211 = arith.mulf %210, %209 : vector<2x128xf32>
    %212 = arith.addf %208, %211 : vector<2x128xf32>
    %c0_98 = arith.constant 0 : index
    %c0_99 = arith.constant 0 : index
    %213 = vector.load %arg21[%c0_98, %c0_99] : memref<2x128xf32, #tpu.memory_space<vmem>>, vector<2x128xf32>
    tpu.vector_store %arg21[%c0_98, %c0_99], %212 {strides = array<i32>} : memref<2x128xf32, #tpu.memory_space<vmem>>, vector<2x128xf32>,
    return
  }
}

</mosaic_0001>

<bundles_post_ra>
// kernel: attr_network_forward.1
= control target key start
LH: loop header
LB: loop body
LE: loop exit
PB: predicated region body
PF: predicated region fallthrough
CT: control target
= control target key end

     0   :  { %s9161_s0 = inlined_call_operand.vmem [shape: f32[32,32], index: 0, kind: input, shape index: {}]   ;;  %s9162_s1 = inlined_call_operand.vmem [shape: f32[4,8], index: 1, kind: input, shape index: {}]   ;;  %s9163_s2 = inlined_call_operand.vmem [shape: f32[4,32], index: 2, kind: input, shape index: {}]   ;;  %s9164_s3 = inlined_call_operand.vmem [shape: f32[4,8], index: 3, kind: input, shape index: {}]   ;;  %s9165_s4 = inlined_call_operand.vmem [shape: f32[4,8], index: 4, kind: input, shape index: {}]   ;;  %s9166_s5 = inlined_call_operand.vmem [shape: s32[4,8], index: 5, kind: input, shape index: {}]   ;;  %s9167_s6 = inlined_call_operand.vmem [shape: f32[1,32,96], index: 6, kind: input, shape index: {}]   ;;  %s9168_s7 = inlined_call_operand.vmem [shape: f32[1,1,96], index: 7, kind: input, shape index: {}]   ;;  %s9169_s8 = inlined_call_operand.vmem [shape: f32[1,32,32], index: 8, kind: input, shape index: {}]   ;;  %s9170_s9 = inlined_call_operand.vmem [shape: f32[1,1,32], index: 9, kind: input, shape index: {}]   ;;  %s9171_s10 = inlined_call_operand.vmem [shape: f32[1,32,2048], index: 10, kind: input, shape index: {}]   ;;  %s9172_s11 = inlined_call_operand.vmem [shape: f32[1,1,2048], index: 11, kind: input, shape index: {}]   ;;  %s9173_s12 = inlined_call_operand.vmem [shape: f32[1,2048,32], index: 12, kind: input, shape index: {}]   ;;  %s9174_s13 = inlined_call_operand.vmem [shape: f32[1,1,32], index: 13, kind: input, shape index: {}]   ;;  %s9175_s14 = inlined_call_operand.vmem [shape: f32[1,1,32], index: 14, kind: input, shape index: {}]   ;;  %s9176_s15 = inlined_call_operand.vmem [shape: f32[1,1,32], index: 15, kind: input, shape index: {}]   ;;  %s9177_s16 = inlined_call_operand.vmem [shape: f32[1,1,32], index: 16, kind: input, shape index: {}]   ;;  %s9178_s17 = inlined_call_operand.vmem [shape: f32[1,1,32], index: 17, kind: input, shape index: {}]   ;;  %s9179_s18 = inlined_call_operand.vmem [shape: f32[32,32], index: 18, kind: input, shape index: {}]   ;;  %s9180_s19 = inlined_call_operand.vmem [shape: f32[1,32], index: 19, kind: input, shape index: {}]   ;;  %s9181_s20 = inlined_call_operand.vmem [shape: f32[4,8], index: 20, kind: output, shape index: {0}]   ;;  %s9182_s21 = inlined_call_operand.hbm [shape: f32[2,128], index: 21, kind: output, shape index: {1}]  }
   0x1   :  { %9184 = sst [smem:[#allocation6_spill]] %s9161_s0 }
   0x2   :  { %9185 = sst [smem:[#allocation7_spill]] %s9162_s1 }
   0x3   :  { %9186 = sst [smem:[#allocation8_spill]] %s9163_s2 }
   0x4   :  { %9187 = sst [smem:[#allocation9_spill]] %s9164_s3 }
   0x5   :  { %9188 = sst [smem:[#allocation10_spill]] %s9165_s4 }
   0x6   :  { %9189 = sst [smem:[#allocation11_spill]] %s9166_s5 }
   0x7   :  { %v73_v0 = vld [vmem:[%s9167_s6] sm:$0xff]  ;;  %v74_v1 = vld [vmem:[%s9167_s6 + $0x8] sm:$0xff]  ;;  %v75_v2 = vld [vmem:[%s9167_s6 + $0x10] sm:$0xff]  ;;  %vm84_vm0 = vcmask 261120   ;;  %s9190_s5 = sld [smem:[#allocation6_spill]] }
   0x8   :  { %v6571_v3 = vpack.c.bf16 %v74_v1, %v73_v0  ;;  %v76_v4 = vld [vmem:[%s9167_s6 + $0x18] sm:$0xff] }
   0x9   :  { %v6575_v6 = vpack.c.bf16 %v76_v4, %v75_v2 }
   0xd   :  { %v68_v5 = vld [vmem:[%s9190_s5] sm:$0xff] }
   0xe   :  { %6357 = vmatprep.mubr.msk.f32.mxu0 %vm84_vm0, %v68_v5 }
   0xf   :  { %27 = vsyncpa [#allocation4], 0  ;;  %6572 = vmatprep.subr.bf16.mxu0 %v6571_v3  ;;  %v69_v7 = vld [vmem:[%s9190_s5 + $0x8] sm:$0xff]  ;;  %v70_v8 = vld [vmem:[%s9190_s5 + $0x10] sm:$0xff]  ;;  %v7049_v10 = vmov 0.0   ;;  %vm7050_vm1 = vmmov 0   ;;  %v507_v26 = vlaneseq }
  0x10   :  { %6574 = vmatpush3.bf16.msra.mxu0 %v6571_v3  ;;  %v71_v9 = vld [vmem:[%s9190_s5 + $0x18] sm:$0xff]  ;;  %6363 = vmatprep.subr.mxu1 %v7049_v10  ;;  %v5787_v11 = vld [vmem:[%s9168_s7] ss:$0 sm:$0xff]  ;;  %s7051_s27 = smov 96   ;;  %vm185_vm2 = vcmask 64512   ;;  %s9191_s28 = sld [smem:[#allocation7_spill]] }
  0x11   :  { %6576 = vmatprep.subr.bf16.mxu0 %v6575_v6  ;;  %6365 = vmatprep.mubr.msk.f32.mxu1 %vm7050_vm1, %v7049_v10  ;;  %v7052_v24 = vmov 1966171168   ;;  %v7253_v28 = vshrl.u32 %v507_v26, 7  ;;  %s7053_s29 = smov 64   ;;  %s7054_s0 = smov 88   ;;  %vm1580_vm3 = vcmask 130112  }
  0x12   :  { %v505_v25 = vunpack.c.l.s4 %v7052_v24  ;;  %s7055_s4 = smov 120   ;;  %s7056_s30 = smov 56   ;;  %vm2269_vm4 = vcmask 195712   ;;  %vm2958_vm5 = vcmask 261312   ;;  %vm5353_vm10 = vcmask 1041409  }
  0x13   :  { %v7263_v32 = vsub.s32 0, %v7253_v28  ;;  %s7057_s22 = smov 80   ;;  %s7058_s23 = smov 112   ;;  %vm5355_vm11 = vcmask 1042434   ;;  %vm5357_vm12 = vcmask 1043459   ;;  %vm5360_vm13 = vcmask 60416  }
  0x14   :  { %6578 = vmatpush3.bf16.msra.mxu0 %v6575_v6  ;;  %v506_v27 = vunpack.c.0.s8 %v505_v25  ;;  %s7059_s1 = smov 48   ;;  %s7060_s24 = smov 72  }
  0x15   :  { %6378 = vmatprep.subr.mxu0 %v7049_v10  ;;  %s7061_s6 = smov 104   ;;  %s7062_s2 = smov 40  }
  0x16   :  { %v7256_v29 = vsub.s32 %v506_v27, %v7253_v28  ;;  %v5800_v30 = vld.sshfl [vmem:[%s9191_s28] sm:$0x33 pattern:$0x75316420]  ;;  %s7063_s25 = smov 8   ;;  %s7064_s26 = smov 16  }
  0x17   :  { %6358 = vmatmul.mubr.msk.f32.vlgmr.msra.gmra.mrb[0].mxu0 %vm84_vm0, %v69_v7  ;;  %v503_v33 = vcombine.high %v5800_v30, %v5800_v30  ;;  %s9193_s7 = sld [smem:[#allocation10_spill]] }
  0x18   :  { %6360 = vmatprep.mubr.msk.f32.mxu0 %vm84_vm0, %v70_v8  ;;  %v510_v31 = vrot.slane %v5800_v30, %v7256_v29 }
  0x19   :  { %v517_v35 = vrot.slane %v503_v33, %v7256_v29 }
  0x1a   :  { %v7266_v34 = vrot.slane %v510_v31, %v7263_v32  ;;  %v518_v41 = vcombine.high %v510_v31, %v510_v31 }
  0x1b   :  { %6361 = vmatmul.mubr.msk.f32.gmra.mrb[2].mxu0 %vm84_vm0, %v71_v9  ;;  %v7271_v40 = vrot.slane %v517_v35, %v7263_v32  ;;  %v519_v46 = vcombine.high %v517_v35, %v517_v35 }
  0x1c   :  { %6380 = vmatprep.mubr.msk.f32.mxu0 %vm7050_vm1, %v7049_v10  ;;  %v7276_v48 = vrot.slane %v518_v41, %v7263_v32 }
  0x1d   :  { %v7279_v55 = vrot.slane %v519_v46, %v7263_v32 }
  0xea   :  { %v6359_v12 = vpop.f32.mrb[0].mxu0 }
  0xeb   :  { %v163_v13 = vpop.f32.mrb[1].mxu0  ;;  %v7219_v17 = vadd.f32 %v6359_v12, %v5787_v11 }
  0xec   :  { %v7216_v14 = vadd.f32 %v5787_v11, %v163_v13 }
  0xee   :  { %v6362_v15 = vpop.f32.mrb[2].mxu0  ;;  %183 = vrot.lane.b32.xlu0 %v7216_v14, %s7051_s27 }
  0xef   :  { %v173_v16 = vpop.f32.mrb[3].mxu0  ;;  %v7223_v19 = vadd.f32 %v6362_v15, %v5787_v11 }
  0xf0   :  { %v7221_v18 = vadd.f32 %v5787_v11, %v173_v16 }
  0xf2   :  { %338 = vrot.lane.b32.xlu1 %v7221_v18, %s7051_s27  ;;  %261 = vrot.lane.b32.xlu0 %v7219_v17, %s7051_s27 }
  0xf6   :  { %415 = vrot.lane.b32.xlu1 %v7223_v19, %s7051_s27 }
 0x160   :  { %v184_v20 = vpop.permute.xlu0 %183 }
 0x161   :  { %6364 = vmatpush3.xpose.msk.msra.mxu1 %vm185_vm2, %v184_v20 }
 0x162   :  { %6368 = vmatprep.subr.mxu1 %v7049_v10 }
 0x164   :  { %v339_v21 = vpop.permute.xlu1 %338  ;;  %6366 = vmatmul.mubr.msk.f32.vlgmr.msra.gmra.mrb[0].mxu1 %vm185_vm2, %v7216_v14  ;;  %v262_v22 = vpop.permute.xlu0 %261 }
 0x165   :  { %6369 = vmatpush3.xpose.msk.msra.mxu1 %vm185_vm2, %v262_v22  ;;  %6370 = vmatprep.mubr.msk.f32.mxu1 %vm7050_vm1, %v7049_v10 }
 0x166   :  { %6373 = vmatprep.subr.mxu1 %v7049_v10 }
 0x168   :  { %v416_v23 = vpop.permute.xlu1 %415  ;;  %6371 = vmatmul.mubr.msk.f32.vlgmr.msra.gmra.mrb[2].mxu1 %vm185_vm2, %v7219_v17 }
 0x169   :  { %6374 = vmatpush3.xpose.msk.msra.mxu1 %vm185_vm2, %v339_v21  ;;  %6379 = vmatpush3.xpose.msk.msra.mxu0 %vm185_vm2, %v416_v23 }
 0x16a   :  { %6375 = vmatprep.mubr.msk.f32.mxu1 %vm7050_vm1, %v7049_v10  ;;  %6383 = vmatprep.subr.mxu1 %v7049_v10 }
 0x16b   :  { %6388 = vmatprep.subr.mxu0 %v7049_v10 }
 0x16c   :  { %6376 = vmatmul.mubr.msk.f32.vlgmr.msra.gmra.mrb[4].mxu1 %vm185_vm2, %v7221_v18  ;;  %6381 = vmatmul.mubr.msk.f32.vlgmr.msra.gmra.mrb[4].mxu0 %vm185_vm2, %v7223_v19 }
 0x16d   :  { %6385 = vmatprep.mubr.msk.f32.mxu1 %vm7050_vm1, %v7049_v10  ;;  %6390 = vmatprep.mubr.msk.f32.mxu0 %vm7050_vm1, %v7049_v10 }
 0x237   :  { %v256_v36 = vpop.f32.mrb[0].mxu1 }
 0x238   :  { %v491_v37 = vmul.f32 0.35355338, %v256_v36  ;;  %v6367_v38 = vpop.f32.mrb[1].mxu1 }
 0x23a   :  { %v540_v39 = vadd.f32 %v7266_v34, %v491_v37 }
 0x23b   :  { %v333_v42 = vpop.f32.mrb[2].mxu1 }
 0x23c   :  { %v492_v43 = vmul.f32 0.35355338, %v333_v42  ;;  %v6372_v44 = vpop.f32.mrb[3].mxu1  ;;  %v544_v45 = vsel %vm185_vm2, %v540_v39, -inf }
 0x23d   :  { %545 = vmax.xlane.f32.xlu0 %v544_v45 }
 0x23e   :  { %v541_v47 = vadd.f32 %v7271_v40, %v492_v43 }
 0x23f   :  { %v410_v49 = vpop.f32.mrb[4].mxu1  ;;  %v487_v50 = vpop.f32.mrb[4].mxu0 }
 0x240   :  { %v493_v51 = vmul.f32 0.35355338, %v410_v49  ;;  %v494_v52 = vmul.f32 0.35355338, %v487_v50  ;;  %v6377_v53 = vpop.f32.mrb[5].mxu1  ;;  %v6382_v54 = vpop.f32.mrb[5].mxu0 }
 0x241   :  { %v547_v56 = vsel %vm185_vm2, %v541_v47, -inf }
 0x242   :  { %548 = vmax.xlane.f32.xlu1 %v547_v56  ;;  %v542_v57 = vadd.f32 %v7276_v48, %v493_v51  ;;  %v543_v59 = vadd.f32 %v7279_v55, %v494_v52 }
 0x244   :  { %v550_v58 = vsel %vm185_vm2, %v542_v57, -inf  ;;  %v553_v60 = vsel %vm185_vm2, %v543_v59, -inf }
 0x245   :  { %551 = vmax.xlane.f32.xlu0 %v550_v58 }
 0x249   :  { %554 = vmax.xlane.f32.xlu0 %v553_v60 }
 0x253   :  { %588 = vrot.lane.b32.xlu1 %v7216_v14, %s7053_s29 }
 0x257   :  { %740 = vrot.lane.b32.xlu1 %v7221_v18, %s7053_s29 }
 0x25b   :  { %816 = vrot.lane.b32.xlu1 %v7223_v19, %s7053_s29 }
 0x25f   :  { %664 = vrot.lane.b32.xlu0 %v7219_v17, %s7053_s29 }
 0x2ca   :  { %v546_v61 = vpop.xlane.xlu0 %545 }
 0x2cb   :  { %v556_v62 = vsub.f32 %v540_v39, %v546_v61 }
 0x2cd   :  { %v560_v63 = vmul.f32 1.442695, %v556_v62 }
 0x2cf   :  { %6941 = vpow2.f32 %v560_v63  ;;  %v549_v0 = vpop.xlane.xlu1 %548 }
 0x2d0   :  { %v557_v3 = vsub.f32 %v541_v47, %v549_v0 }
 0x2d2   :  { %v552_v1 = vpop.xlane.xlu0 %551  ;;  %v562_v7 = vmul.f32 1.442695, %v557_v3 }
 0x2d3   :  { %v589_v2 = vpop.permute.xlu1 %588  ;;  %v558_v20 = vsub.f32 %v542_v57, %v552_v1 }
 0x2d4   :  { %6384 = vmatpush3.msra.mxu1 %v589_v2 }
 0x2d5   :  { %6393 = vmatprep.subr.mxu1 %v7049_v10  ;;  %v564_v21 = vmul.f32 1.442695, %v558_v20 }
 0x2d6   :  { %v555_v4 = vpop.xlane.xlu0 %554 }
 0x2d7   :  { %v559_v5 = vsub.f32 %v543_v59, %v555_v4  ;;  %v741_v24 = vpop.permute.xlu1 %740 }
 0x2d9   :  { %v6942_v6 = vpop.eup %6941  ;;  %v566_v8 = vmul.f32 1.442695, %v559_v5 }
 0x2da   :  { %v665_v9 = vpop.permute.xlu0 %664  ;;  %v568_v11 = vsel %vm185_vm2, %v6942_v6, 0.0 }
 0x2db   :  { %6943 = vpow2.f32 %v566_v8  ;;  %569 = vadd.xlane.f32.xlu1 %v568_v11  ;;  %6389 = vmatpush3.msra.mxu0 %v665_v9  ;;  %v817_v25 = vpop.permute.xlu1 %816 }
 0x2dc   :  { %6398 = vmatprep.subr.mxu0 %v7049_v10  ;;  %6945 = vpow2.f32 %v562_v7 }
 0x2dd   :  { %6947 = vpow2.f32 %v564_v21 }
 0x2e5   :  { %v6944_v12 = vpop.eup %6943 }
 0x2e6   :  { %v577_v13 = vsel %vm185_vm2, %v6944_v12, 0.0  ;;  %v6946_v15 = vpop.eup %6945 }
 0x2e7   :  { %578 = vadd.xlane.f32.xlu0 %v577_v13  ;;  %v571_v16 = vsel %vm185_vm2, %v6946_v15, 0.0  ;;  %v6948_v22 = vpop.eup %6947 }
 0x2e8   :  { %v574_v23 = vsel %vm185_vm2, %v6948_v22, 0.0 }
 0x2eb   :  { %572 = vadd.xlane.f32.xlu0 %v571_v16 }
 0x2ec   :  { %976 = vrot.lane.b32.xlu1 %v7219_v17, %s7054_s0 }
 0x2f0   :  { %974 = vrot.lane.b32.xlu1 %v7219_v17, %s7055_s4 }
 0x301   :  { %898 = vrot.lane.b32.xlu0 %v7216_v14, %s7054_s0 }
 0x305   :  { %896 = vrot.lane.b32.xlu0 %v7216_v14, %s7055_s4 }
 0x309   :  { %1054 = vrot.lane.b32.xlu0 %v7221_v18, %s7054_s0 }
 0x30d   :  { %1052 = vrot.lane.b32.xlu0 %v7221_v18, %s7055_s4 }
 0x314   :  { %575 = vadd.xlane.f32.xlu1 %v574_v23 }
 0x325   :  { %1132 = vrot.lane.b32.xlu1 %v7223_v19, %s7054_s0  ;;  %s9194_s0 = sld [smem:[#allocation8_spill]] }
 0x329   :  { %1130 = vrot.lane.b32.xlu1 %v7223_v19, %s7055_s4 }
 0x368   :  { %v570_v27 = vpop.xlane.xlu1 %569 }
 0x369   :  { %6949 = vrcp.f32 %v570_v27 }
 0x36c   :  { %v977_v41 = vpop.permute.xlu1 %976 }
 0x370   :  { %v975_v42 = vpop.permute.xlu1 %974 }
 0x373   :  { %v6950_v30 = vpop.eup %6949 }
 0x374   :  { %v579_v31 = vpop.xlane.xlu0 %578  ;;  %v581_v33 = vmul.f32 %v6950_v30, %v6942_v6 }
 0x376   :  { %6386 = vmatmul.mubr.msk.f32.vlgmr.msra.gmra.mrb[6].mxu1 %vm185_vm2, %v581_v33 }
 0x377   :  { %6394 = vmatpush3.msra.mxu1 %v741_v24  ;;  %6395 = vmatprep.mubr.msk.f32.mxu1 %vm7050_vm1, %v7049_v10 }
 0x378   :  { %v573_v35 = vpop.xlane.xlu0 %572  ;;  %6403 = vmatprep.subr.mxu1 %v7049_v10 }
 0x379   :  { %6951 = vrcp.f32 %v573_v35 }
 0x37a   :  { %6953 = vrcp.f32 %v579_v31 }
 0x37c   :  { %v899_v44 = vpop.permute.xlu0 %898 }
 0x380   :  { %v897_v47 = vpop.permute.xlu0 %896 }
 0x383   :  { %v6952_v36 = vpop.eup %6951 }
 0x384   :  { %v583_v37 = vmul.f32 %v6952_v36, %v6946_v15  ;;  %v6954_v38 = vpop.eup %6953  ;;  %v1055_v51 = vpop.permute.xlu0 %1054 }
 0x385   :  { %v587_v39 = vmul.f32 %v6954_v38, %v6944_v12 }
 0x386   :  { %6391 = vmatmul.mubr.msk.f32.vlgmr.msra.gmra.mrb[6].mxu0 %vm185_vm2, %v583_v37 }
 0x387   :  { %6399 = vmatpush3.msra.mxu0 %v817_v25  ;;  %6400 = vmatprep.mubr.msk.f32.mxu0 %vm7050_vm1, %v7049_v10 }
 0x388   :  { %6408 = vmatprep.subr.mxu0 %v7049_v10  ;;  %v1053_v52 = vpop.permute.xlu0 %1052 }
 0x38a   :  { %6401 = vmatmul.mubr.msk.f32.vlgmr.msra.gmra.mrb[8].mxu0 %vm185_vm2, %v587_v39 }
 0x38b   :  { %6410 = vmatprep.mubr.msk.f32.mxu0 %vm7050_vm1, %v7049_v10 }
 0x38e   :  { %6409 = vmatpush3.xpose.msk.msra.mxu0 %vm185_vm2, %v977_v41 }
 0x38f   :  { %6418 = vmatprep.subr.mxu0 %v7049_v10 }
 0x391   :  { %6411 = vmatmul.mubr.msk.f32.vlgmr.msra.gmra.mrb[10].mxu0 %vm185_vm2, %v975_v42 }
 0x392   :  { %6420 = vmatprep.mubr.msk.f32.mxu0 %vm7050_vm1, %v7049_v10 }
 0x3a1   :  { %v576_v43 = vpop.xlane.xlu1 %575 }
 0x3a2   :  { %6955 = vrcp.f32 %v576_v43 }
 0x3a5   :  { %v1133_v45 = vpop.permute.xlu1 %1132 }
 0x3a6   :  { %6419 = vmatpush3.xpose.msk.msra.mxu0 %vm185_vm2, %v1133_v45 }
 0x3a7   :  { %6428 = vmatprep.subr.mxu0 %v7049_v10 }
 0x3a9   :  { %v1131_v46 = vpop.permute.xlu1 %1130 }
 0x3aa   :  { %6421 = vmatmul.mubr.msk.f32.vlgmr.msra.gmra.mrb[12].mxu0 %vm185_vm2, %v1131_v46 }
 0x3ab   :  { %6430 = vmatprep.mubr.msk.f32.mxu0 %vm7050_vm1, %v7049_v10 }
 0x3ac   :  { %v6956_v49 = vpop.eup %6955 }
 0x3ad   :  { %v585_v50 = vmul.f32 %v6956_v49, %v6948_v22 }
 0x3af   :  { %6396 = vmatmul.mubr.msk.f32.vlgmr.msra.gmra.mrb[8].mxu1 %vm185_vm2, %v585_v50 }
 0x3b0   :  { %6404 = vmatpush3.xpose.msk.msra.mxu1 %vm185_vm2, %v899_v44  ;;  %6405 = vmatprep.mubr.msk.f32.mxu1 %vm7050_vm1, %v7049_v10 }
 0x3b1   :  { %6413 = vmatprep.subr.mxu1 %v7049_v10 }
 0x3b3   :  { %6406 = vmatmul.mubr.msk.f32.vlgmr.msra.gmra.mrb[10].mxu1 %vm185_vm2, %v897_v47 }
 0x3b4   :  { %6414 = vmatpush3.xpose.msk.msra.mxu1 %vm185_vm2, %v1055_v51  ;;  %6415 = vmatprep.mubr.msk.f32.mxu1 %vm7050_vm1, %v7049_v10 }
 0x3b5   :  { %6423 = vmatprep.subr.mxu1 %v7049_v10 }
 0x3b7   :  { %6416 = vmatmul.mubr.msk.f32.vlgmr.msra.gmra.mrb[12].mxu1 %vm185_vm2, %v1053_v52 }
 0x3b8   :  { %6425 = vmatprep.mubr.msk.f32.mxu1 %vm7050_vm1, %v7049_v10 }
 0x449   :  { %v660_v53 = vpop.f32.mrb[6].mxu1 }
 0x44a   :  { %892 = vst.msk [vmem:[#allocation2] sm:$0xff] %vm185_vm2, %v660_v53  ;;  %v6387_v54 = vpop.f32.mrb[7].mxu1 }
 0x459   :  { %v736_v56 = vpop.f32.mrb[6].mxu0 }
 0x45a   :  { %893 = vst.msk [vmem:[#allocation2 + $0x8] sm:$0xff] %vm185_vm2, %v736_v56  ;;  %v6392_v57 = vpop.f32.mrb[7].mxu0 }
 0x45d   :  { %v888_v58 = vpop.f32.mrb[8].mxu0 }
 0x45e   :  { %895 = vst.msk [vmem:[#allocation2 + $0x18] sm:$0xff] %vm185_vm2, %v888_v58  ;;  %v6402_v59 = vpop.f32.mrb[9].mxu0 }
 0x464   :  { %v1048_v60 = vpop.f32.mrb[10].mxu0 }
 0x465   :  { %v1209_v61 = vmul.f32 0.35355338, %v1048_v60  ;;  %v6412_v62 = vpop.f32.mrb[11].mxu0 }
 0x467   :  { %v1213_v63 = vadd.f32 %v1209_v61, %v7271_v40 }
 0x469   :  { %v1219_v0 = vsel %vm185_vm2, %v1213_v63, -inf }
 0x46a   :  { %1220 = vmax.xlane.f32.xlu1 %v1219_v0 }
 0x47b   :  { %1260 = vrot.lane.b32.xlu1 %v7216_v14, %s7056_s30 }
 0x47d   :  { %v1204_v1 = vpop.f32.mrb[12].mxu0 }
 0x47e   :  { %v6422_v2 = vpop.f32.mrb[13].mxu0  ;;  %v1211_v11 = vmul.f32 0.35355338, %v1204_v1 }
 0x47f   :  { %1412 = vrot.lane.b32.xlu1 %v7221_v18, %s7056_s30 }
 0x480   :  { %v1215_v21 = vadd.f32 %v1211_v11, %v7279_v55 }
 0x482   :  { %v812_v3 = vpop.f32.mrb[8].mxu1  ;;  %v1225_v22 = vsel %vm185_vm2, %v1215_v21, -inf }
 0x483   :  { %894 = vst.msk [vmem:[#allocation2 + $0x10] sm:$0xff] %vm185_vm2, %v812_v3  ;;  %1488 = vrot.lane.b32.xlu1 %v7223_v19, %s7056_s30  ;;  %v6397_v4 = vpop.f32.mrb[9].mxu1 }
 0x486   :  { %v970_v5 = vpop.f32.mrb[10].mxu1 }
 0x487   :  { %1665 = vrot.lane.b32.xlu1 %v7219_v17, %s7057_s22  ;;  %v1208_v6 = vmul.f32 0.35355338, %v970_v5  ;;  %v6407_v7 = vpop.f32.mrb[11].mxu1 }
 0x489   :  { %v1212_v8 = vadd.f32 %v1208_v6, %v7266_v34 }
 0x48a   :  { %v1126_v9 = vpop.f32.mrb[12].mxu1 }
 0x48b   :  { %v1210_v12 = vmul.f32 0.35355338, %v1126_v9  ;;  %v6417_v13 = vpop.f32.mrb[13].mxu1  ;;  %v1216_v15 = vsel %vm185_vm2, %v1212_v8, -inf }
 0x48c   :  { %1217 = vmax.xlane.f32.xlu0 %v1216_v15 }
 0x48d   :  { %v1214_v16 = vadd.f32 %v1210_v12, %v7276_v48 }
 0x48f   :  { %v1222_v20 = vsel %vm185_vm2, %v1214_v16, -inf }
 0x490   :  { %1223 = vmax.xlane.f32.xlu0 %v1222_v20 }
 0x494   :  { %1226 = vmax.xlane.f32.xlu0 %v1225_v22 }
 0x4aa   :  { %1336 = vrot.lane.b32.xlu0 %v7219_v17, %s7056_s30 }
 0x4ae   :  { %1587 = vrot.lane.b32.xlu0 %v7216_v14, %s7057_s22 }
 0x4f7   :  { %v1221_v23 = vpop.xlane.xlu1 %1220 }
 0x4f8   :  { %v1229_v24 = vsub.f32 %v1213_v63, %v1221_v23 }
 0x4fa   :  { %v1234_v25 = vmul.f32 1.442695, %v1229_v24 }
 0x4fb   :  { %v1261_v27 = vpop.permute.xlu1 %1260 }
 0x4fc   :  { %6957 = vpow2.f32 %v1234_v25  ;;  %6424 = vmatpush3.msra.mxu1 %v1261_v27 }
 0x4fd   :  { %6433 = vmatprep.subr.mxu1 %v7049_v10 }
 0x4ff   :  { %v1413_v54 = vpop.permute.xlu1 %1412 }
 0x503   :  { %v1489_v58 = vpop.permute.xlu1 %1488 }
 0x506   :  { %v6958_v30 = vpop.eup %6957 }
 0x507   :  { %v1243_v31 = vsel %vm185_vm2, %v6958_v30, 0.0  ;;  %v1666_v59 = vpop.permute.xlu1 %1665 }
 0x508   :  { %1244 = vadd.xlane.f32.xlu0 %v1243_v31 }
 0x519   :  { %v1218_v33 = vpop.xlane.xlu0 %1217 }
 0x51a   :  { %v1228_v35 = vsub.f32 %v1212_v8, %v1218_v33 }
 0x51c   :  { %v1232_v36 = vmul.f32 1.442695, %v1228_v35 }
 0x51d   :  { %v1224_v37 = vpop.xlane.xlu0 %1223 }
 0x51e   :  { %6959 = vpow2.f32 %v1232_v36  ;;  %v1230_v38 = vsub.f32 %v1214_v16, %v1224_v37 }
 0x520   :  { %v1236_v39 = vmul.f32 1.442695, %v1230_v38 }
 0x521   :  { %v1227_v41 = vpop.xlane.xlu0 %1226 }
 0x522   :  { %6961 = vpow2.f32 %v1236_v39  ;;  %v1231_v42 = vsub.f32 %v1215_v21, %v1227_v41 }
 0x524   :  { %v1238_v43 = vmul.f32 1.442695, %v1231_v42 }
 0x525   :  { %v1337_v44 = vpop.permute.xlu0 %1336 }
 0x526   :  { %6963 = vpow2.f32 %v1238_v43  ;;  %6429 = vmatpush3.msra.mxu0 %v1337_v44 }
 0x527   :  { %6438 = vmatprep.subr.mxu0 %v7049_v10 }
 0x528   :  { %v6960_v45 = vpop.eup %6959 }
 0x529   :  { %v1240_v46 = vsel %vm185_vm2, %v6960_v45, 0.0  ;;  %v1588_v52 = vpop.permute.xlu0 %1587 }
 0x52a   :  { %1241 = vadd.xlane.f32.xlu1 %v1240_v46 }
 0x52c   :  { %v6962_v47 = vpop.eup %6961 }
 0x52d   :  { %v1246_v49 = vsel %vm185_vm2, %v6962_v47, 0.0 }
 0x52e   :  { %1247 = vadd.xlane.f32.xlu1 %v1246_v49 }
 0x530   :  { %v6964_v50 = vpop.eup %6963 }
 0x531   :  { %v1249_v51 = vsel %vm185_vm2, %v6964_v50, 0.0 }
 0x532   :  { %1250 = vadd.xlane.f32.xlu0 %v1249_v51 }
 0x53f   :  { %1663 = vrot.lane.b32.xlu1 %v7219_v17, %s7058_s23 }
 0x543   :  { %1821 = vrot.lane.b32.xlu1 %v7223_v19, %s7057_s22 }
 0x547   :  { %1819 = vrot.lane.b32.xlu1 %v7223_v19, %s7058_s23 }
 0x548   :  { %1585 = vrot.lane.b32.xlu0 %v7216_v14, %s7058_s23 }
 0x54b   :  { %1949 = vrot.lane.b32.xlu1 %v7216_v14, %s7059_s1 }
 0x54c   :  { %1743 = vrot.lane.b32.xlu0 %v7221_v18, %s7057_s22  ;;  %s7065_s22 = smov 24  }
 0x550   :  { %1741 = vrot.lane.b32.xlu0 %v7221_v18, %s7058_s23 }
 0x595   :  { %v1245_v53 = vpop.xlane.xlu0 %1244 }
 0x596   :  { %6965 = vrcp.f32 %v1245_v53 }
 0x5a0   :  { %v6966_v56 = vpop.eup %6965 }
 0x5a1   :  { %v1255_v57 = vmul.f32 %v6966_v56, %v6958_v30 }
 0x5a3   :  { %6431 = vmatmul.mubr.msk.f32.vlgmr.msra.gmra.mrb[14].mxu0 %vm185_vm2, %v1255_v57 }
 0x5a4   :  { %6439 = vmatpush3.msra.mxu0 %v1489_v58  ;;  %6440 = vmatprep.mubr.msk.f32.mxu0 %vm7050_vm1, %v7049_v10 }
 0x5a5   :  { %6448 = vmatprep.subr.mxu0 %v7049_v10 }
 0x5b7   :  { %v1242_v60 = vpop.xlane.xlu1 %1241 }
 0x5b8   :  { %6967 = vrcp.f32 %v1242_v60 }
 0x5bb   :  { %v1248_v61 = vpop.xlane.xlu1 %1247 }
 0x5bc   :  { %6969 = vrcp.f32 %v1248_v61 }
 0x5bf   :  { %v1251_v62 = vpop.xlane.xlu0 %1250  ;;  %v1664_v0 = vpop.permute.xlu1 %1663 }
 0x5c0   :  { %6971 = vrcp.f32 %v1251_v62 }
 0x5c2   :  { %v6968_v63 = vpop.eup %6967 }
 0x5c3   :  { %v1253_v1 = vmul.f32 %v6968_v63, %v6960_v45  ;;  %v1586_v4 = vpop.permute.xlu0 %1585  ;;  %v1822_v5 = vpop.permute.xlu1 %1821 }
 0x5c5   :  { %6426 = vmatmul.mubr.msk.f32.vlgmr.msra.gmra.mrb[14].mxu1 %vm185_vm2, %v1253_v1 }
 0x5c6   :  { %v6970_v2 = vpop.eup %6969  ;;  %6434 = vmatpush3.msra.mxu1 %v1413_v54  ;;  %6435 = vmatprep.mubr.msk.f32.mxu1 %vm7050_vm1, %v7049_v10 }
 0x5c7   :  { %v1257_v3 = vmul.f32 %v6970_v2, %v6962_v47  ;;  %6443 = vmatprep.subr.mxu1 %v7049_v10  ;;  %v1744_v8 = vpop.permute.xlu0 %1743  ;;  %v1820_v9 = vpop.permute.xlu1 %1819 }
 0x5c9   :  { %6436 = vmatmul.mubr.msk.f32.vlgmr.msra.gmra.mrb[16].mxu1 %vm185_vm2, %v1257_v3 }
 0x5ca   :  { %v6972_v6 = vpop.eup %6971  ;;  %6445 = vmatprep.mubr.msk.f32.mxu1 %vm7050_vm1, %v7049_v10 }
 0x5cb   :  { %v1259_v7 = vmul.f32 %v6972_v6, %v6964_v50  ;;  %v1742_v11 = vpop.permute.xlu0 %1741  ;;  %v1950_v12 = vpop.permute.xlu1 %1949 }
 0x5cd   :  { %6444 = vmatpush3.xpose.msk.msra.mxu1 %vm185_vm2, %v1588_v52  ;;  %6441 = vmatmul.mubr.msk.f32.vlgmr.msra.gmra.mrb[16].mxu0 %vm185_vm2, %v1259_v7 }
 0x5ce   :  { %6449 = vmatpush3.xpose.msk.msra.mxu0 %vm185_vm2, %v1666_v59  ;;  %6453 = vmatprep.subr.mxu1 %v7049_v10 }
 0x5cf   :  { %6450 = vmatprep.mubr.msk.f32.mxu0 %vm7050_vm1, %v7049_v10  ;;  %6458 = vmatprep.subr.mxu0 %v7049_v10 }
 0x5d0   :  { %6446 = vmatmul.mubr.msk.f32.vlgmr.msra.gmra.mrb[18].mxu1 %vm185_vm2, %v1586_v4 }
 0x5d1   :  { %6454 = vmatpush3.xpose.msk.msra.mxu1 %vm185_vm2, %v1744_v8  ;;  %6451 = vmatmul.mubr.msk.f32.vlgmr.msra.gmra.mrb[18].mxu0 %vm185_vm2, %v1664_v0 }
 0x5d2   :  { %6459 = vmatpush3.xpose.msk.msra.mxu0 %vm185_vm2, %v1822_v5  ;;  %6455 = vmatprep.mubr.msk.f32.mxu1 %vm7050_vm1, %v7049_v10 }
 0x5d3   :  { %6463 = vmatprep.subr.mxu1 %v7049_v10  ;;  %6460 = vmatprep.mubr.msk.f32.mxu0 %vm7050_vm1, %v7049_v10 }
 0x5d4   :  { %6456 = vmatmul.mubr.msk.f32.vlgmr.msra.gmra.mrb[20].mxu1 %vm185_vm2, %v1742_v11  ;;  %6468 = vmatprep.subr.mxu0 %v7049_v10 }
 0x5d5   :  { %6464 = vmatpush3.msra.mxu1 %v1950_v12  ;;  %6461 = vmatmul.mubr.msk.f32.vlgmr.msra.gmra.mrb[20].mxu0 %vm185_vm2, %v1820_v9 }
 0x5d6   :  { %6465 = vmatprep.mubr.msk.f32.mxu1 %vm7050_vm1, %v7049_v10  ;;  %6473 = vmatprep.subr.mxu1 %v7049_v10 }
 0x5d7   :  { %6470 = vmatprep.mubr.msk.f32.mxu0 %vm7050_vm1, %v7049_v10 }
 0x676   :  { %v7409_v13 = vpop.f32.mrb[14].mxu0 }
 0x677   :  { %v6432_v15 = vpop.f32.mrb[15].mxu0 }
 0x698   :  { %v7411_v16 = vpop.f32.mrb[14].mxu1 }
 0x699   :  { %v6427_v20 = vpop.f32.mrb[15].mxu1 }
 0x69c   :  { %v7413_v21 = vpop.f32.mrb[16].mxu1 }
 0x69d   :  { %v6437_v22 = vpop.f32.mrb[17].mxu1 }
 0x6a0   :  { %v7415_v23 = vpop.f32.mrb[16].mxu0 }
 0x6a1   :  { %v6442_v24 = vpop.f32.mrb[17].mxu0 }
 0x6a3   :  { %v1659_v25 = vpop.f32.mrb[18].mxu1 }
 0x6a4   :  { %v1897_v27 = vmul.f32 0.35355338, %v1659_v25  ;;  %v6447_v30 = vpop.f32.mrb[19].mxu1  ;;  %v1737_v31 = vpop.f32.mrb[18].mxu0 }
 0x6a5   :  { %v1898_v33 = vmul.f32 0.35355338, %v1737_v31  ;;  %v6452_v35 = vpop.f32.mrb[19].mxu0 }
 0x6a6   :  { %v1901_v36 = vadd.f32 %v1897_v27, %v7266_v34 }
 0x6a7   :  { %v1815_v37 = vpop.f32.mrb[20].mxu1  ;;  %v1902_v38 = vadd.f32 %v1898_v33, %v7271_v40 }
 0x6a8   :  { %v1899_v39 = vmul.f32 0.35355338, %v1815_v37  ;;  %v6457_v41 = vpop.f32.mrb[21].mxu1  ;;  %v1893_v42 = vpop.f32.mrb[20].mxu0  ;;  %v1905_v43 = vsel %vm185_vm2, %v1901_v36, -inf }
 0x6a9   :  { %v1900_v44 = vmul.f32 0.35355338, %v1893_v42  ;;  %1906 = vmax.xlane.f32.xlu0 %v1905_v43  ;;  %v6462_v45 = vpop.f32.mrb[21].mxu0  ;;  %v1908_v46 = vsel %vm185_vm2, %v1902_v38, -inf }
 0x6aa   :  { %1909 = vmax.xlane.f32.xlu1 %v1908_v46  ;;  %v1903_v47 = vadd.f32 %v1899_v39, %v7276_v48 }
 0x6ab   :  { %v1904_v50 = vadd.f32 %v1900_v44, %v7279_v55 }
 0x6ac   :  { %v1911_v49 = vsel %vm185_vm2, %v1903_v47, -inf }
 0x6ad   :  { %1912 = vmax.xlane.f32.xlu0 %v1911_v49  ;;  %v1914_v51 = vsel %vm185_vm2, %v1904_v50, -inf }
 0x6b1   :  { %1915 = vmax.xlane.f32.xlu0 %v1914_v51 }
 0x6bb   :  { %2101 = vrot.lane.b32.xlu1 %v7221_v18, %s7059_s1 }
 0x6bf   :  { %2177 = vrot.lane.b32.xlu1 %v7223_v19, %s7059_s1 }
 0x6c7   :  { %2025 = vrot.lane.b32.xlu0 %v7219_v17, %s7059_s1  ;;  %s7068_s1 = smov [#allocation3]  }
 0x736   :  { %v1907_v52 = vpop.xlane.xlu0 %1906 }
 0x737   :  { %v1917_v53 = vsub.f32 %v1901_v36, %v1907_v52  ;;  %v1910_v54 = vpop.xlane.xlu1 %1909 }
 0x738   :  { %v1918_v56 = vsub.f32 %v1902_v38, %v1910_v54 }
 0x739   :  { %v1921_v57 = vmul.f32 1.442695, %v1917_v53 }
 0x73a   :  { %v1923_v58 = vmul.f32 1.442695, %v1918_v56  ;;  %v1913_v59 = vpop.xlane.xlu0 %1912 }
 0x73b   :  { %6973 = vpow2.f32 %v1921_v57  ;;  %v1919_v2 = vsub.f32 %v1903_v47, %v1913_v59  ;;  %v2102_v11 = vpop.permute.xlu1 %2101 }
 0x73c   :  { %6975 = vpow2.f32 %v1923_v58 }
 0x73d   :  { %v1925_v4 = vmul.f32 1.442695, %v1919_v2 }
 0x73e   :  { %v1916_v60 = vpop.xlane.xlu0 %1915 }
 0x73f   :  { %v1920_v3 = vsub.f32 %v1904_v50, %v1916_v60  ;;  %6977 = vpow2.f32 %v1925_v4  ;;  %v2178_v12 = vpop.permute.xlu1 %2177 }
 0x741   :  { %v1927_v5 = vmul.f32 1.442695, %v1920_v3 }
 0x742   :  { %v2026_v61 = vpop.permute.xlu0 %2025 }
 0x743   :  { %6469 = vmatpush3.msra.mxu0 %v2026_v61  ;;  %6979 = vpow2.f32 %v1927_v5 }
 0x744   :  { %6478 = vmatprep.subr.mxu0 %v7049_v10 }
 0x745   :  { %v6974_v62 = vpop.eup %6973 }
 0x746   :  { %v6976_v63 = vpop.eup %6975  ;;  %v1929_v0 = vsel %vm185_vm2, %v6974_v62, 0.0 }
 0x747   :  { %1930 = vadd.xlane.f32.xlu1 %v1929_v0  ;;  %v1932_v1 = vsel %vm185_vm2, %v6976_v63, 0.0 }
 0x748   :  { %1933 = vadd.xlane.f32.xlu0 %v1932_v1 }
 0x749   :  { %v6978_v6 = vpop.eup %6977 }
 0x74a   :  { %v1935_v8 = vsel %vm185_vm2, %v6978_v6, 0.0 }
 0x74d   :  { %v6980_v7 = vpop.eup %6979 }
 0x74e   :  { %v1938_v9 = vsel %vm185_vm2, %v6980_v7, 0.0 }
 0x758   :  { %2354 = vrot.lane.b32.xlu1 %v7219_v17, %s7060_s24 }
 0x75e   :  { %2276 = vrot.lane.b32.xlu0 %v7216_v14, %s7060_s24 }
 0x77c   :  { %1936 = vadd.xlane.f32.xlu1 %v1935_v8 }
 0x77d   :  { %1939 = vadd.xlane.f32.xlu0 %v1938_v9 }
 0x78d   :  { %2352 = vrot.lane.b32.xlu1 %v7219_v17, %s7061_s6 }
 0x791   :  { %2510 = vrot.lane.b32.xlu1 %v7223_v19, %s7060_s24 }
 0x793   :  { %2274 = vrot.lane.b32.xlu0 %v7216_v14, %s7061_s6 }
 0x795   :  { %2508 = vrot.lane.b32.xlu1 %v7223_v19, %s7061_s6 }
 0x797   :  { %2432 = vrot.lane.b32.xlu0 %v7221_v18, %s7060_s24 }
 0x79b   :  { %2430 = vrot.lane.b32.xlu0 %v7221_v18, %s7061_s6 }
 0x7d4   :  { %v1931_v15 = vpop.xlane.xlu1 %1930 }
 0x7d5   :  { %6981 = vrcp.f32 %v1931_v15  ;;  %v1934_v20 = vpop.xlane.xlu0 %1933 }
 0x7d6   :  { %6983 = vrcp.f32 %v1934_v20 }
 0x7d8   :  { %v2355_v30 = vpop.permute.xlu1 %2354 }
 0x7d9   :  { %v2277_v31 = vpop.permute.xlu0 %2276 }
 0x7df   :  { %v6982_v22 = vpop.eup %6981 }
 0x7e0   :  { %v6984_v24 = vpop.eup %6983  ;;  %v1942_v25 = vmul.f32 %v6982_v22, %v6974_v62 }
 0x7e1   :  { %v1944_v27 = vmul.f32 %v6984_v24, %v6976_v63 }
 0x7e2   :  { %6466 = vmatmul.mubr.msk.f32.vlgmr.msra.gmra.mrb[22].mxu1 %vm185_vm2, %v1942_v25 }
 0x7e3   :  { %6474 = vmatpush3.msra.mxu1 %v2102_v11  ;;  %6471 = vmatmul.mubr.msk.f32.vlgmr.msra.gmra.mrb[22].mxu0 %vm185_vm2, %v1944_v27 }
 0x7e4   :  { %6479 = vmatpush3.msra.mxu0 %v2178_v12  ;;  %6475 = vmatprep.mubr.msk.f32.mxu1 %vm7050_vm1, %v7049_v10 }
 0x7e5   :  { %6483 = vmatprep.subr.mxu1 %v7049_v10  ;;  %6480 = vmatprep.mubr.msk.f32.mxu0 %vm7050_vm1, %v7049_v10 }
 0x7e6   :  { %6488 = vmatprep.subr.mxu0 %v7049_v10 }
 0x809   :  { %v1937_v33 = vpop.xlane.xlu1 %1936 }
 0x80a   :  { %6985 = vrcp.f32 %v1937_v33  ;;  %v1940_v35 = vpop.xlane.xlu0 %1939 }
 0x80b   :  { %6987 = vrcp.f32 %v1940_v35 }
 0x80d   :  { %v2353_v37 = vpop.permute.xlu1 %2352 }
 0x80e   :  { %v2275_v36 = vpop.permute.xlu0 %2274 }
 0x811   :  { %v2511_v44 = vpop.permute.xlu1 %2510 }
 0x812   :  { %v2433_v43 = vpop.permute.xlu0 %2432 }
 0x814   :  { %v6986_v38 = vpop.eup %6985 }
 0x815   :  { %v6988_v39 = vpop.eup %6987  ;;  %v1946_v41 = vmul.f32 %v6986_v38, %v6978_v6  ;;  %v2509_v46 = vpop.permute.xlu1 %2508 }
 0x816   :  { %v1948_v42 = vmul.f32 %v6988_v39, %v6980_v7  ;;  %v2431_v45 = vpop.permute.xlu0 %2430 }
 0x817   :  { %6476 = vmatmul.mubr.msk.f32.vlgmr.msra.gmra.mrb[24].mxu1 %vm185_vm2, %v1946_v41 }
 0x818   :  { %6484 = vmatpush3.xpose.msk.msra.mxu1 %vm185_vm2, %v2277_v31  ;;  %6481 = vmatmul.mubr.msk.f32.vlgmr.msra.gmra.mrb[24].mxu0 %vm185_vm2, %v1948_v42 }
 0x819   :  { %6489 = vmatpush3.xpose.msk.msra.mxu0 %vm185_vm2, %v2355_v30  ;;  %6485 = vmatprep.mubr.msk.f32.mxu1 %vm7050_vm1, %v7049_v10 }
 0x81a   :  { %6493 = vmatprep.subr.mxu1 %v7049_v10  ;;  %6490 = vmatprep.mubr.msk.f32.mxu0 %vm7050_vm1, %v7049_v10 }
 0x81b   :  { %6486 = vmatmul.mubr.msk.f32.vlgmr.msra.gmra.mrb[26].mxu1 %vm185_vm2, %v2275_v36  ;;  %6498 = vmatprep.subr.mxu0 %v7049_v10 }
 0x81c   :  { %6494 = vmatpush3.xpose.msk.msra.mxu1 %vm185_vm2, %v2433_v43  ;;  %6491 = vmatmul.mubr.msk.f32.vlgmr.msra.gmra.mrb[26].mxu0 %vm185_vm2, %v2353_v37 }
 0x81d   :  { %6499 = vmatpush3.xpose.msk.msra.mxu0 %vm185_vm2, %v2511_v44  ;;  %6495 = vmatprep.mubr.msk.f32.mxu1 %vm7050_vm1, %v7049_v10 }
 0x81e   :  { %6500 = vmatprep.mubr.msk.f32.mxu0 %vm7050_vm1, %v7049_v10  ;;  %6503 = vmatprep.subr.mxu1 %v7049_v10 }
 0x81f   :  { %6496 = vmatmul.mubr.msk.f32.vlgmr.msra.gmra.mrb[28].mxu1 %vm185_vm2, %v2431_v45  ;;  %6508 = vmatprep.subr.mxu0 %v7049_v10 }
 0x820   :  { %6501 = vmatmul.mubr.msk.f32.vlgmr.msra.gmra.mrb[28].mxu0 %vm185_vm2, %v2509_v46  ;;  %6505 = vmatprep.mubr.msk.f32.mxu1 %vm7050_vm1, %v7049_v10 }
 0x821   :  { %6510 = vmatprep.mubr.msk.f32.mxu0 %vm7050_vm1, %v7049_v10 }
 0x8b5   :  { %v2021_v47 = vpop.f32.mrb[22].mxu1 }
 0x8b6   :  { %v6467_v49 = vpop.f32.mrb[23].mxu1  ;;  %v7478_v50 = vpop.f32.mrb[22].mxu0 }
 0x8b7   :  { %v6472_v51 = vpop.f32.mrb[23].mxu0 }
 0x8ea   :  { %v7480_v52 = vpop.f32.mrb[24].mxu1 }
 0x8eb   :  { %v6477_v53 = vpop.f32.mrb[25].mxu1  ;;  %v7482_v54 = vpop.f32.mrb[24].mxu0 }
 0x8ec   :  { %v6482_v56 = vpop.f32.mrb[25].mxu0 }
 0x8ee   :  { %v2348_v57 = vpop.f32.mrb[26].mxu1 }
 0x8ef   :  { %v2586_v58 = vmul.f32 0.35355338, %v2348_v57  ;;  %v6487_v59 = vpop.f32.mrb[27].mxu1  ;;  %v2426_v60 = vpop.f32.mrb[26].mxu0 }
 0x8f0   :  { %v2587_v61 = vmul.f32 0.35355338, %v2426_v60  ;;  %v6492_v62 = vpop.f32.mrb[27].mxu0 }
 0x8f1   :  { %v2590_v63 = vadd.f32 %v2586_v58, %v7266_v34  ;;  %v2967_v62 = vld [vmem:[%s9169_s8] sm:$0xff] }
 0x8f2   :  { %v2504_v0 = vpop.f32.mrb[28].mxu1  ;;  %v2591_v1 = vadd.f32 %v2587_v61, %v7271_v40 }
 0x8f3   :  { %v2588_v2 = vmul.f32 0.35355338, %v2504_v0  ;;  %v6497_v3 = vpop.f32.mrb[29].mxu1  ;;  %v2582_v4 = vpop.f32.mrb[28].mxu0  ;;  %v2594_v5 = vsel %vm185_vm2, %v2590_v63, -inf }
 0x8f4   :  { %v2589_v6 = vmul.f32 0.35355338, %v2582_v4  ;;  %2595 = vmax.xlane.f32.xlu0 %v2594_v5  ;;  %v6502_v7 = vpop.f32.mrb[29].mxu0  ;;  %v2597_v8 = vsel %vm185_vm2, %v2591_v1, -inf }
 0x8f5   :  { %2598 = vmax.xlane.f32.xlu1 %v2597_v8  ;;  %v2592_v9 = vadd.f32 %v2588_v2, %v7276_v48  ;;  %v2970_v2 = vld [vmem:[%s9169_s8 + $0x18] sm:$0xff] }
 0x8f6   :  { %v2593_v34 = vadd.f32 %v2589_v6, %v7279_v55 }
 0x8f7   :  { %v2600_v11 = vsel %vm185_vm2, %v2592_v9, -inf }
 0x8f8   :  { %2601 = vmax.xlane.f32.xlu0 %v2600_v11  ;;  %v2603_v40 = vsel %vm185_vm2, %v2593_v34, -inf }
 0x8fc   :  { %2604 = vmax.xlane.f32.xlu0 %v2603_v40 }
 0x981   :  { %v2596_v12 = vpop.xlane.xlu0 %2595 }
 0x982   :  { %v2606_v15 = vsub.f32 %v2590_v63, %v2596_v12  ;;  %v2599_v20 = vpop.xlane.xlu1 %2598  ;;  %v2968_v63 = vld [vmem:[%s9169_s8 + $0x8] sm:$0xff] }
 0x983   :  { %v2607_v22 = vsub.f32 %v2591_v1, %v2599_v20  ;;  %v6579_v0 = vpack.c.bf16 %v2968_v63, %v2967_v62  ;;  %v2969_v1 = vld [vmem:[%s9169_s8 + $0x10] sm:$0xff]  ;;  %v3157_v62 = vld [vmem:[%s9171_s10 + $0x18] sm:$0xff]  ;;  %s9195_s8 = sld [smem:[#allocation11_spill]] }
 0x984   :  { %v2610_v24 = vmul.f32 1.442695, %v2606_v15  ;;  %v6583_v3 = vpack.c.bf16 %v2970_v2, %v2969_v1  ;;  %v3154_v1 = vld [vmem:[%s9171_s10] sm:$0xff] }
 0x985   :  { %v2612_v25 = vmul.f32 1.442695, %v2607_v22  ;;  %v2602_v27 = vpop.xlane.xlu0 %2601  ;;  %v3170_v2 = vld [vmem:[%s9171_s10 + $0x80] sm:$0xff] }
 0x986   :  { %6989 = vpow2.f32 %v2610_v24  ;;  %v2608_v39 = vsub.f32 %v2592_v9, %v2602_v27 }
 0x987   :  { %6991 = vpow2.f32 %v2612_v25 }
 0x988   :  { %v2614_v41 = vmul.f32 1.442695, %v2608_v39 }
 0x989   :  { %v2605_v30 = vpop.xlane.xlu0 %2604 }
 0x98a   :  { %v2609_v31 = vsub.f32 %v2593_v34, %v2605_v30  ;;  %v5841_v30 = vld [vmem:[%s9170_s9] ss:$0 sm:$0xff] }
 0x98c   :  { %v2616_v48 = vmul.f32 1.442695, %v2609_v31 }
 0x98e   :  { %6993 = vpow2.f32 %v2616_v48 }
 0x98f   :  { %6995 = vpow2.f32 %v2614_v41 }
 0x990   :  { %v6990_v33 = vpop.eup %6989 }
 0x991   :  { %v6992_v35 = vpop.eup %6991  ;;  %v2618_v55 = vsel %vm185_vm2, %v6990_v33, 0.0 }
 0x992   :  { %2619 = vadd.xlane.f32.xlu1 %v2618_v55  ;;  %v2621_v36 = vsel %vm185_vm2, %v6992_v35, 0.0  ;;  %v7021_v55 = vld [vmem:[%s9190_s5 + $0x8] sm:$0xff] }
 0x993   :  { %2622 = vadd.xlane.f32.xlu0 %v2621_v36 }
 0x998   :  { %v6994_v37 = vpop.eup %6993 }
 0x999   :  { %v2627_v38 = vsel %vm185_vm2, %v6994_v37, 0.0  ;;  %v6996_v42 = vpop.eup %6995 }
 0x99a   :  { %2628 = vadd.xlane.f32.xlu0 %v2627_v38  ;;  %v2624_v43 = vsel %vm185_vm2, %v6996_v42, 0.0 }
 0x9a3   :  { %2638 = vrot.lane.b32.xlu1 %v7216_v14, %s7062_s2 }
 0x9b0   :  { %2714 = vrot.lane.b32.xlu0 %v7219_v17, %s7062_s2 }
 0x9b4   :  { %1568 = vrot.lane.b32.xlu0 %v7411_v16, %s7063_s25 }
 0x9b8   :  { %2257 = vrot.lane.b32.xlu0 %v2021_v47, %s7064_s26 }
 0x9c7   :  { %2625 = vadd.xlane.f32.xlu1 %v2624_v43 }
 0x9d8   :  { %2790 = vrot.lane.b32.xlu1 %v7221_v18, %s7062_s2 }
 0x9dc   :  { %2866 = vrot.lane.b32.xlu1 %v7223_v19, %s7062_s2 }
 0x9e0   :  { %1570 = vrot.lane.b32.xlu1 %v7409_v13, %s7063_s25 }
 0x9e4   :  { %2259 = vrot.lane.b32.xlu1 %v7478_v50, %s7064_s26 }
 0xa1f   :  { %v2620_v14 = vpop.xlane.xlu1 %2619 }
 0xa20   :  { %6997 = vrcp.f32 %v2620_v14  ;;  %v2623_v17 = vpop.xlane.xlu0 %2622 }
 0xa21   :  { %6999 = vrcp.f32 %v2623_v17 }
 0xa23   :  { %v2639_v16 = vpop.permute.xlu1 %2638 }
 0xa24   :  { %6504 = vmatpush3.msra.mxu1 %v2639_v16  ;;  %v7023_v16 = vld [vmem:[%s9190_s5 + $0x10] sm:$0xff] }
 0xa25   :  { %6513 = vmatprep.subr.mxu1 %v7049_v10 }
 0xa27   :  { %v2629_v44 = vpop.xlane.xlu0 %2628 }
 0xa28   :  { %7001 = vrcp.f32 %v2629_v44 }
 0xa2a   :  { %v6998_v45 = vpop.eup %6997 }
 0xa2b   :  { %v7000_v46 = vpop.eup %6999  ;;  %v2631_v18 = vmul.f32 %v6998_v45, %v6990_v33  ;;  %v2715_v47 = vpop.permute.xlu0 %2714 }
 0xa2c   :  { %v2633_v19 = vmul.f32 %v7000_v46, %v6992_v35  ;;  %6509 = vmatpush3.msra.mxu0 %v2715_v47  ;;  %v7024_v46 = vld [vmem:[%s9190_s5 + $0x18] sm:$0xff] }
 0xa2d   :  { %6506 = vmatmul.mubr.msk.f32.vlgmr.msra.gmra.mrb[30].mxu1 %vm185_vm2, %v2631_v18  ;;  %6518 = vmatprep.subr.mxu0 %v7049_v10 }
 0xa2e   :  { %6511 = vmatmul.mubr.msk.f32.vlgmr.msra.gmra.mrb[30].mxu0 %vm185_vm2, %v2633_v19  ;;  %6515 = vmatprep.mubr.msk.f32.mxu1 %vm7050_vm1, %v7049_v10 }
 0xa2f   :  { %v1569_v13 = vpop.permute.xlu0 %1568  ;;  %6520 = vmatprep.mubr.msk.f32.mxu0 %vm7050_vm1, %v7049_v10 }
 0xa30   :  { %1581 = vst.msk [vmem:[#allocation2] sm:$0xff] %vm1580_vm3, %v1569_v13 }
 0xa32   :  { %v7002_v53 = vpop.eup %7001 }
 0xa33   :  { %v2258_v49 = vpop.permute.xlu0 %2257  ;;  %v2637_v56 = vmul.f32 %v7002_v53, %v6994_v37  ;;  %v7022_v37 = vld [vmem:[%s9190_s5] sm:$0xff] }
 0xa34   :  { %2270 = vst.msk [vmem:[#allocation2] sm:$0xff] %vm2269_vm4, %v2258_v49 }
 0xa54   :  { %v2626_v50 = vpop.xlane.xlu1 %2625 }
 0xa55   :  { %7003 = vrcp.f32 %v2626_v50 }
 0xa58   :  { %v2791_v51 = vpop.permute.xlu1 %2790 }
 0xa59   :  { %6514 = vmatpush3.msra.mxu1 %v2791_v51 }
 0xa5a   :  { %6580 = vmatprep.subr.bf16.mxu1 %v6579_v0 }
 0xa5c   :  { %v2867_v57 = vpop.permute.xlu1 %2866 }
 0xa5d   :  { %6519 = vmatpush3.msra.mxu0 %v2867_v57 }
 0xa5e   :  { %6521 = vmatmul.mubr.msk.f32.vlgmr.msra.gmra.mrb[32].mxu0 %vm185_vm2, %v2637_v56 }
 0xa5f   :  { %v7004_v58 = vpop.eup %7003  ;;  %3378 = vmatprep.mubr.f32.mxu0 %v7049_v10 }
 0xa60   :  { %v2635_v59 = vmul.f32 %v7004_v58, %v6996_v42  ;;  %v1571_v60 = vpop.permute.xlu1 %1570 }
 0xa61   :  { %1582 = vst.msk [vmem:[#allocation2 + $0x8] sm:$0xff] %vm1580_vm3, %v1571_v60  ;;  %v3155_v60 = vld [vmem:[%s9171_s10 + $0x8] sm:$0xff] }
 0xa62   :  { %6516 = vmatmul.mubr.msk.f32.vlgmr.msra.gmra.mrb[32].mxu1 %vm185_vm2, %v2635_v59 }
 0xa63   :  { %6582 = vmatpush3.bf16.msra.mxu1 %v6579_v0  ;;  %v3173_v0 = vld [vmem:[%s9171_s10 + $0x98] sm:$0xff] }
 0xa64   :  { %v2260_v61 = vpop.permute.xlu1 %2259  ;;  %6584 = vmatprep.subr.bf16.mxu1 %v6583_v3 }
 0xa65   :  { %2271 = vst.msk [vmem:[#allocation2 + $0x8] sm:$0xff] %vm2269_vm4, %v2260_v61  ;;  %v3171_v61 = vld [vmem:[%s9171_s10 + $0x88] sm:$0xff] }
 0xa66   :  { %v6587_v63 = vpack.c.bf16 %v3171_v61, %v3155_v60  ;;  %v3193_v60 = vld [vmem:[%s9171_s10 + $0x138] sm:$0xff] }
 0xa67   :  { %6586 = vmatpush3.bf16.msra.mxu1 %v6583_v3  ;;  %v6595_v3 = vpack.c.bf16 %v3173_v0, %v3157_v62  ;;  %v3209_v61 = vld [vmem:[%s9171_s10 + $0x1b8] sm:$0xff] }
 0xa68   :  { %6588 = vmatprep.subr.bf16.mxu0 %v6587_v63 }
 0xa69   :  { %6596 = vmatprep.subr.bf16.mxu1 %v6595_v3  ;;  %v3206_v3 = vld [vmem:[%s9171_s10 + $0x1a0] sm:$0xff] }
 0xb00   :  { %v2710_v4 = vpop.f32.mrb[30].mxu1 }
 0xb01   :  { %v6507_v5 = vpop.f32.mrb[31].mxu1  ;;  %2946 = vrot.lane.b32.xlu0 %v2710_v4, %s7065_s22  ;;  %v2786_v6 = vpop.f32.mrb[30].mxu0  ;;  %v6589_v4 = vpack.c.bf16 %v3170_v2, %v3154_v1  ;;  %v3190_v2 = vld [vmem:[%s9171_s10 + $0x120] sm:$0xff] }
 0xb02   :  { %2948 = vrot.lane.b32.xlu1 %v2786_v6, %s7065_s22  ;;  %v6512_v7 = vpop.f32.mrb[31].mxu0  ;;  %v3156_v5 = vld [vmem:[%s9171_s10 + $0x10] sm:$0xff] }
 0xb03   :  { %v3172_v6 = vld [vmem:[%s9171_s10 + $0x90] sm:$0xff]  ;;  %6590 = vmatpush1.bf16.msra.mxu0 %v6589_v4 }
 0xb04   :  { %v6597_v7 = vpack.c.bf16 %v3172_v6, %v3156_v5  ;;  %v6615_v5 = vpack.c.bf16 %v3209_v61, %v3193_v60  ;;  %v3192_v6 = vld [vmem:[%s9171_s10 + $0x130] sm:$0xff]  ;;  %v3166_v60 = vld [vmem:[%s9171_s10 + $0x60] sm:$0xff] }
 0xb05   :  { %1572 = vrot.lane.b32.xlu0 %v7413_v21, %s7063_s25  ;;  %v3182_v61 = vld [vmem:[%s9171_s10 + $0xe0] sm:$0xff] }
 0xb06   :  { %1574 = vrot.lane.b32.xlu1 %v7415_v23, %s7063_s25 }
 0xb09   :  { %2261 = vrot.lane.b32.xlu0 %v7480_v52, %s7064_s26 }
 0xb0a   :  { %2263 = vrot.lane.b32.xlu1 %v7482_v54, %s7064_s26  ;;  %s9192_s26 = sld [smem:[#allocation9_spill]] }
 0xb31   :  { %v2938_v8 = vpop.f32.mrb[32].mxu0 }
 0xb32   :  { %2952 = vrot.lane.b32.xlu1 %v2938_v8, %s7065_s22  ;;  %v6522_v9 = vpop.f32.mrb[33].mxu0  ;;  %v3187_v8 = vld [vmem:[%s9171_s10 + $0x108] sm:$0xff] }
 0xb33   :  { %v3203_v9 = vld [vmem:[%s9171_s10 + $0x188] sm:$0xff] }
 0xb35   :  { %v2862_v11 = vpop.f32.mrb[32].mxu1 }
 0xb36   :  { %v6517_v34 = vpop.f32.mrb[33].mxu1  ;;  %2950 = vrot.lane.b32.xlu0 %v2862_v11, %s7065_s22  ;;  %v3189_v11 = vld [vmem:[%s9171_s10 + $0x118] sm:$0xff] }
 0xb37   :  { %v6591_v34 = vpack.c.bf16 %v3203_v9, %v3187_v8  ;;  %v3163_v8 = vld [vmem:[%s9171_s10 + $0x48] sm:$0xff] }
 0xb38   :  { %v3179_v9 = vld [vmem:[%s9171_s10 + $0xc8] sm:$0xff] }
 0xb39   :  { %6592 = vmatprep.subr.bf16.mxu0 %v6591_v34  ;;  %v3181_v34 = vld [vmem:[%s9171_s10 + $0xd8] sm:$0xff] }
 0xb73   :  { %v2947_v40 = vpop.permute.xlu0 %2946 }
 0xb74   :  { %2959 = vst.msk [vmem:[#allocation2] sm:$0xff] %vm2958_vm5, %v2947_v40  ;;  %v2949_v21 = vpop.permute.xlu1 %2948  ;;  %v3205_v40 = vld [vmem:[%s9171_s10 + $0x198] sm:$0xff] }
 0xb75   :  { %2960 = vst.msk [vmem:[#allocation2 + $0x8] sm:$0xff] %vm2958_vm5, %v2949_v21  ;;  %v3186_v21 = vld [vmem:[%s9171_s10 + $0x100] sm:$0xff] }
 0xb77   :  { %v1573_v23 = vpop.permute.xlu0 %1572 }
 0xb78   :  { %1583 = vst.msk [vmem:[#allocation2 + $0x10] sm:$0xff] %vm1580_vm3, %v1573_v23  ;;  %v1575_v52 = vpop.permute.xlu1 %1574  ;;  %v3202_v23 = vld [vmem:[%s9171_s10 + $0x180] sm:$0xff] }
 0xb79   :  { %1584 = vst.msk [vmem:[#allocation2 + $0x18] sm:$0xff] %vm1580_vm3, %v1575_v52  ;;  %v6599_v52 = vpack.c.bf16 %v3205_v40, %v3189_v11  ;;  %v3165_v11 = vld [vmem:[%s9171_s10 + $0x58] sm:$0xff] }
 0xb7b   :  { %v2262_v54 = vpop.permute.xlu0 %2261  ;;  %v2963_v12 = vld [vmem:[#allocation2] sm:$0xff] }
 0xb7c   :  { %2272 = vst.msk [vmem:[#allocation2 + $0x10] sm:$0xff] %vm2269_vm4, %v2262_v54  ;;  %6531 = vmatprep.mubr.msk.f32.mxu1 %vm84_vm0, %v2963_v12  ;;  %v2264_v15 = vpop.permute.xlu1 %2263  ;;  %v2964_v20 = vld [vmem:[#allocation2 + $0x8] sm:$0xff]  ;;  %v6593_v54 = vpack.c.bf16 %v3202_v23, %v3186_v21  ;;  %v3188_v12 = vld [vmem:[%s9171_s10 + $0x110] sm:$0xff]  ;;  %v6609_v21 = vpack.c.bf16 %v3206_v3, %v3190_v2  ;;  %v3201_v3 = vld [vmem:[%s9171_s10 + $0x178] sm:$0xff] }
 0xb7d   :  { %2273 = vst.msk [vmem:[#allocation2 + $0x18] sm:$0xff] %vm2269_vm4, %v2264_v15  ;;  %6532 = vmatmul.mubr.msk.f32.vlgmr.msra.gmra.mrb[34].mxu1 %vm84_vm0, %v2964_v20  ;;  %v3204_v15 = vld [vmem:[%s9171_s10 + $0x190] sm:$0xff]  ;;  %v3215_v2 = vld [vmem:[%s9171_s10 + $0x1e8] sm:$0xff] }
 0xb7e   :  { %6598 = vmatpush1.bf16.msra.mxu1 %v6597_v7  ;;  %v6601_v20 = vpack.c.bf16 %v3204_v15, %v3188_v12  ;;  %6594 = vmatpush1.bf16.msra.mxu0 %v6593_v54  ;;  %v3208_v7 = vld [vmem:[%s9171_s10 + $0x1b0] sm:$0xff]  ;;  %v6627_v54 = vpack.c.bf16 %v3181_v34, %v3165_v11 }
 0xb7f   :  { %6600 = vmatprep.subr.bf16.mxu1 %v6599_v52  ;;  %v6617_v23 = vpack.c.bf16 %v3208_v7, %v3192_v6  ;;  %v6619_v52 = vpack.c.bf16 %v3179_v9, %v3163_v8  ;;  %v3198_v7 = vld [vmem:[%s9171_s10 + $0x160] sm:$0xff]  ;;  %v3200_v34 = vld [vmem:[%s9171_s10 + $0x170] sm:$0xff] }
 0xb80   :  { %v3214_v8 = vld [vmem:[%s9171_s10 + $0x1e0] sm:$0xff] }
 0xb82   :  { %6602 = vmatpush1.bf16.msra.mxu1 %v6601_v20 }
 0xba4   :  { %v2953_v22 = vpop.permute.xlu1 %2952 }
 0xba5   :  { %2962 = vst.msk [vmem:[#allocation2 + $0x18] sm:$0xff] %vm2958_vm5, %v2953_v22 }
 0xba8   :  { %v2951_v24 = vpop.permute.xlu0 %2950 }
 0xba9   :  { %2961 = vst.msk [vmem:[#allocation2 + $0x10] sm:$0xff] %vm2958_vm5, %v2951_v24 }
 0xbac   :  { %v2966_v27 = vld [vmem:[#allocation2 + $0x18] sm:$0xff] }
 0xbb0   :  { %v2965_v25 = vld [vmem:[#allocation2 + $0x10] sm:$0xff] }
 0xbb1   :  { %6534 = vmatprep.mubr.msk.f32.mxu1 %vm84_vm0, %v2965_v25 }
 0xbb2   :  { %6535 = vmatmul.mubr.msk.f32.gmra.mrb[36].mxu1 %vm84_vm0, %v2966_v27 }
 0xbb3   :  { %3467 = vmatprep.mubr.f32.mxu1 %v7049_v10 }
 0xc50   :  { %v6533_v31 = vpop.f32.mrb[34].mxu1 }
 0xc51   :  { %v3062_v48 = vadd.f32 %v6533_v31, %v5841_v30  ;;  %v3056_v33 = vpop.f32.mrb[35].mxu1 }
 0xc52   :  { %v3057_v35 = vadd.f32 %v5841_v30, %v3056_v33 }
 0xc53   :  { %v3076_v36 = vadd.f32 %v7021_v55, %v3062_v48 }
 0xc54   :  { %v3075_v38 = vadd.f32 %v7022_v37, %v3057_v35  ;;  %v3175_v37 = vld [vmem:[%s9171_s10 + $0xa8] sm:$0xff] }
 0xc55   :  { %v3084_v39 = vsel %vm84_vm0, %v3076_v36, 0.0 }
 0xc56   :  { %3085 = vadd.xlane.f32.xlu1 %v3084_v39  ;;  %v3081_v41 = vsel %vm84_vm0, %v3075_v38, 0.0 }
 0xc57   :  { %3082 = vadd.xlane.f32.xlu0 %v3081_v41  ;;  %v3177_v41 = vld [vmem:[%s9171_s10 + $0xb8] sm:$0xff] }
 0xc85   :  { %v6536_v42 = vpop.f32.mrb[36].mxu1 }
 0xc86   :  { %v3066_v43 = vpop.f32.mrb[37].mxu1  ;;  %v3072_v14 = vadd.f32 %v6536_v42, %v5841_v30 }
 0xc87   :  { %v3067_v17 = vadd.f32 %v5841_v30, %v3066_v43 }
 0xc88   :  { %v3078_v18 = vadd.f32 %v7024_v46, %v3072_v14 }
 0xc89   :  { %v3077_v44 = vadd.f32 %v7023_v16, %v3067_v17 }
 0xc8a   :  { %v3090_v47 = vsel %vm84_vm0, %v3078_v18, 0.0 }
 0xc8b   :  { %v3087_v45 = vsel %vm84_vm0, %v3077_v44, 0.0 }
 0xc8c   :  { %3088 = vadd.xlane.f32.xlu0 %v3087_v45 }
 0xc90   :  { %3091 = vadd.xlane.f32.xlu0 %v3090_v47  ;;  %v5846_v47 = vld [vmem:[%s9175_s14] ss:$0 sm:$0xff] }
 0xce3   :  { %v3086_v19 = vpop.xlane.xlu1 %3085 }
 0xce4   :  { %v3095_v13 = vmul.f32 0.03125, %v3086_v19  ;;  %v3083_v49 = vpop.xlane.xlu0 %3082  ;;  %v7660_v19 = vld [vmem:[%s9176_s15] ss:$0 sm:$0xff] }
 0xce5   :  { %v3094_v50 = vmul.f32 0.03125, %v3083_v49 }
 0xce6   :  { %v7574_v51 = vsub.f32 %v3076_v36, %v3095_v13  ;;  %v3159_v36 = vld [vmem:[%s9171_s10 + $0x28] sm:$0xff] }
 0xce7   :  { %v7576_v53 = vsub.f32 %v3075_v38, %v3094_v50  ;;  %v3161_v38 = vld [vmem:[%s9171_s10 + $0x38] sm:$0xff]  ;;  %v6603_v39 = vpack.c.bf16 %v3175_v37, %v3159_v36  ;;  %v3158_v50 = vld [vmem:[%s9171_s10 + $0x20] sm:$0xff] }
 0xce8   :  { %v3103_v56 = vmul.f32 %v7574_v51, %v7574_v51  ;;  %v6611_v42 = vpack.c.bf16 %v3177_v41, %v3161_v38  ;;  %v3162_v38 = vld [vmem:[%s9171_s10 + $0x40] sm:$0xff]  ;;  %v3180_v41 = vld [vmem:[%s9171_s10 + $0xd0] sm:$0xff] }
 0xce9   :  { %v3102_v57 = vmul.f32 %v7576_v53, %v7576_v53  ;;  %6604 = vmatprep.subr.bf16.mxu0 %v6603_v39  ;;  %v3164_v39 = vld [vmem:[%s9171_s10 + $0x50] sm:$0xff] }
 0xcea   :  { %v3109_v58 = vsel %vm84_vm0, %v3103_v56, 0.0  ;;  %6612 = vmatprep.subr.bf16.mxu1 %v6611_v42  ;;  %v3174_v56 = vld [vmem:[%s9171_s10 + $0xa0] sm:$0xff]  ;;  %v3195_v42 = vld [vmem:[%s9171_s10 + $0x148] sm:$0xff] }
 0xceb   :  { %3110 = vadd.xlane.f32.xlu0 %v3109_v58  ;;  %v3106_v59 = vsel %vm84_vm0, %v3102_v57, 0.0  ;;  %v3160_v57 = vld [vmem:[%s9171_s10 + $0x30] sm:$0xff]  ;;  %v6605_v0 = vpack.c.bf16 %v3174_v56, %v3158_v50  ;;  %v3183_v50 = vld [vmem:[%s9171_s10 + $0xe8] sm:$0xff]  ;;  %v3169_v56 = vld [vmem:[%s9171_s10 + $0x78] sm:$0xff] }
 0xcec   :  { %3107 = vadd.xlane.f32.xlu1 %v3106_v59  ;;  %v3176_v58 = vld [vmem:[%s9171_s10 + $0xb0] sm:$0xff]  ;;  %v3207_v59 = vld [vmem:[%s9171_s10 + $0x1a8] sm:$0xff] }
 0xced   :  { %v6613_v1 = vpack.c.bf16 %v3176_v58, %v3160_v57  ;;  %v3185_v57 = vld [vmem:[%s9171_s10 + $0xf8] sm:$0xff] }
 0xd19   :  { %v3089_v22 = vpop.xlane.xlu0 %3088 }
 0xd1a   :  { %v3096_v24 = vmul.f32 0.03125, %v3089_v22 }
 0xd1c   :  { %v7632_v25 = vsub.f32 %v3077_v44, %v3096_v24 }
 0xd1d   :  { %v3092_v27 = vpop.xlane.xlu0 %3091 }
 0xd1e   :  { %v3097_v30 = vmul.f32 0.03125, %v3092_v27  ;;  %v3104_v31 = vmul.f32 %v7632_v25, %v7632_v25 }
 0xd20   :  { %v7636_v48 = vsub.f32 %v3078_v18, %v3097_v30  ;;  %v3112_v33 = vsel %vm84_vm0, %v3104_v31, 0.0 }
 0xd21   :  { %3113 = vadd.xlane.f32.xlu1 %v3112_v33 }
 0xd22   :  { %v3105_v35 = vmul.f32 %v7636_v48, %v7636_v48 }
 0xd24   :  { %v3115_v55 = vsel %vm84_vm0, %v3105_v35, 0.0 }
 0xd25   :  { %3116 = vadd.xlane.f32.xlu0 %v3115_v55 }
 0xd78   :  { %v3111_v43 = vpop.xlane.xlu0 %3110 }
 0xd79   :  { %v3119_v14 = vmul.f32 0.03125, %v3111_v43  ;;  %v3108_v17 = vpop.xlane.xlu1 %3107  ;;  %v3211_v43 = vld [vmem:[%s9171_s10 + $0x1c8] sm:$0xff] }
 0xd7a   :  { %v3118_v16 = vmul.f32 0.03125, %v3108_v17  ;;  %v3213_v17 = vld [vmem:[%s9171_s10 + $0x1d8] sm:$0xff] }
 0xd7b   :  { %v3123_v44 = vadd.f32 1e-05, %v3119_v14  ;;  %v3197_v14 = vld [vmem:[%s9171_s10 + $0x158] sm:$0xff] }
 0xd7c   :  { %v3122_v45 = vadd.f32 1e-05, %v3118_v16 }
 0xd7d   :  { %7005 = vrsqrt.f32 %v3123_v44  ;;  %v6629_v44 = vpack.c.bf16 %v3180_v41, %v3164_v39  ;;  %v4092_v41 = vld [vmem:[%s9173_s12 + $0x10] sm:$0xff] }
 0xd7e   :  { %7007 = vrsqrt.f32 %v3122_v45  ;;  %v3194_v45 = vld [vmem:[%s9171_s10 + $0x140] sm:$0xff] }
 0xd87   :  { %v7006_v46 = vpop.eup %7005 }
 0xd88   :  { %v7008_v18 = vpop.eup %7007  ;;  %v3131_v13 = vmul.f32 %v7006_v46, %v7574_v51  ;;  %v3191_v51 = vld [vmem:[%s9171_s10 + $0x128] sm:$0xff]  ;;  %v3210_v46 = vld [vmem:[%s9171_s10 + $0x1c0] sm:$0xff] }
 0xd89   :  { %v3130_v49 = vmul.f32 %v7008_v18, %v7576_v53  ;;  %v6607_v4 = vpack.c.bf16 %v3207_v59, %v3191_v51  ;;  %v6623_v18 = vpack.c.bf16 %v3211_v43, %v3195_v42  ;;  %v6625_v58 = vpack.c.bf16 %v3210_v46, %v3194_v45  ;;  %v4093_v42 = vld [vmem:[%s9173_s12 + $0x18] sm:$0xff]  ;;  %v4111_v45 = vld [vmem:[%s9173_s12 + $0xa8] sm:$0xff]  ;;  %v4142_v46 = vld [vmem:[%s9173_s12 + $0x1a0] sm:$0xff] }
 0xd8a   :  { %v3141_v62 = vmul.f32 %v5846_v47, %v3131_v13  ;;  %v3212_v13 = vld [vmem:[%s9171_s10 + $0x1d0] sm:$0xff]  ;;  %v6643_v59 = vpack.c.bf16 %v3185_v57, %v3169_v56  ;;  %v4126_v57 = vld [vmem:[%s9173_s12 + $0x120] sm:$0xff] }
 0xd8b   :  { %v3140_v53 = vmul.f32 %v5846_v47, %v3130_v49  ;;  %v3167_v49 = vld [vmem:[%s9171_s10 + $0x68] sm:$0xff] }
 0xd8c   :  { %v7722_v40 = vadd.f32 %v7660_v19, %v3141_v62  ;;  %v3168_v62 = vld [vmem:[%s9171_s10 + $0x70] sm:$0xff] }
 0xd8d   :  { %v7689_v63 = vadd.f32 %v7660_v19, %v3140_v53  ;;  %v6635_v53 = vpack.c.bf16 %v3183_v50, %v3167_v49  ;;  %v4095_v49 = vld [vmem:[%s9173_s12 + $0x28] sm:$0xff] }
 0xd8f   :  { %5848 = vmatmul.mubr.msk.f32.vlgmr.msra.gmra.mrb[34].mxu0 %vm84_vm0, %v7689_v63  ;;  %5852 = vmatmul.mubr.msk.f32.vlgmr.msra.gmra.mrb[38].mxu1 %vm84_vm0, %v7689_v63 }
 0xd90   :  { %3384 = vmatprep.mubr.f32.mxu0 %v7049_v10  ;;  %3473 = vmatprep.mubr.f32.mxu1 %v7049_v10 }
 0xd91   :  { %6606 = vmatpush1.bf16.msra.mxu0 %v6605_v0  ;;  %6614 = vmatpush1.bf16.msra.mxu1 %v6613_v1  ;;  %v3184_v0 = vld [vmem:[%s9171_s10 + $0xf0] sm:$0xff]  ;;  %v3199_v1 = vld [vmem:[%s9171_s10 + $0x168] sm:$0xff] }
 0xd92   :  { %6608 = vmatprep.subr.bf16.mxu0 %v6607_v4  ;;  %6616 = vmatprep.subr.bf16.mxu1 %v6615_v5  ;;  %v3217_v4 = vld [vmem:[%s9171_s10 + $0x1f8] sm:$0xff]  ;;  %v6637_v5 = vpack.c.bf16 %v3182_v61, %v3166_v60  ;;  %v6645_v6 = vpack.c.bf16 %v3184_v0, %v3168_v62  ;;  %v6639_v9 = vpack.c.bf16 %v3215_v2, %v3199_v1  ;;  %v4096_v0 = vld [vmem:[%s9173_s12 + $0x30] sm:$0xff] }
 0xd93   :  { %5849 = vmatmul.mubr.msk.f32.gmra.mrb[36].mxu0 %vm84_vm0, %v7722_v40  ;;  %5853 = vmatmul.mubr.msk.f32.gmra.mrb[40].mxu1 %vm84_vm0, %v7722_v40  ;;  %v6647_v11 = vpack.c.bf16 %v3217_v4, %v3201_v3  ;;  %v4145_v60 = vld [vmem:[%s9173_s12 + $0x1b8] sm:$0xff]  ;;  %v4128_v4 = vld [vmem:[%s9173_s12 + $0x130] sm:$0xff] }
 0xd94   :  { %3390 = vmatprep.mubr.f32.mxu0 %v7049_v10  ;;  %3479 = vmatprep.mubr.f32.mxu1 %v7049_v10  ;;  %v4097_v1 = vld [vmem:[%s9173_s12 + $0x38] sm:$0xff] }
 0xd95   :  { %6610 = vmatpush1.bf16.msra.mxu0 %v6609_v21  ;;  %6618 = vmatpush1.bf16.msra.mxu1 %v6617_v23  ;;  %v3216_v21 = vld [vmem:[%s9171_s10 + $0x1f0] sm:$0xff]  ;;  %v4106_v23 = vld [vmem:[%s9173_s12 + $0x80] sm:$0xff] }
 0xd96   :  { %6620 = vmatprep.subr.bf16.mxu0 %v6619_v52  ;;  %6628 = vmatprep.subr.bf16.mxu1 %v6627_v54  ;;  %v4107_v52 = vld [vmem:[%s9173_s12 + $0x88] sm:$0xff]  ;;  %v4138_v54 = vld [vmem:[%s9173_s12 + $0x180] sm:$0xff] }
 0xdae   :  { %v3114_v12 = vpop.xlane.xlu1 %3113 }
 0xdaf   :  { %v3120_v15 = vmul.f32 0.03125, %v3114_v12  ;;  %v4139_v12 = vld [vmem:[%s9173_s12 + $0x188] sm:$0xff] }
 0xdb1   :  { %v3124_v20 = vadd.f32 1e-05, %v3120_v15  ;;  %v6641_v15 = vpack.c.bf16 %v3214_v8, %v3198_v7  ;;  %v4115_v7 = vld [vmem:[%s9173_s12 + $0xc8] sm:$0xff]  ;;  %v4146_v8 = vld [vmem:[%s9173_s12 + $0x1c0] sm:$0xff] }
 0xdb2   :  { %v3117_v22 = vpop.xlane.xlu0 %3116 }
 0xdb3   :  { %7009 = vrsqrt.f32 %v3124_v20  ;;  %v3121_v24 = vmul.f32 0.03125, %v3117_v22  ;;  %v6649_v20 = vpack.c.bf16 %v3216_v21, %v3200_v34  ;;  %v6651_v22 = vpack.c.bf16 %v4107_v52, %v4106_v23  ;;  %v4098_v21 = vld [vmem:[%s9173_s12 + $0x40] sm:$0xff]  ;;  %v4099_v23 = vld [vmem:[%s9173_s12 + $0x48] sm:$0xff] }
 0xdb5   :  { %v3125_v27 = vadd.f32 1e-05, %v3121_v24  ;;  %v6683_v24 = vpack.c.bf16 %v4139_v12, %v4138_v54  ;;  %v4130_v12 = vld [vmem:[%s9173_s12 + $0x140] sm:$0xff] }
 0xdb7   :  { %7011 = vrsqrt.f32 %v3125_v27  ;;  %v4090_v27 = vld [vmem:[%s9173_s12] sm:$0xff] }
 0xdbd   :  { %v7010_v30 = vpop.eup %7009 }
 0xdbe   :  { %v3132_v31 = vmul.f32 %v7010_v30, %v7632_v25  ;;  %v4091_v30 = vld [vmem:[%s9173_s12 + $0x8] sm:$0xff] }
 0xdc0   :  { %v3142_v33 = vmul.f32 %v5846_v47, %v3132_v31  ;;  %v4122_v31 = vld [vmem:[%s9173_s12 + $0x100] sm:$0xff] }
 0xdc1   :  { %v7012_v35 = vpop.eup %7011 }
 0xdc2   :  { %v7732_v55 = vadd.f32 %v7660_v19, %v3142_v33  ;;  %v3133_v36 = vmul.f32 %v7012_v35, %v7636_v48  ;;  %v3178_v48 = vld [vmem:[%s9171_s10 + $0xc0] sm:$0xff]  ;;  %v4123_v33 = vld [vmem:[%s9173_s12 + $0x108] sm:$0xff]  ;;  %v4108_v35 = vld [vmem:[%s9173_s12 + $0x90] sm:$0xff] }
 0xdc3   :  { %v6621_v16 = vpack.c.bf16 %v3178_v48, %v3162_v38  ;;  %v4141_v38 = vld [vmem:[%s9173_s12 + $0x198] sm:$0xff]  ;;  %v6653_v48 = vpack.c.bf16 %v4091_v30, %v4090_v27  ;;  %v6685_v39 = vpack.c.bf16 %v4123_v33, %v4122_v31  ;;  %v6669_v30 = vpack.c.bf16 %v4099_v23, %v4098_v21  ;;  %v4100_v33 = vld [vmem:[%s9173_s12 + $0x50] sm:$0xff] }
 0xdc4   :  { %v3143_v37 = vmul.f32 %v5846_v47, %v3133_v36  ;;  %5850 = vmatmul.mubr.msk.f32.gmra.mrb[38].mxu0 %vm84_vm0, %v7732_v55  ;;  %5854 = vmatmul.mubr.msk.f32.gmra.mrb[42].mxu1 %vm84_vm0, %v7732_v55  ;;  %v6631_v47 = vpack.c.bf16 %v3213_v17, %v3197_v14  ;;  %v4109_v36 = vld [vmem:[%s9173_s12 + $0x98] sm:$0xff]  ;;  %v4124_v17 = vld [vmem:[%s9173_s12 + $0x110] sm:$0xff] }
 0xdc5   :  { %3396 = vmatprep.mubr.f32.mxu0 %v7049_v10  ;;  %3485 = vmatprep.mubr.f32.mxu1 %v7049_v10  ;;  %v6655_v43 = vpack.c.bf16 %v4109_v36, %v4108_v35  ;;  %v4149_v27 = vld [vmem:[%s9173_s12 + $0x1d8] sm:$0xff] }
 0xdc6   :  { %v7742_v25 = vadd.f32 %v7660_v19, %v3143_v37  ;;  %v3196_v19 = vld [vmem:[%s9171_s10 + $0x150] sm:$0xff]  ;;  %v4101_v35 = vld [vmem:[%s9173_s12 + $0x58] sm:$0xff] }
 0xdc7   :  { %v6633_v51 = vpack.c.bf16 %v3212_v13, %v3196_v19  ;;  %v4140_v37 = vld [vmem:[%s9173_s12 + $0x190] sm:$0xff]  ;;  %v4094_v13 = vld [vmem:[%s9173_s12 + $0x20] sm:$0xff] }
 0xdc8   :  { %5851 = vmatmul.mubr.msk.f32.gmra.mrb[40].mxu0 %vm84_vm0, %v7742_v25  ;;  %5855 = vmatmul.mubr.msk.f32.gmra.mrb[44].mxu1 %vm84_vm0, %v7742_v25  ;;  %v6687_v14 = vpack.c.bf16 %v4141_v38, %v4140_v37  ;;  %v6661_v61 = vpack.c.bf16 %v4095_v49, %v4094_v13  ;;  %v4132_v38 = vld [vmem:[%s9173_s12 + $0x150] sm:$0xff]  ;;  %v4121_v13 = vld [vmem:[%s9173_s12 + $0xf8] sm:$0xff] }
 0xdc9   :  { %3556 = vmatprep.mubr.f32.mxu0 %v7049_v10  ;;  %3645 = vmatprep.mubr.f32.mxu1 %v7049_v10  ;;  %v4152_v49 = vld [vmem:[%s9173_s12 + $0x1f0] sm:$0xff] }
 0xdcc   :  { %5856 = vmatmul.mubr.msk.f32.vlgmr.msra.gmra.mrb[42].mxu0 %vm84_vm0, %v7689_v63  ;;  %5860 = vmatmul.mubr.msk.f32.vlgmr.msra.gmra.mrb[46].mxu1 %vm84_vm0, %v7689_v63 }
 0xdcd   :  { %3562 = vmatprep.mubr.f32.mxu0 %v7049_v10  ;;  %3651 = vmatprep.mubr.f32.mxu1 %v7049_v10 }
 0xdce   :  { %6622 = vmatpush1.bf16.msra.mxu0 %v6621_v16  ;;  %6630 = vmatpush1.bf16.msra.mxu1 %v6629_v44  ;;  %v4125_v16 = vld [vmem:[%s9173_s12 + $0x118] sm:$0xff]  ;;  %v4110_v44 = vld [vmem:[%s9173_s12 + $0xa0] sm:$0xff] }
 0xdcf   :  { %6624 = vmatprep.subr.bf16.mxu0 %v6623_v18  ;;  %6632 = vmatprep.subr.bf16.mxu1 %v6631_v47  ;;  %v4143_v18 = vld [vmem:[%s9173_s12 + $0x1a8] sm:$0xff]  ;;  %v6657_v47 = vpack.c.bf16 %v4093_v42, %v4092_v41  ;;  %v6689_v19 = vpack.c.bf16 %v4125_v16, %v4124_v17  ;;  %v6659_v50 = vpack.c.bf16 %v4111_v45, %v4110_v44  ;;  %v4150_v42 = vld [vmem:[%s9173_s12 + $0x1e0] sm:$0xff] }
 0xdd0   :  { %5857 = vmatmul.mubr.msk.f32.gmra.mrb[44].mxu0 %vm84_vm0, %v7722_v40  ;;  %5861 = vmatmul.mubr.msk.f32.gmra.mrb[48].mxu1 %vm84_vm0, %v7722_v40  ;;  %v6691_v56 = vpack.c.bf16 %v4143_v18, %v4142_v46  ;;  %v4119_v41 = vld [vmem:[%s9173_s12 + $0xe8] sm:$0xff]  ;;  %v4102_v16 = vld [vmem:[%s9173_s12 + $0x60] sm:$0xff] }
 0xdd1   :  { %3568 = vmatprep.mubr.f32.mxu0 %v7049_v10  ;;  %3657 = vmatprep.mubr.f32.mxu1 %v7049_v10  ;;  %v4103_v44 = vld [vmem:[%s9173_s12 + $0x68] sm:$0xff]  ;;  %v4134_v18 = vld [vmem:[%s9173_s12 + $0x160] sm:$0xff] }
 0xdd2   :  { %6626 = vmatpush1.bf16.msra.mxu0 %v6625_v58  ;;  %6634 = vmatpush1.bf16.msra.mxu1 %v6633_v51  ;;  %v4127_v58 = vld [vmem:[%s9173_s12 + $0x128] sm:$0xff]  ;;  %v4112_v51 = vld [vmem:[%s9173_s12 + $0xb0] sm:$0xff] }
 0xdd3   :  { %6636 = vmatprep.subr.bf16.mxu0 %v6635_v53  ;;  %6644 = vmatprep.subr.bf16.mxu1 %v6643_v59  ;;  %v4113_v53 = vld [vmem:[%s9173_s12 + $0xb8] sm:$0xff]  ;;  %v4144_v59 = vld [vmem:[%s9173_s12 + $0x1b0] sm:$0xff]  ;;  %v6693_v62 = vpack.c.bf16 %v4127_v58, %v4126_v57 }
 0xdd4   :  { %5858 = vmatmul.mubr.msk.f32.gmra.mrb[46].mxu0 %vm84_vm0, %v7732_v55  ;;  %5862 = vmatmul.mubr.msk.f32.gmra.mrb[50].mxu1 %vm84_vm0, %v7732_v55  ;;  %v6663_v2 = vpack.c.bf16 %v4113_v53, %v4112_v51  ;;  %v6695_v3 = vpack.c.bf16 %v4145_v60, %v4144_v59  ;;  %v4104_v58 = vld [vmem:[%s9173_s12 + $0x70] sm:$0xff]  ;;  %v4105_v51 = vld [vmem:[%s9173_s12 + $0x78] sm:$0xff] }
 0xdd5   :  { %3574 = vmatprep.mubr.f32.mxu0 %v7049_v10  ;;  %3663 = vmatprep.mubr.f32.mxu1 %v7049_v10  ;;  %v4136_v60 = vld [vmem:[%s9173_s12 + $0x170] sm:$0xff] }
 0xdd8   :  { %5859 = vmatmul.mubr.msk.f32.gmra.mrb[48].mxu0 %vm84_vm0, %v7742_v25  ;;  %5863 = vmatmul.mubr.msk.f32.gmra.mrb[52].mxu1 %vm84_vm0, %v7742_v25 }
 0xdd9   :  { %3734 = vmatprep.mubr.f32.mxu0 %v7049_v10  ;;  %3823 = vmatprep.mubr.f32.mxu1 %v7049_v10 }
 0xddc   :  { %5864 = vmatmul.mubr.msk.f32.vlgmr.msra.gmra.mrb[50].mxu0 %vm84_vm0, %v7689_v63  ;;  %5868 = vmatmul.mubr.msk.f32.vlgmr.msra.gmra.mrb[54].mxu1 %vm84_vm0, %v7689_v63 }
 0xddd   :  { %3740 = vmatprep.mubr.f32.mxu0 %v7049_v10  ;;  %3829 = vmatprep.mubr.f32.mxu1 %v7049_v10 }
 0xdde   :  { %6638 = vmatpush1.bf16.msra.mxu0 %v6637_v5  ;;  %6646 = vmatpush1.bf16.msra.mxu1 %v6645_v6  ;;  %v4129_v5 = vld [vmem:[%s9173_s12 + $0x138] sm:$0xff]  ;;  %v4114_v6 = vld [vmem:[%s9173_s12 + $0xc0] sm:$0xff] }
 0xddf   :  { %6640 = vmatprep.subr.bf16.mxu0 %v6639_v9  ;;  %6648 = vmatprep.subr.bf16.mxu1 %v6647_v11  ;;  %v4147_v9 = vld [vmem:[%s9173_s12 + $0x1c8] sm:$0xff]  ;;  %v6665_v11 = vpack.c.bf16 %v4097_v1, %v4096_v0  ;;  %v6697_v34 = vpack.c.bf16 %v4129_v5, %v4128_v4  ;;  %v6667_v52 = vpack.c.bf16 %v4115_v7, %v4114_v6  ;;  %v4202_v1 = vld [vmem:[%s9173_s12 + $0x380] sm:$0xff]  ;;  %v8109_v7 = vsub.s32 2, %v7253_v28 }
 0xde0   :  { %5865 = vmatmul.mubr.msk.f32.gmra.mrb[52].mxu0 %vm84_vm0, %v7722_v40  ;;  %5869 = vmatmul.mubr.msk.f32.gmra.mrb[56].mxu1 %vm84_vm0, %v7722_v40  ;;  %v6699_v54 = vpack.c.bf16 %v4147_v9, %v4146_v8  ;;  %v4171_v0 = vld [vmem:[%s9173_s12 + $0x288] sm:$0xff]  ;;  %v8114_v8 = vld [vmem:[%s9172_s11] sm:$0xff]  ;;  %v8117_v9 = vsub.s32 1, %v7253_v28 }
 0xde1   :  { %3746 = vmatprep.mubr.f32.mxu0 %v7049_v10  ;;  %3835 = vmatprep.mubr.f32.mxu1 %v7049_v10  ;;  %v8128_v21 = vrot.slane %v8114_v8, %v8109_v7 }
 0xde2   :  { %6642 = vmatpush1.bf16.msra.mxu0 %v6641_v15  ;;  %6650 = vmatpush1.bf16.msra.mxu1 %v6649_v20  ;;  %v4131_v15 = vld [vmem:[%s9173_s12 + $0x148] sm:$0xff]  ;;  %v4116_v20 = vld [vmem:[%s9173_s12 + $0xd0] sm:$0xff]  ;;  %v8132_v23 = vrot.slane %v8114_v8, %v8117_v9 }
 0xde3   :  { %6652 = vmatprep.subr.bf16.mxu0 %v6651_v22  ;;  %6684 = vmatprep.subr.bf16.mxu1 %v6683_v24  ;;  %v4117_v22 = vld [vmem:[%s9173_s12 + $0xd8] sm:$0xff]  ;;  %v4148_v24 = vld [vmem:[%s9173_s12 + $0x1d0] sm:$0xff]  ;;  %v6701_v31 = vpack.c.bf16 %v4131_v15, %v4130_v12  ;;  %v4155_v12 = vld [vmem:[%s9173_s12 + $0x208] sm:$0xff] }
 0xde4   :  { %5866 = vmatmul.mubr.msk.f32.gmra.mrb[54].mxu0 %vm84_vm0, %v7732_v55  ;;  %5870 = vmatmul.mubr.msk.f32.gmra.mrb[58].mxu1 %vm84_vm0, %v7732_v55  ;;  %v6671_v36 = vpack.c.bf16 %v4117_v22, %v4116_v20  ;;  %v6703_v37 = vpack.c.bf16 %v4149_v27, %v4148_v24  ;;  %v4186_v22 = vld [vmem:[%s9173_s12 + $0x300] sm:$0xff]  ;;  %v4187_v24 = vld [vmem:[%s9173_s12 + $0x308] sm:$0xff]  ;;  %v4172_v27 = vld [vmem:[%s9173_s12 + $0x290] sm:$0xff] }
 0xde5   :  { %3752 = vmatprep.mubr.f32.mxu0 %v7049_v10  ;;  %3841 = vmatprep.mubr.f32.mxu1 %v7049_v10 }
 0xde8   :  { %5867 = vmatmul.mubr.msk.f32.gmra.mrb[56].mxu0 %vm84_vm0, %v7742_v25  ;;  %5871 = vmatmul.mubr.msk.f32.gmra.mrb[60].mxu1 %vm84_vm0, %v7742_v25 }
 0xde9   :  { %3912 = vmatprep.mubr.f32.mxu0 %v7049_v10  ;;  %4001 = vmatprep.mubr.f32.mxu1 %v7049_v10 }
 0xdec   :  { %5872 = vmatmul.mubr.msk.f32.vlgmr.msra.gmra.mrb[58].mxu0 %vm84_vm0, %v7689_v63  ;;  %5876 = vmatmul.mubr.msk.f32.vlgmr.msra.gmra.mrb[62].mxu1 %vm84_vm0, %v7689_v63 }
 0xded   :  { %3918 = vmatprep.mubr.f32.mxu0 %v7049_v10  ;;  %4007 = vmatprep.mubr.f32.mxu1 %v7049_v10 }
 0xdee   :  { %6654 = vmatpush3.bf16.msra.mxu0 %v6653_v48  ;;  %6686 = vmatpush3.bf16.msra.mxu1 %v6685_v39  ;;  %v4133_v48 = vld [vmem:[%s9173_s12 + $0x158] sm:$0xff]  ;;  %v4118_v39 = vld [vmem:[%s9173_s12 + $0xe0] sm:$0xff] }
 0xdef   :  { %6656 = vmatprep.subr.bf16.mxu0 %v6655_v43  ;;  %6688 = vmatprep.subr.bf16.mxu1 %v6687_v14  ;;  %v4151_v43 = vld [vmem:[%s9173_s12 + $0x1e8] sm:$0xff]  ;;  %v6673_v14 = vpack.c.bf16 %v4101_v35, %v4100_v33  ;;  %v6705_v17 = vpack.c.bf16 %v4133_v48, %v4132_v38  ;;  %v6675_v45 = vpack.c.bf16 %v4119_v41, %v4118_v39  ;;  %v4205_v38 = vld [vmem:[%s9173_s12 + $0x398] sm:$0xff] }
 0xdf0   :  { %5873 = vmatmul.mubr.msk.f32.gmra.mrb[60].mxu0 %vm84_vm0, %v7722_v40  ;;  %5877 = vmatmul.mubr.msk.f32.gmra.mrb[64].mxu1 %vm84_vm0, %v7722_v40  ;;  %v6707_v46 = vpack.c.bf16 %v4151_v43, %v4150_v42  ;;  %v6749_v42 = vpack.c.bf16 %v4187_v24, %v4186_v22  ;;  %v4156_v43 = vld [vmem:[%s9173_s12 + $0x210] sm:$0xff]  ;;  %v4191_v22 = vld [vmem:[%s9173_s12 + $0x328] sm:$0xff] }
 0xdf1   :  { %3924 = vmatprep.mubr.f32.mxu0 %v7049_v10  ;;  %4013 = vmatprep.mubr.f32.mxu1 %v7049_v10  ;;  %v4176_v24 = vld [vmem:[%s9173_s12 + $0x2b0] sm:$0xff] }
 0xdf2   :  { %6658 = vmatpush3.bf16.msra.mxu0 %v6657_v47  ;;  %6690 = vmatpush3.bf16.msra.mxu1 %v6689_v19  ;;  %v4135_v47 = vld [vmem:[%s9173_s12 + $0x168] sm:$0xff]  ;;  %v4120_v19 = vld [vmem:[%s9173_s12 + $0xf0] sm:$0xff] }
 0xdf3   :  { %6660 = vmatprep.subr.bf16.mxu0 %v6659_v50  ;;  %6692 = vmatprep.subr.bf16.mxu1 %v6691_v56  ;;  %v4153_v50 = vld [vmem:[%s9173_s12 + $0x1f8] sm:$0xff]  ;;  %v6677_v56 = vpack.c.bf16 %v4103_v44, %v4102_v16  ;;  %v6709_v57 = vpack.c.bf16 %v4135_v47, %v4134_v18  ;;  %v6679_v53 = vpack.c.bf16 %v4121_v13, %v4120_v19  ;;  %v4188_v47 = vld [vmem:[%s9173_s12 + $0x310] sm:$0xff] }
 0xdf4   :  { %5874 = vmatmul.mubr.msk.f32.gmra.mrb[62].mxu0 %vm84_vm0, %v7732_v55  ;;  %5878 = vmatmul.mubr.msk.f32.gmra.mrb[66].mxu1 %vm84_vm0, %v7732_v55  ;;  %v6711_v59 = vpack.c.bf16 %v4153_v50, %v4152_v49  ;;  %v4157_v18 = vld [vmem:[%s9173_s12 + $0x218] sm:$0xff] }
 0xdf5   :  { %3930 = vmatprep.mubr.f32.mxu0 %v7049_v10  ;;  %4019 = vmatprep.mubr.f32.mxu1 %v7049_v10 }
 0xdf6   :  { %6662 = vmatpush3.bf16.msra.mxu0 %v6661_v61  ;;  %6694 = vmatpush3.bf16.msra.mxu1 %v6693_v62  ;;  %v4137_v61 = vld [vmem:[%s9173_s12 + $0x178] sm:$0xff]  ;;  %v4170_v62 = vld [vmem:[%s9173_s12 + $0x280] sm:$0xff] }
 0xdf7   :  { %6664 = vmatprep.subr.bf16.mxu0 %v6663_v2  ;;  %6696 = vmatprep.subr.bf16.mxu1 %v6695_v3  ;;  %v4203_v2 = vld [vmem:[%s9173_s12 + $0x388] sm:$0xff]  ;;  %v6681_v3 = vpack.c.bf16 %v4105_v51, %v4104_v58  ;;  %v6713_v4 = vpack.c.bf16 %v4137_v61, %v4136_v60  ;;  %v6715_v5 = vpack.c.bf16 %v4171_v0, %v4170_v62  ;;  %v4189_v58 = vld [vmem:[%s9173_s12 + $0x318] sm:$0xff]  ;;  %v4174_v51 = vld [vmem:[%s9173_s12 + $0x2a0] sm:$0xff] }
 0xdf8   :  { %5875 = vmatmul.mubr.msk.f32.gmra.mrb[64].mxu0 %vm84_vm0, %v7742_v25  ;;  %5879 = vmatmul.mubr.msk.f32.gmra.mrb[68].mxu1 %vm84_vm0, %v7742_v25  ;;  %v6747_v6 = vpack.c.bf16 %v4203_v2, %v4202_v1  ;;  %v4175_v60 = vld [vmem:[%s9173_s12 + $0x2a8] sm:$0xff]  ;;  %v4206_v61 = vld [vmem:[%s9173_s12 + $0x3a0] sm:$0xff]  ;;  %v6721_v2 = vpack.c.bf16 %v4157_v18, %v4156_v43 }
 0xdf9   :  { %v4207_v62 = vld [vmem:[%s9173_s12 + $0x3a8] sm:$0xff] }
 0xdfa   :  { %6666 = vmatpush3.bf16.msra.mxu0 %v6665_v11  ;;  %6698 = vmatpush3.bf16.msra.mxu1 %v6697_v34  ;;  %v8120_v11 = vsub.s32 3, %v7253_v28  ;;  %v8124_v34 = vrot.slane %v8114_v8, %v7263_v32  ;;  %v4179_v43 = vld [vmem:[%s9173_s12 + $0x2c8] sm:$0xff] }
 0xdfb   :  { %6668 = vmatprep.subr.bf16.mxu0 %v6667_v52  ;;  %6700 = vmatprep.subr.bf16.mxu1 %v6699_v54  ;;  %v4154_v54 = vld [vmem:[%s9173_s12 + $0x200] sm:$0xff] }
 0xdfc   :  { %v8136_v52 = vrot.slane %v8114_v8, %v8120_v11  ;;  %v6717_v41 = vpack.c.bf16 %v4155_v12, %v4154_v54  ;;  %v6723_v12 = vpack.c.bf16 %v4175_v60, %v4174_v51 }
 0xdfe   :  { %6670 = vmatpush3.bf16.msra.mxu0 %v6669_v30  ;;  %6702 = vmatpush3.bf16.msra.mxu1 %v6701_v31 }
 0xdff   :  { %6672 = vmatprep.subr.bf16.mxu0 %v6671_v36  ;;  %6704 = vmatprep.subr.bf16.mxu1 %v6703_v37  ;;  %v4173_v36 = vld [vmem:[%s9173_s12 + $0x298] sm:$0xff]  ;;  %v4204_v37 = vld [vmem:[%s9173_s12 + $0x390] sm:$0xff] }
 0xe02   :  { %6674 = vmatpush3.bf16.msra.mxu0 %v6673_v14  ;;  %6706 = vmatpush3.bf16.msra.mxu1 %v6705_v17 }
 0xe03   :  { %6676 = vmatprep.subr.bf16.mxu0 %v6675_v45  ;;  %6708 = vmatprep.subr.bf16.mxu1 %v6707_v46  ;;  %v6719_v45 = vpack.c.bf16 %v4173_v36, %v4172_v27  ;;  %v6751_v46 = vpack.c.bf16 %v4205_v38, %v4204_v37  ;;  %v4177_v27 = vld [vmem:[%s9173_s12 + $0x2b8] sm:$0xff]  ;;  %v4160_v36 = vld [vmem:[%s9173_s12 + $0x230] sm:$0xff] }
 0xe04   :  { %v4161_v37 = vld [vmem:[%s9173_s12 + $0x238] sm:$0xff]  ;;  %v6727_v38 = vpack.c.bf16 %v4177_v27, %v4176_v24  ;;  %v4199_v24 = vld [vmem:[%s9173_s12 + $0x368] sm:$0xff]  ;;  %v4184_v27 = vld [vmem:[%s9173_s12 + $0x2f0] sm:$0xff] }
 0xe06   :  { %6678 = vmatpush3.bf16.msra.mxu0 %v6677_v56  ;;  %6710 = vmatpush3.bf16.msra.mxu1 %v6709_v57 }
 0xe07   :  { %6680 = vmatprep.subr.bf16.mxu0 %v6679_v53  ;;  %6712 = vmatprep.subr.bf16.mxu1 %v6711_v59 }
 0xe0a   :  { %6682 = vmatpush3.bf16.msra.mxu0 %v6681_v3  ;;  %6714 = vmatpush3.bf16.msra.mxu1 %v6713_v4  ;;  %v6753_v3 = vpack.c.bf16 %v4189_v58, %v4188_v47  ;;  %v4158_v4 = vld [vmem:[%s9173_s12 + $0x220] sm:$0xff] }
 0xe0b   :  { %6716 = vmatprep.subr.bf16.mxu0 %v6715_v5  ;;  %6748 = vmatprep.subr.bf16.mxu1 %v6747_v6  ;;  %v4159_v5 = vld [vmem:[%s9173_s12 + $0x228] sm:$0xff] }
 0xe62   :  { %v3380_v15 = vpop.f32.mrb[34].mxu0  ;;  %v3469_v20 = vpop.f32.mrb[38].mxu1 }
 0xe63   :  { %v3381_v30 = vadd.f32 %v3380_v15, %v8124_v34  ;;  %v3470_v31 = vadd.f32 %v3469_v20, %v8128_v21  ;;  %v3382_v33 = vpop.f32.mrb[35].mxu0  ;;  %v3471_v35 = vpop.f32.mrb[39].mxu1  ;;  %v6755_v15 = vpack.c.bf16 %v4207_v62, %v4206_v61  ;;  %v4190_v20 = vld [vmem:[%s9173_s12 + $0x320] sm:$0xff]  ;;  %v4196_v62 = vld [vmem:[%s9173_s12 + $0x350] sm:$0xff] }
 0xe64   :  { %v3383_v48 = vadd.f32 %v3382_v33, %v8132_v23  ;;  %v3472_v39 = vadd.f32 %v3471_v35, %v8136_v52  ;;  %v6725_v33 = vpack.c.bf16 %v4159_v5, %v4158_v4  ;;  %v6757_v35 = vpack.c.bf16 %v4191_v22, %v4190_v20  ;;  %v4215_v4 = vld [vmem:[%s9173_s12 + $0x3e8] sm:$0xff]  ;;  %v4198_v22 = vld [vmem:[%s9173_s12 + $0x360] sm:$0xff] }
 0xe65   :  { %v4026_v19 = vmax.f32 %v3381_v30, 0.0  ;;  %v4028_v13 = vmax.f32 %v3470_v31, 0.0  ;;  %v4208_v30 = vld [vmem:[%s9173_s12 + $0x3b0] sm:$0xff]  ;;  %v4209_v31 = vld [vmem:[%s9173_s12 + $0x3b8] sm:$0xff] }
 0xe66   :  { %v4027_v14 = vmax.f32 %v3383_v48, 0.0  ;;  %v4029_v17 = vmax.f32 %v3472_v39, 0.0  ;;  %v3386_v16 = vpop.f32.mrb[36].mxu0  ;;  %v3475_v44 = vpop.f32.mrb[40].mxu1  ;;  %v6759_v48 = vpack.c.bf16 %v4209_v31, %v4208_v30  ;;  %v4192_v39 = vld [vmem:[%s9173_s12 + $0x330] sm:$0xff]  ;;  %v4185_v30 = vld [vmem:[%s9173_s12 + $0x2f8] sm:$0xff] }
 0xe67   :  { %v3387_v49 = vadd.f32 %v3386_v16, %v8124_v34  ;;  %v3476_v50 = vadd.f32 %v3475_v44, %v8128_v21  ;;  %v3388_v56 = vpop.f32.mrb[37].mxu0  ;;  %v3477_v57 = vpop.f32.mrb[41].mxu1  ;;  %v6729_v16 = vpack.c.bf16 %v4161_v37, %v4160_v36  ;;  %v4216_v31 = vld [vmem:[%s9173_s12 + $0x3f0] sm:$0xff]  ;;  %v6773_v36 = vpack.c.bf16 %v4199_v24, %v4198_v22 }
 0xe68   :  { %v3389_v53 = vadd.f32 %v3388_v56, %v8132_v23  ;;  %v3478_v59 = vadd.f32 %v3477_v57, %v8136_v52  ;;  %4417 = vmatprep.mubr.f32.mxu0 %v4027_v14  ;;  %4502 = vmatprep.mubr.f32.mxu1 %v4029_v17  ;;  %v4210_v14 = vld [vmem:[%s9173_s12 + $0x3c0] sm:$0xff]  ;;  %v4211_v17 = vld [vmem:[%s9173_s12 + $0x3c8] sm:$0xff]  ;;  %v4212_v56 = vld [vmem:[%s9173_s12 + $0x3d0] sm:$0xff] }
 0xe69   :  { %4418 = vmatmul.mubr.f32.vlgmr.msra.gmra.mrb[66].mxu0 %v4026_v19  ;;  %4503 = vmatmul.mubr.f32.vlgmr.msra.gmra.mrb[70].mxu1 %v4028_v13  ;;  %v4042_v6 = vmax.f32 %v3387_v49, 0.0  ;;  %v4044_v54 = vmax.f32 %v3476_v50, 0.0  ;;  %v6763_v47 = vpack.c.bf16 %v4211_v17, %v4210_v14  ;;  %v4194_v19 = vld [vmem:[%s9173_s12 + $0x340] sm:$0xff]  ;;  %v4195_v13 = vld [vmem:[%s9173_s12 + $0x348] sm:$0xff]  ;;  %v4180_v49 = vld [vmem:[%s9173_s12 + $0x2d0] sm:$0xff] }
 0xe6a   :  { %v4043_v0 = vmax.f32 %v3389_v53, 0.0  ;;  %v4045_v1 = vmax.f32 %v3478_v59, 0.0  ;;  %6718 = vmatpush3.bf16.msra.mxu0 %v6717_v41  ;;  %6750 = vmatpush3.bf16.msra.mxu1 %v6749_v42  ;;  %v4193_v41 = vld [vmem:[%s9173_s12 + $0x338] sm:$0xff]  ;;  %v4178_v42 = vld [vmem:[%s9173_s12 + $0x2c0] sm:$0xff]  ;;  %v6765_v51 = vpack.c.bf16 %v4195_v13, %v4194_v19  ;;  %v4164_v53 = vld [vmem:[%s9173_s12 + $0x250] sm:$0xff] }
 0xe6b   :  { %6720 = vmatprep.subr.bf16.mxu0 %v6719_v45  ;;  %6752 = vmatprep.subr.bf16.mxu1 %v6751_v46  ;;  %v6761_v44 = vpack.c.bf16 %v4193_v41, %v4192_v39  ;;  %v4162_v45 = vld [vmem:[%s9173_s12 + $0x240] sm:$0xff]  ;;  %v4163_v46 = vld [vmem:[%s9173_s12 + $0x248] sm:$0xff]  ;;  %v6731_v18 = vpack.c.bf16 %v4179_v43, %v4178_v42  ;;  %v4181_v50 = vld [vmem:[%s9173_s12 + $0x2d8] sm:$0xff] }
 0xe6c   :  { %4422 = vmatprep.mubr.f32.mxu0 %v4043_v0  ;;  %4507 = vmatprep.mubr.f32.mxu1 %v4045_v1  ;;  %v4213_v57 = vld [vmem:[%s9173_s12 + $0x3d8] sm:$0xff]  ;;  %v6733_v58 = vpack.c.bf16 %v4163_v46, %v4162_v45  ;;  %v6735_v60 = vpack.c.bf16 %v4181_v50, %v4180_v49  ;;  %v4182_v1 = vld [vmem:[%s9173_s12 + $0x2e0] sm:$0xff]  ;;  %v4168_v37 = vld [vmem:[%s9173_s12 + $0x270] sm:$0xff]  ;;  %v3248_v49 = vsub.s32 6, %v7253_v28  ;;  %v3244_v50 = vsub.s32 5, %v7253_v28 }
 0xe6d   :  { %4423 = vmatmul.mubr.f32.gmra.mrb[68].mxu0 %v4042_v6  ;;  %4508 = vmatmul.mubr.f32.gmra.mrb[72].mxu1 %v4044_v54  ;;  %v4165_v59 = vld [vmem:[%s9173_s12 + $0x258] sm:$0xff]  ;;  %v6767_v61 = vpack.c.bf16 %v4213_v57, %v4212_v56  ;;  %v4166_v54 = vld [vmem:[%s9173_s12 + $0x260] sm:$0xff]  ;;  %v4200_v41 = vld [vmem:[%s9173_s12 + $0x370] sm:$0xff] }
 0xe6e   :  { %6722 = vmatpush3.bf16.msra.mxu0 %v6721_v2  ;;  %6754 = vmatpush3.bf16.msra.mxu1 %v6753_v3  ;;  %v4197_v0 = vld [vmem:[%s9173_s12 + $0x358] sm:$0xff]  ;;  %v4183_v2 = vld [vmem:[%s9173_s12 + $0x2e8] sm:$0xff]  ;;  %v4214_v3 = vld [vmem:[%s9173_s12 + $0x3e0] sm:$0xff]  ;;  %v6737_v5 = vpack.c.bf16 %v4165_v59, %v4164_v53 }
 0xe6f   :  { %6724 = vmatprep.subr.bf16.mxu0 %v6723_v12  ;;  %6756 = vmatprep.subr.bf16.mxu1 %v6755_v15  ;;  %v6769_v6 = vpack.c.bf16 %v4197_v0, %v4196_v62  ;;  %v4167_v12 = vld [vmem:[%s9173_s12 + $0x268] sm:$0xff]  ;;  %v6739_v15 = vpack.c.bf16 %v4183_v2, %v4182_v1  ;;  %v6771_v20 = vpack.c.bf16 %v4215_v4, %v4214_v3  ;;  %v4201_v42 = vld [vmem:[%s9173_s12 + $0x378] sm:$0xff]  ;;  %v4234_v43 = vld [vmem:[%s9173_s12 + $0x480] sm:$0xff] }
 0xe70   :  { %v4235_v14 = vld [vmem:[%s9173_s12 + $0x488] sm:$0xff]  ;;  %v4266_v17 = vld [vmem:[%s9173_s12 + $0x580] sm:$0xff]  ;;  %v6777_v45 = vpack.c.bf16 %v4201_v42, %v4200_v41  ;;  %v8354_v3 = vrot.slane %v8114_v8, %v3248_v49  ;;  %v8359_v4 = vrot.slane %v8114_v8, %v3244_v50 }
 0xe71   :  { %v6779_v46 = vpack.c.bf16 %v4235_v14, %v4234_v43  ;;  %v4268_v43 = vld [vmem:[%s9173_s12 + $0x590] sm:$0xff]  ;;  %v4269_v14 = vld [vmem:[%s9173_s12 + $0x598] sm:$0xff] }
 0xe72   :  { %6726 = vmatpush3.bf16.msra.mxu0 %v6725_v33  ;;  %6758 = vmatpush3.bf16.msra.mxu1 %v6757_v35  ;;  %v4217_v33 = vld [vmem:[%s9173_s12 + $0x3f8] sm:$0xff]  ;;  %v6741_v35 = vpack.c.bf16 %v4167_v12, %v4166_v54 }
 0xe73   :  { %6728 = vmatprep.subr.bf16.mxu0 %v6727_v38  ;;  %6760 = vmatprep.subr.bf16.mxu1 %v6759_v48  ;;  %v4169_v38 = vld [vmem:[%s9173_s12 + $0x278] sm:$0xff]  ;;  %v6743_v48 = vpack.c.bf16 %v4185_v30, %v4184_v27  ;;  %v6775_v39 = vpack.c.bf16 %v4217_v33, %v4216_v31  ;;  %v8373_v30 = vld [vmem:[%s9173_s12 + $0x400] sm:$0xff] }
 0xe76   :  { %6730 = vmatpush3.bf16.msra.mxu0 %v6729_v16  ;;  %6762 = vmatpush3.bf16.msra.mxu1 %v6761_v44  ;;  %v4267_v16 = vld [vmem:[%s9173_s12 + $0x588] sm:$0xff]  ;;  %v6745_v44 = vpack.c.bf16 %v4169_v38, %v4168_v37 }
 0xe77   :  { %6732 = vmatprep.subr.bf16.mxu0 %v6731_v18  ;;  %6764 = vmatprep.subr.bf16.mxu1 %v6763_v47  ;;  %v6811_v18 = vpack.c.bf16 %v4267_v16, %v4266_v17  ;;  %v3240_v47 = vsub.s32 4, %v7253_v28 }
 0xe7a   :  { %6734 = vmatpush3.bf16.msra.mxu0 %v6733_v58  ;;  %6766 = vmatpush3.bf16.msra.mxu1 %v6765_v51 }
 0xe7b   :  { %6736 = vmatprep.subr.bf16.mxu0 %v6735_v60  ;;  %6768 = vmatprep.subr.bf16.mxu1 %v6767_v61  ;;  %v3252_v60 = vsub.s32 7, %v7253_v28  ;;  %v8349_v61 = vrot.slane %v8114_v8, %v3240_v47 }
 0xe7d   :  { %v8368_v27 = vrot.slane %v8114_v8, %v3252_v60  ;;  %v4251_v8 = vld [vmem:[%s9173_s12 + $0x508] sm:$0xff] }
 0xe7e   :  { %6738 = vmatpush3.bf16.msra.mxu0 %v6737_v5  ;;  %6770 = vmatpush3.bf16.msra.mxu1 %v6769_v6 }
 0xe7f   :  { %6740 = vmatprep.subr.bf16.mxu0 %v6739_v15  ;;  %6772 = vmatprep.subr.bf16.mxu1 %v6771_v20 }
 0xe82   :  { %6742 = vmatpush3.bf16.msra.mxu0 %v6741_v35  ;;  %6774 = vmatpush3.bf16.msra.mxu1 %v6773_v36  ;;  %v8387_v35 = vld [vmem:[%s9173_s12 + $0x490] sm:$0xff]  ;;  %v8392_v36 = vld [vmem:[%s9173_s12 + $0x498] sm:$0xff] }
 0xe83   :  { %6744 = vmatprep.subr.bf16.mxu0 %v6743_v48  ;;  %6776 = vmatprep.subr.bf16.mxu1 %v6775_v39 }
 0xe86   :  { %6746 = vmatpush3.bf16.msra.mxu0 %v6745_v44  ;;  %6778 = vmatpush3.bf16.msra.mxu1 %v6777_v45  ;;  %v8407_v44 = vld [vmem:[%s9173_s12 + $0x410] sm:$0xff] }
 0xe87   :  { %6780 = vmatprep.subr.bf16.mxu0 %v6779_v46  ;;  %6812 = vmatprep.subr.bf16.mxu1 %v6811_v18  ;;  %v8413_v18 = vld [vmem:[%s9173_s12 + $0x418] sm:$0xff] }
 0xe97   :  { %v3392_v19 = vpop.f32.mrb[38].mxu0  ;;  %v3481_v13 = vpop.f32.mrb[42].mxu1 }
 0xe98   :  { %v3393_v56 = vadd.f32 %v3392_v19, %v8124_v34  ;;  %v3482_v57 = vadd.f32 %v3481_v13, %v8128_v21  ;;  %v3394_v58 = vpop.f32.mrb[39].mxu0  ;;  %v3483_v51 = vpop.f32.mrb[43].mxu1  ;;  %v8418_v19 = vld [vmem:[%s9173_s12 + $0x510] sm:$0xff]  ;;  %v8423_v13 = vld [vmem:[%s9173_s12 + $0x518] sm:$0xff] }
 0xe99   :  { %v3395_v53 = vadd.f32 %v3394_v58, %v8132_v23  ;;  %v3484_v59 = vadd.f32 %v3483_v51, %v8136_v52 }
 0xe9a   :  { %v4058_v5 = vmax.f32 %v3393_v56, 0.0  ;;  %v4060_v6 = vmax.f32 %v3482_v57, 0.0 }
 0xe9b   :  { %v4059_v62 = vmax.f32 %v3395_v53, 0.0  ;;  %v4061_v0 = vmax.f32 %v3484_v59, 0.0  ;;  %v3398_v1 = vpop.f32.mrb[40].mxu0  ;;  %v3487_v2 = vpop.f32.mrb[44].mxu1  ;;  %v6783_v53 = vpack.c.bf16 %v8392_v36, %v8387_v35  ;;  %v6815_v59 = vpack.c.bf16 %v4269_v14, %v4268_v43 }
 0xe9c   :  { %v3399_v54 = vadd.f32 %v3398_v1, %v8124_v34  ;;  %v3488_v12 = vadd.f32 %v3487_v2, %v8128_v21  ;;  %v3400_v15 = vpop.f32.mrb[41].mxu0  ;;  %v3489_v20 = vpop.f32.mrb[45].mxu1  ;;  %v4219_v34 = vld [vmem:[%s9173_s12 + $0x408] sm:$0xff]  ;;  %v4250_v21 = vld [vmem:[%s9173_s12 + $0x500] sm:$0xff] }
 0xe9d   :  { %v3401_v22 = vadd.f32 %v3400_v15, %v8132_v23  ;;  %v3490_v24 = vadd.f32 %v3489_v20, %v8136_v52  ;;  %4427 = vmatprep.mubr.f32.mxu0 %v4059_v62  ;;  %4512 = vmatprep.mubr.f32.mxu1 %v4061_v0  ;;  %v6781_v45 = vpack.c.bf16 %v4219_v34, %v8373_v30  ;;  %v8430_v62 = vld [vmem:[%s9173_s12 + $0x4a0] sm:$0xff]  ;;  %v8435_v0 = vld [vmem:[%s9173_s12 + $0x4a8] sm:$0xff] }
 0xe9e   :  { %4428 = vmatmul.mubr.f32.gmra.mrb[70].mxu0 %v4058_v5  ;;  %4513 = vmatmul.mubr.f32.gmra.mrb[74].mxu1 %v4060_v6  ;;  %v4074_v37 = vmax.f32 %v3399_v54, 0.0  ;;  %v4076_v38 = vmax.f32 %v3488_v12, 0.0  ;;  %v6813_v46 = vpack.c.bf16 %v4251_v8, %v4250_v21  ;;  %v4270_v15 = vld [vmem:[%s9173_s12 + $0x5a0] sm:$0xff]  ;;  %v4271_v20 = vld [vmem:[%s9173_s12 + $0x5a8] sm:$0xff]  ;;  %v6785_v21 = vpack.c.bf16 %v8413_v18, %v8407_v44 }
 0xe9f   :  { %v4075_v23 = vmax.f32 %v3401_v22, 0.0  ;;  %v4077_v52 = vmax.f32 %v3490_v24, 0.0  ;;  %v3558_v31 = vpop.f32.mrb[42].mxu0  ;;  %v3647_v33 = vpop.f32.mrb[46].mxu1  ;;  %v8450_v30 = vld [vmem:[%s9173_s12 + $0x420] sm:$0xff]  ;;  %v8455_v34 = vld [vmem:[%s9173_s12 + $0x428] sm:$0xff]  ;;  %v6817_v8 = vpack.c.bf16 %v8423_v13, %v8418_v19 }
 0xea0   :  { %v3559_v48 = vadd.f32 %v3558_v31, %v8349_v61  ;;  %v3648_v39 = vadd.f32 %v3647_v33, %v8354_v3  ;;  %v3560_v41 = vpop.f32.mrb[43].mxu0  ;;  %v3649_v42 = vpop.f32.mrb[47].mxu1  ;;  %v8474_v31 = vld [vmem:[%s9172_s11 + $0x8] sm:$0xff]  ;;  %v6789_v13 = vpack.c.bf16 %v8455_v34, %v8450_v30  ;;  %v4242_v30 = vld [vmem:[%s9173_s12 + $0x4c0] sm:$0xff] }
 0xea1   :  { %v3561_v17 = vadd.f32 %v3560_v41, %v8359_v4  ;;  %v3650_v16 = vadd.f32 %v3649_v42, %v8368_v27  ;;  %4432 = vmatprep.mubr.f32.mxu0 %v4075_v23  ;;  %4517 = vmatprep.mubr.f32.mxu1 %v4077_v52  ;;  %v8464_v23 = vld [vmem:[%s9173_s12 + $0x520] sm:$0xff]  ;;  %v8469_v52 = vld [vmem:[%s9173_s12 + $0x528] sm:$0xff]  ;;  %v8486_v41 = vld [vmem:[%s9173_s12 + $0x4b8] sm:$0xff] }
 0xea2   :  { %4433 = vmatmul.mubr.f32.gmra.mrb[72].mxu0 %v4074_v37  ;;  %4518 = vmatmul.mubr.f32.gmra.mrb[76].mxu1 %v4076_v38  ;;  %v4030_v1 = vmax.f32 %v3559_v48, 0.0  ;;  %v4032_v2 = vmax.f32 %v3648_v39, 0.0  ;;  %v6787_v38 = vpack.c.bf16 %v8435_v0, %v8430_v62  ;;  %v6819_v48 = vpack.c.bf16 %v4271_v20, %v4270_v15  ;;  %v8481_v39 = vld [vmem:[%s9173_s12 + $0x4b0] sm:$0xff] }
 0xea3   :  { %v4031_v56 = vmax.f32 %v3561_v17, 0.0  ;;  %v4033_v57 = vmax.f32 %v3650_v16, 0.0  ;;  %v3564_v58 = vpop.f32.mrb[44].mxu0  ;;  %v3653_v51 = vpop.f32.mrb[48].mxu1  ;;  %v6791_v0 = vpack.c.bf16 %v8486_v41, %v8481_v39 }
 0xea4   :  { %v3565_v5 = vadd.f32 %v3564_v58, %v8349_v61  ;;  %v3654_v6 = vadd.f32 %v3653_v51, %v8354_v3  ;;  %v3566_v54 = vpop.f32.mrb[45].mxu0  ;;  %v3655_v12 = vpop.f32.mrb[49].mxu1  ;;  %v8509_v58 = vld [vmem:[%s9173_s12 + $0x430] sm:$0xff] }
 0xea5   :  { %v3567_v22 = vadd.f32 %v3566_v54, %v8359_v4  ;;  %v3656_v24 = vadd.f32 %v3655_v12, %v8368_v27  ;;  %4587 = vmatprep.mubr.f32.mxu0 %v4031_v56  ;;  %4672 = vmatprep.mubr.f32.mxu1 %v4033_v57  ;;  %v6821_v56 = vpack.c.bf16 %v8469_v52, %v8464_v23 }
 0xea6   :  { %4588 = vmatmul.mubr.f32.vlgmr.msra.gmra.mrb[74].mxu0 %v4030_v1  ;;  %4673 = vmatmul.mubr.f32.vlgmr.msra.gmra.mrb[78].mxu1 %v4032_v2  ;;  %v4046_v42 = vmax.f32 %v3565_v5, 0.0  ;;  %v4048_v43 = vmax.f32 %v3654_v6, 0.0  ;;  %v8504_v57 = vrot.slane %v8474_v31, %v8117_v9  ;;  %v4225_v2 = vld [vmem:[%s9173_s12 + $0x438] sm:$0xff]  ;;  %v4256_v5 = vld [vmem:[%s9173_s12 + $0x530] sm:$0xff] }
 0xea7   :  { %v4047_v33 = vmax.f32 %v3567_v22, 0.0  ;;  %v4049_v35 = vmax.f32 %v3656_v24, 0.0  ;;  %6782 = vmatpush3.bf16.msra.mxu0 %v6781_v45  ;;  %6814 = vmatpush3.bf16.msra.mxu1 %v6813_v46  ;;  %v3570_v36 = vpop.f32.mrb[46].mxu0  ;;  %v3659_v37 = vpop.f32.mrb[50].mxu1  ;;  %v4272_v45 = vld [vmem:[%s9173_s12 + $0x5b0] sm:$0xff]  ;;  %v4273_v46 = vld [vmem:[%s9173_s12 + $0x5b8] sm:$0xff] }
 0xea8   :  { %v3571_v14 = vadd.f32 %v3570_v36, %v8349_v61  ;;  %v3660_v17 = vadd.f32 %v3659_v37, %v8354_v3  ;;  %v3572_v16 = vpop.f32.mrb[47].mxu0  ;;  %v3661_v44 = vpop.f32.mrb[51].mxu1  ;;  %6784 = vmatprep.subr.bf16.mxu0 %v6783_v53  ;;  %6816 = vmatprep.subr.bf16.mxu1 %v6815_v59  ;;  %v6823_v1 = vpack.c.bf16 %v4273_v46, %v4272_v45  ;;  %v4257_v24 = vld [vmem:[%s9173_s12 + $0x538] sm:$0xff] }
 0xea9   :  { %v3573_v18 = vadd.f32 %v3572_v16, %v8359_v4  ;;  %v3662_v19 = vadd.f32 %v3661_v44, %v8368_v27  ;;  %4592 = vmatprep.mubr.f32.mxu0 %v4047_v33  ;;  %4677 = vmatprep.mubr.f32.mxu1 %v4049_v35  ;;  %v6793_v36 = vpack.c.bf16 %v4225_v2, %v8509_v58  ;;  %v4259_v16 = vld [vmem:[%s9173_s12 + $0x548] sm:$0xff]  ;;  %v4244_v44 = vld [vmem:[%s9173_s12 + $0x4d0] sm:$0xff] }
 0xeaa   :  { %4593 = vmatmul.mubr.f32.gmra.mrb[76].mxu0 %v4046_v42  ;;  %4678 = vmatmul.mubr.f32.gmra.mrb[80].mxu1 %v4048_v43  ;;  %v4062_v6 = vmax.f32 %v3571_v14, 0.0  ;;  %v4064_v54 = vmax.f32 %v3660_v17, 0.0  ;;  %v6825_v37 = vpack.c.bf16 %v4257_v24, %v4256_v5  ;;  %v4278_v24 = vld [vmem:[%s9173_s12 + $0x5e0] sm:$0xff] }
 0xeab   :  { %v4063_v51 = vmax.f32 %v3573_v18, 0.0  ;;  %v4065_v53 = vmax.f32 %v3662_v19, 0.0  ;;  %6786 = vmatpush3.bf16.msra.mxu0 %v6785_v21  ;;  %6818 = vmatpush3.bf16.msra.mxu1 %v6817_v8  ;;  %v3576_v59 = vpop.f32.mrb[48].mxu0  ;;  %v3665_v62 = vpop.f32.mrb[52].mxu1  ;;  %v4274_v8 = vld [vmem:[%s9173_s12 + $0x5c0] sm:$0xff]  ;;  %v4245_v18 = vld [vmem:[%s9173_s12 + $0x4d8] sm:$0xff] }
 0xeac   :  { %v3577_v12 = vadd.f32 %v3576_v59, %v8349_v61  ;;  %v3666_v15 = vadd.f32 %v3665_v62, %v8354_v3  ;;  %v3578_v20 = vpop.f32.mrb[49].mxu0  ;;  %v3667_v22 = vpop.f32.mrb[53].mxu1  ;;  %6788 = vmatprep.subr.bf16.mxu0 %v6787_v38  ;;  %6820 = vmatprep.subr.bf16.mxu1 %v6819_v48  ;;  %v8531_v61 = vrot.slane %v8474_v31, %v8120_v11  ;;  %v4243_v3 = vld [vmem:[%s9173_s12 + $0x4c8] sm:$0xff]  ;;  %v4258_v48 = vld [vmem:[%s9173_s12 + $0x540] sm:$0xff]  ;;  %v4276_v19 = vld [vmem:[%s9173_s12 + $0x5d0] sm:$0xff] }
 0xead   :  { %v3579_v34 = vadd.f32 %v3578_v20, %v8359_v4  ;;  %v3668_v21 = vadd.f32 %v3667_v22, %v8368_v27  ;;  %4597 = vmatprep.mubr.f32.mxu0 %v4063_v51  ;;  %4682 = vmatprep.mubr.f32.mxu1 %v4065_v53  ;;  %v4275_v4 = vld [vmem:[%s9173_s12 + $0x5c8] sm:$0xff]  ;;  %v4226_v27 = vld [vmem:[%s9173_s12 + $0x440] sm:$0xff]  ;;  %v6795_v14 = vpack.c.bf16 %v4243_v3, %v4242_v30 }
 0xeae   :  { %4598 = vmatmul.mubr.f32.gmra.mrb[78].mxu0 %v4062_v6  ;;  %4683 = vmatmul.mubr.f32.gmra.mrb[82].mxu1 %v4064_v54  ;;  %v4227_v38 = vld [vmem:[%s9173_s12 + $0x448] sm:$0xff]  ;;  %v4078_v39 = vmax.f32 %v3577_v12, 0.0  ;;  %v4080_v41 = vmax.f32 %v3666_v15, 0.0  ;;  %v6827_v17 = vpack.c.bf16 %v4275_v4, %v4274_v8  ;;  %v6829_v62 = vpack.c.bf16 %v4259_v16, %v4258_v48  ;;  %v4260_v12 = vld [vmem:[%s9173_s12 + $0x550] sm:$0xff]  ;;  %v4261_v15 = vld [vmem:[%s9173_s12 + $0x558] sm:$0xff] }
 0xeaf   :  { %v4079_v23 = vmax.f32 %v3579_v34, 0.0  ;;  %v4081_v52 = vmax.f32 %v3668_v21, 0.0  ;;  %6790 = vmatpush3.bf16.msra.mxu0 %v6789_v13  ;;  %6822 = vmatpush3.bf16.msra.mxu1 %v6821_v56  ;;  %v8545_v33 = vpop.f32.mrb[50].mxu0  ;;  %v8547_v35 = vpop.f32.mrb[54].mxu1  ;;  %v4277_v13 = vld [vmem:[%s9173_s12 + $0x5d8] sm:$0xff]  ;;  %v6797_v59 = vpack.c.bf16 %v4227_v38, %v4226_v27  ;;  %v6799_v6 = vpack.c.bf16 %v4245_v18, %v4244_v44  ;;  %v4246_v20 = vld [vmem:[%s9173_s12 + $0x4e0] sm:$0xff] }
 0xeb0   :  { %v3738_v42 = vpop.f32.mrb[51].mxu0  ;;  %v3827_v43 = vpop.f32.mrb[55].mxu1  ;;  %6792 = vmatprep.subr.bf16.mxu0 %v6791_v0  ;;  %6824 = vmatprep.subr.bf16.mxu1 %v6823_v1  ;;  %v4228_v0 = vld [vmem:[%s9173_s12 + $0x450] sm:$0xff]  ;;  %v4229_v1 = vld [vmem:[%s9173_s12 + $0x458] sm:$0xff]  ;;  %v6831_v54 = vpack.c.bf16 %v4277_v13, %v4276_v19  ;;  %v4247_v22 = vld [vmem:[%s9173_s12 + $0x4e8] sm:$0xff]  ;;  %v6833_v8 = vpack.c.bf16 %v4261_v15, %v4260_v12  ;;  %v8658_v13 = vrot.slane %v8474_v31, %v3240_v47 }
 0xeb1   :  { %v3739_v45 = vadd.f32 %v3738_v42, %v8504_v57  ;;  %v3828_v46 = vadd.f32 %v3827_v43, %v8531_v61  ;;  %4602 = vmatprep.mubr.f32.mxu0 %v4079_v23  ;;  %4687 = vmatprep.mubr.f32.mxu1 %v4081_v52  ;;  %v4279_v30 = vld [vmem:[%s9173_s12 + $0x5e8] sm:$0xff]  ;;  %v6801_v3 = vpack.c.bf16 %v4229_v1, %v4228_v0  ;;  %v4230_v4 = vld [vmem:[%s9173_s12 + $0x460] sm:$0xff]  ;;  %v4280_v42 = vld [vmem:[%s9173_s12 + $0x5f0] sm:$0xff] }
 0xeb2   :  { %4603 = vmatmul.mubr.f32.gmra.mrb[80].mxu0 %v4078_v39  ;;  %4688 = vmatmul.mubr.f32.gmra.mrb[84].mxu1 %v4080_v41  ;;  %v4231_v27 = vld [vmem:[%s9173_s12 + $0x468] sm:$0xff]  ;;  %v4262_v38 = vld [vmem:[%s9173_s12 + $0x560] sm:$0xff]  ;;  %v4248_v39 = vld [vmem:[%s9173_s12 + $0x4f0] sm:$0xff]  ;;  %v8676_v47 = vrot.slane %v8474_v31, %v3248_v49 }
 0xeb3   :  { %v4035_v56 = vmax.f32 %v3739_v45, 0.0  ;;  %v4037_v58 = vmax.f32 %v3828_v46, 0.0  ;;  %6794 = vmatpush3.bf16.msra.mxu0 %v6793_v36  ;;  %6826 = vmatpush3.bf16.msra.mxu1 %v6825_v37  ;;  %v8573_v51 = vpop.f32.mrb[52].mxu0  ;;  %v8575_v53 = vpop.f32.mrb[56].mxu1  ;;  %v6803_v36 = vpack.c.bf16 %v4247_v22, %v4246_v20  ;;  %v6835_v37 = vpack.c.bf16 %v4279_v30, %v4278_v24  ;;  %v4263_v48 = vld [vmem:[%s9173_s12 + $0x568] sm:$0xff]  ;;  %v4249_v41 = vld [vmem:[%s9173_s12 + $0x4f8] sm:$0xff] }
 0xeb4   :  { %v8583_v2 = vpop.f32.mrb[53].mxu0  ;;  %v8585_v5 = vpop.f32.mrb[57].mxu1  ;;  %6796 = vmatprep.subr.bf16.mxu0 %v6795_v14  ;;  %6828 = vmatprep.subr.bf16.mxu1 %v6827_v17  ;;  %v4281_v43 = vld [vmem:[%s9173_s12 + $0x5f8] sm:$0xff]  ;;  %v8639_v14 = vrot.slane %v8474_v31, %v7263_v32  ;;  %v8643_v17 = vrot.slane %v8474_v31, %v8109_v7  ;;  %v4232_v16 = vld [vmem:[%s9173_s12 + $0x470] sm:$0xff]  ;;  %v6805_v18 = vpack.c.bf16 %v4231_v27, %v4230_v4  ;;  %v4330_v12 = vld [vmem:[%s9173_s12 + $0x780] sm:$0xff] }
 0xeb5   :  { %4757 = vmatprep.mubr.f32.mxu0 %v4035_v56  ;;  %4842 = vmatprep.mubr.f32.mxu1 %v4037_v58  ;;  %v4233_v44 = vld [vmem:[%s9173_s12 + $0x478] sm:$0xff]  ;;  %v6837_v19 = vpack.c.bf16 %v4263_v48, %v4262_v38  ;;  %v4264_v56 = vld [vmem:[%s9173_s12 + $0x570] sm:$0xff]  ;;  %v6807_v1 = vpack.c.bf16 %v4249_v41, %v4248_v39  ;;  %v4331_v15 = vld [vmem:[%s9173_s12 + $0x788] sm:$0xff] }
 0xeb6   :  { %v4265_v58 = vld [vmem:[%s9173_s12 + $0x578] sm:$0xff]  ;;  %v6809_v20 = vpack.c.bf16 %v4233_v44, %v4232_v16  ;;  %v8690_v49 = vld [vmem:[%s9173_s12 + $0x600] sm:$0xff]  ;;  %v8695_v24 = vld [vmem:[%s9173_s12 + $0x608] sm:$0xff]  ;;  %v3737_v30 = vadd.f32 %v8545_v33, %v8639_v14  ;;  %v6875_v27 = vpack.c.bf16 %v4331_v15, %v4330_v12  ;;  %v3826_v38 = vadd.f32 %v8547_v35, %v8643_v17 }
 0xeb7   :  { %6798 = vmatpush3.bf16.msra.mxu0 %v6797_v59  ;;  %6830 = vmatpush3.bf16.msra.mxu1 %v6829_v62  ;;  %v8605_v34 = vpop.f32.mrb[54].mxu0  ;;  %v8607_v21 = vpop.f32.mrb[58].mxu1  ;;  %v4298_v59 = vld [vmem:[%s9173_s12 + $0x680] sm:$0xff]  ;;  %v6841_v22 = vpack.c.bf16 %v4265_v58, %v4264_v56  ;;  %v8712_v33 = vld [vmem:[%s9173_s12 + $0x690] sm:$0xff]  ;;  %v8739_v16 = vld [vmem:[%s9173_s12 + $0x798] sm:$0xff]  ;;  %v3745_v44 = vadd.f32 %v8583_v2, %v8504_v57  ;;  %v6845_v56 = vpack.c.bf16 %v8695_v24, %v8690_v49 }
 0xeb8   :  { %v8615_v23 = vpop.f32.mrb[55].mxu0  ;;  %v8617_v52 = vpop.f32.mrb[59].mxu1  ;;  %6800 = vmatprep.subr.bf16.mxu0 %v6799_v6  ;;  %6832 = vmatprep.subr.bf16.mxu1 %v6831_v54  ;;  %v6839_v6 = vpack.c.bf16 %v4281_v43, %v4280_v42  ;;  %v4299_v54 = vld [vmem:[%s9173_s12 + $0x688] sm:$0xff]  ;;  %v8729_v43 = vld [vmem:[%s9173_s12 + $0x698] sm:$0xff]  ;;  %v8734_v35 = vld [vmem:[%s9173_s12 + $0x790] sm:$0xff] }
 0xeb9   :  { %v6843_v4 = vpack.c.bf16 %v4299_v54, %v4298_v59  ;;  %v8757_v59 = vld [vmem:[%s9173_s12 + $0x610] sm:$0xff]  ;;  %v8762_v2 = vld [vmem:[%s9173_s12 + $0x618] sm:$0xff]  ;;  %v6847_v54 = vpack.c.bf16 %v8729_v43, %v8712_v33  ;;  %v6879_v12 = vpack.c.bf16 %v8739_v16, %v8734_v35  ;;  %v4051_v33 = vmax.f32 %v3745_v44, 0.0 }
 0xeba   :  { %v8773_v15 = vld [vmem:[%s9173_s12 + $0x710] sm:$0xff]  ;;  %v8778_v49 = vld [vmem:[%s9173_s12 + $0x718] sm:$0xff]  ;;  %v8819_v43 = vrot.slane %v8474_v31, %v3252_v60  ;;  %v6849_v35 = vpack.c.bf16 %v8762_v2, %v8757_v59 }
 0xebb   :  { %6802 = vmatpush3.bf16.msra.mxu0 %v6801_v3  ;;  %6834 = vmatpush3.bf16.msra.mxu1 %v6833_v8  ;;  %v8651_v45 = vpop.f32.mrb[56].mxu0  ;;  %v8653_v46 = vpop.f32.mrb[60].mxu1  ;;  %v6881_v16 = vpack.c.bf16 %v8778_v49, %v8773_v15 }
 0xebc   :  { %v8669_v62 = vpop.f32.mrb[57].mxu0  ;;  %v8671_v0 = vpop.f32.mrb[61].mxu1  ;;  %6804 = vmatprep.subr.bf16.mxu0 %v6803_v36  ;;  %6836 = vmatprep.subr.bf16.mxu1 %v6835_v37  ;;  %v8702_v36 = vld [vmem:[%s9173_s12 + $0x700] sm:$0xff]  ;;  %v8707_v37 = vld [vmem:[%s9173_s12 + $0x708] sm:$0xff] }
 0xebd   :  { %v6877_v58 = vpack.c.bf16 %v8707_v37, %v8702_v36  ;;  %v8800_v36 = vld [vmem:[%s9173_s12 + $0x6a8] sm:$0xff] }
 0xebe   :  { %v8810_v37 = vld [vmem:[%s9173_s12 + $0x7a8] sm:$0xff] }
 0xebf   :  { %6806 = vmatpush3.bf16.msra.mxu0 %v6805_v18  ;;  %6838 = vmatpush3.bf16.msra.mxu1 %v6837_v19  ;;  %v3914_v3 = vpop.f32.mrb[58].mxu0  ;;  %v4003_v8 = vpop.f32.mrb[62].mxu1  ;;  %v3834_v18 = vadd.f32 %v8585_v5, %v8531_v61  ;;  %v8748_v19 = vrot.slane %v8474_v31, %v3244_v50  ;;  %v4034_v5 = vmax.f32 %v3737_v30, 0.0  ;;  %v3743_v50 = vadd.f32 %v8573_v51, %v8639_v14  ;;  %v8783_v51 = vld [vmem:[%s9173_s12 + $0x6a0] sm:$0xff] }
 0xec0   :  { %v8717_v48 = vadd.f32 %v3914_v3, %v8658_v13  ;;  %v8720_v39 = vadd.f32 %v4003_v8, %v8676_v47  ;;  %v8722_v41 = vpop.f32.mrb[59].mxu0  ;;  %v8724_v42 = vpop.f32.mrb[63].mxu1  ;;  %6808 = vmatprep.subr.bf16.mxu0 %v6807_v1  ;;  %6840 = vmatprep.subr.bf16.mxu1 %v6839_v6  ;;  %v3749_v31 = vadd.f32 %v8605_v34, %v8639_v14  ;;  %v8850_v34 = vld [vmem:[%s9173_s12 + $0x6b0] sm:$0xff] }
 0xec1   :  { %v4050_v60 = vmax.f32 %v3743_v50, 0.0  ;;  %v6851_v59 = vpack.c.bf16 %v8800_v36, %v8783_v51  ;;  %v4319_v50 = vld [vmem:[%s9173_s12 + $0x728] sm:$0xff]  ;;  %v4305_v36 = vld [vmem:[%s9173_s12 + $0x6b8] sm:$0xff] }
 0xec3   :  { %6810 = vmatpush3.bf16.msra.mxu0 %v6809_v20  ;;  %6842 = vmatpush3.bf16.msra.mxu1 %v6841_v22  ;;  %v3920_v1 = vpop.f32.mrb[60].mxu0  ;;  %v4009_v6 = vpop.f32.mrb[64].mxu1  ;;  %v4036_v20 = vmax.f32 %v3826_v38, 0.0  ;;  %v3832_v22 = vadd.f32 %v8575_v53, %v8643_v17  ;;  %v8805_v53 = vld [vmem:[%s9173_s12 + $0x7a0] sm:$0xff]  ;;  %v4053_v38 = vmax.f32 %v3834_v18, 0.0 }
 0xec4   :  { %v8788_v24 = vadd.f32 %v3920_v1, %v8658_v13  ;;  %v8791_v30 = vadd.f32 %v4009_v6, %v8676_v47  ;;  %v8793_v3 = vpop.f32.mrb[61].mxu0  ;;  %v8795_v8 = vpop.f32.mrb[65].mxu1  ;;  %6844 = vmatprep.subr.bf16.mxu0 %v6843_v4  ;;  %6876 = vmatprep.subr.bf16.mxu1 %v6875_v27  ;;  %v3751_v4 = vadd.f32 %v8615_v23, %v8504_v57  ;;  %v8828_v23 = vld [vmem:[%s9173_s12 + $0x620] sm:$0xff] }
 0xec5   :  { %v3840_v27 = vadd.f32 %v8617_v52, %v8531_v61  ;;  %v8833_v52 = vld [vmem:[%s9173_s12 + $0x628] sm:$0xff]  ;;  %v6883_v2 = vpack.c.bf16 %v8810_v37, %v8805_v53  ;;  %v4052_v1 = vmax.f32 %v3832_v22, 0.0  ;;  %v3838_v6 = vadd.f32 %v8607_v21, %v8643_v17  ;;  %v4336_v21 = vld [vmem:[%s9173_s12 + $0x7b0] sm:$0xff] }
 0xec6   :  { %4758 = vmatmul.mubr.f32.vlgmr.msra.gmra.mrb[82].mxu0 %v4034_v5  ;;  %4843 = vmatmul.mubr.f32.vlgmr.msra.gmra.mrb[86].mxu1 %v4036_v20  ;;  %v4318_v5 = vld [vmem:[%s9173_s12 + $0x720] sm:$0xff]  ;;  %v3757_v53 = vadd.f32 %v8669_v62, %v8504_v57  ;;  %v3846_v37 = vadd.f32 %v8671_v0, %v8531_v61  ;;  %v6855_v57 = vpack.c.bf16 %v4305_v36, %v8850_v34 }
 0xec7   :  { %4762 = vmatprep.mubr.f32.mxu0 %v4051_v33  ;;  %4847 = vmatprep.mubr.f32.mxu1 %v4053_v38  ;;  %v3926_v44 = vpop.f32.mrb[62].mxu0  ;;  %v4015_v18 = vpop.f32.mrb[66].mxu1  ;;  %v4069_v22 = vmax.f32 %v3840_v27, 0.0  ;;  %v6853_v33 = vpack.c.bf16 %v8833_v52, %v8828_v23  ;;  %v6885_v38 = vpack.c.bf16 %v4319_v50, %v4318_v5  ;;  %v4068_v61 = vmax.f32 %v3838_v6, 0.0  ;;  %v4288_v23 = vld [vmem:[%s9173_s12 + $0x630] sm:$0xff]  ;;  %v4321_v52 = vld [vmem:[%s9173_s12 + $0x738] sm:$0xff] }
 0xec8   :  { %6846 = vmatpush3.bf16.msra.mxu0 %v6845_v56  ;;  %6878 = vmatpush3.bf16.msra.mxu1 %v6877_v58  ;;  %v8855_v15 = vadd.f32 %v3926_v44, %v8658_v13  ;;  %v8858_v49 = vadd.f32 %v4015_v18, %v8676_v47  ;;  %v8860_v51 = vpop.f32.mrb[63].mxu0  ;;  %v8862_v20 = vpop.f32.mrb[67].mxu1  ;;  %v4337_v56 = vld [vmem:[%s9173_s12 + $0x7b8] sm:$0xff]  ;;  %v4067_v58 = vmax.f32 %v3751_v4, 0.0  ;;  %v4066_v44 = vmax.f32 %v3749_v31, 0.0  ;;  %v4339_v31 = vld [vmem:[%s9173_s12 + $0x7c8] sm:$0xff] }
 0xec9   :  { %6848 = vmatprep.subr.bf16.mxu0 %v6847_v54  ;;  %6880 = vmatprep.subr.bf16.mxu1 %v6879_v12  ;;  %v3755_v18 = vadd.f32 %v8651_v45, %v8639_v14  ;;  %v6887_v62 = vpack.c.bf16 %v4337_v56, %v4336_v21  ;;  %v3844_v0 = vadd.f32 %v8653_v46, %v8643_v17  ;;  %v4289_v17 = vld [vmem:[%s9173_s12 + $0x638] sm:$0xff]  ;;  %v4083_v46 = vmax.f32 %v3757_v53, 0.0  ;;  %v4290_v34 = vld [vmem:[%s9173_s12 + $0x640] sm:$0xff]  ;;  %v4308_v53 = vld [vmem:[%s9173_s12 + $0x6d0] sm:$0xff] }
 0xeca   :  { %4763 = vmatmul.mubr.f32.gmra.mrb[84].mxu0 %v4050_v60  ;;  %4848 = vmatmul.mubr.f32.gmra.mrb[88].mxu1 %v4052_v1  ;;  %v4306_v60 = vld [vmem:[%s9173_s12 + $0x6c0] sm:$0xff]  ;;  %v6857_v5 = vpack.c.bf16 %v4289_v17, %v4288_v23  ;;  %v4291_v1 = vld [vmem:[%s9173_s12 + $0x648] sm:$0xff] }
 0xecb   :  { %4767 = vmatprep.mubr.f32.mxu0 %v4067_v58  ;;  %4852 = vmatprep.mubr.f32.mxu1 %v4069_v22  ;;  %v3932_v4 = vpop.f32.mrb[64].mxu0  ;;  %v4021_v27 = vpop.f32.mrb[68].mxu1  ;;  %v4322_v58 = vld [vmem:[%s9173_s12 + $0x740] sm:$0xff]  ;;  %v4323_v22 = vld [vmem:[%s9173_s12 + $0x748] sm:$0xff] }
 0xecc   :  { %6850 = vmatpush3.bf16.msra.mxu0 %v6849_v35  ;;  %6882 = vmatpush3.bf16.msra.mxu1 %v6881_v16  ;;  %v8885_v54 = vadd.f32 %v3932_v4, %v8658_v13  ;;  %v8888_v12 = vadd.f32 %v4021_v27, %v8676_v47  ;;  %v8890_v14 = vpop.f32.mrb[65].mxu0  ;;  %v8892_v45 = vpop.f32.mrb[69].mxu1  ;;  %v4085_v35 = vmax.f32 %v3846_v37, 0.0  ;;  %v3917_v13 = vadd.f32 %v8722_v41, %v8748_v19  ;;  %v4320_v16 = vld [vmem:[%s9173_s12 + $0x730] sm:$0xff]  ;;  %v4307_v41 = vld [vmem:[%s9173_s12 + $0x6c8] sm:$0xff]  ;;  %v4309_v37 = vld [vmem:[%s9173_s12 + $0x6d8] sm:$0xff] }
 0xecd   :  { %v4006_v47 = vadd.f32 %v8724_v42, %v8819_v43  ;;  %6852 = vmatprep.subr.bf16.mxu0 %v6851_v59  ;;  %6884 = vmatprep.subr.bf16.mxu1 %v6883_v2  ;;  %v4338_v42 = vld [vmem:[%s9173_s12 + $0x7c0] sm:$0xff]  ;;  %v4082_v59 = vmax.f32 %v3755_v18, 0.0  ;;  %v4084_v2 = vmax.f32 %v3844_v0, 0.0  ;;  %v6889_v50 = vpack.c.bf16 %v4321_v52, %v4320_v16  ;;  %v4292_v4 = vld [vmem:[%s9173_s12 + $0x650] sm:$0xff]  ;;  %v4293_v27 = vld [vmem:[%s9173_s12 + $0x658] sm:$0xff] }
 0xece   :  { %4768 = vmatmul.mubr.f32.gmra.mrb[86].mxu0 %v4066_v44  ;;  %4853 = vmatmul.mubr.f32.gmra.mrb[90].mxu1 %v4068_v61  ;;  %v4039_v6 = vmax.f32 %v3917_v13, 0.0  ;;  %v6859_v21 = vpack.c.bf16 %v4307_v41, %v4306_v60  ;;  %v6891_v56 = vpack.c.bf16 %v4339_v31, %v4338_v42  ;;  %v6861_v44 = vpack.c.bf16 %v4291_v1, %v4290_v34  ;;  %v4324_v61 = vld [vmem:[%s9173_s12 + $0x750] sm:$0xff]  ;;  %v4325_v0 = vld [vmem:[%s9173_s12 + $0x758] sm:$0xff]  ;;  %v4310_v23 = vld [vmem:[%s9173_s12 + $0x6e0] sm:$0xff] }
 0xecf   :  { %4772 = vmatprep.mubr.f32.mxu0 %v4083_v46  ;;  %4857 = vmatprep.mubr.f32.mxu1 %v4085_v35  ;;  %v4041_v36 = vmax.f32 %v4006_v47, 0.0  ;;  %v6893_v18 = vpack.c.bf16 %v4323_v22, %v4322_v58  ;;  %v4311_v17 = vld [vmem:[%s9173_s12 + $0x6e8] sm:$0xff]  ;;  %v4342_v46 = vld [vmem:[%s9173_s12 + $0x7e0] sm:$0xff]  ;;  %v6865_v13 = vpack.c.bf16 %v4293_v27, %v4292_v4  ;;  %v6897_v47 = vpack.c.bf16 %v4325_v0, %v4324_v61  ;;  %v4328_v58 = vld [vmem:[%s9173_s12 + $0x770] sm:$0xff] }
 0xed0   :  { %6854 = vmatpush3.bf16.msra.mxu0 %v6853_v33  ;;  %6886 = vmatpush3.bf16.msra.mxu1 %v6885_v38  ;;  %v4340_v33 = vld [vmem:[%s9173_s12 + $0x7d0] sm:$0xff]  ;;  %v4341_v38 = vld [vmem:[%s9173_s12 + $0x7d8] sm:$0xff]  ;;  %v4343_v35 = vld [vmem:[%s9173_s12 + $0x7e8] sm:$0xff]  ;;  %v6867_v60 = vpack.c.bf16 %v4311_v17, %v4310_v23  ;;  %v3935_v61 = vadd.f32 %v8890_v14, %v8748_v19  ;;  %v4024_v0 = vadd.f32 %v8892_v45, %v8819_v43 }
 0xed1   :  { %6856 = vmatprep.subr.bf16.mxu0 %v6855_v57  ;;  %6888 = vmatprep.subr.bf16.mxu1 %v6887_v62  ;;  %v6863_v57 = vpack.c.bf16 %v4309_v37, %v4308_v53  ;;  %v6895_v62 = vpack.c.bf16 %v4341_v38, %v4340_v33  ;;  %v4294_v16 = vld [vmem:[%s9173_s12 + $0x660] sm:$0xff]  ;;  %v4295_v52 = vld [vmem:[%s9173_s12 + $0x668] sm:$0xff]  ;;  %v6899_v41 = vpack.c.bf16 %v4343_v35, %v4342_v46  ;;  %v4329_v22 = vld [vmem:[%s9173_s12 + $0x778] sm:$0xff] }
 0xed2   :  { %4773 = vmatmul.mubr.f32.gmra.mrb[88].mxu0 %v4082_v59  ;;  %4858 = vmatmul.mubr.f32.gmra.mrb[92].mxu1 %v4084_v2  ;;  %v4326_v42 = vld [vmem:[%s9173_s12 + $0x760] sm:$0xff]  ;;  %v4327_v31 = vld [vmem:[%s9173_s12 + $0x768] sm:$0xff]  ;;  %v4312_v59 = vld [vmem:[%s9173_s12 + $0x6f0] sm:$0xff]  ;;  %v6869_v34 = vpack.c.bf16 %v4295_v52, %v4294_v16  ;;  %v6905_v37 = vpack.c.bf16 %v4329_v22, %v4328_v58  ;;  %v3923_v33 = vadd.f32 %v8793_v3, %v8748_v19  ;;  %v4054_v3 = vmax.f32 %v8788_v24, 0.0 }
 0xed3   :  { %4927 = vmatprep.mubr.f32.mxu0 %v4039_v6  ;;  %5012 = vmatprep.mubr.f32.mxu1 %v4041_v36  ;;  %v4313_v2 = vld [vmem:[%s9173_s12 + $0x6f8] sm:$0xff]  ;;  %v6901_v1 = vpack.c.bf16 %v4327_v31, %v4326_v42  ;;  %v4296_v6 = vld [vmem:[%s9173_s12 + $0x670] sm:$0xff]  ;;  %v4012_v38 = vadd.f32 %v8795_v8, %v8819_v43  ;;  %v4087_v23 = vmax.f32 %v3935_v61, 0.0  ;;  %v4089_v24 = vmax.f32 %v4024_v0, 0.0 }
 0xed4   :  { %6858 = vmatpush3.bf16.msra.mxu0 %v6857_v5  ;;  %6890 = vmatpush3.bf16.msra.mxu1 %v6889_v50  ;;  %v4344_v5 = vld [vmem:[%s9173_s12 + $0x7f0] sm:$0xff]  ;;  %v4345_v50 = vld [vmem:[%s9173_s12 + $0x7f8] sm:$0xff]  ;;  %v6871_v36 = vpack.c.bf16 %v4313_v2, %v4312_v59  ;;  %v4055_v4 = vmax.f32 %v3923_v33, 0.0 }
 0xed5   :  { %6860 = vmatprep.subr.bf16.mxu0 %v6859_v21  ;;  %6892 = vmatprep.subr.bf16.mxu1 %v6891_v56  ;;  %v6903_v21 = vpack.c.bf16 %v4345_v50, %v4344_v5  ;;  %v4297_v56 = vld [vmem:[%s9173_s12 + $0x678] sm:$0xff]  ;;  %v4057_v27 = vmax.f32 %v4012_v38, 0.0 }
 0xed6   :  { %v6873_v53 = vpack.c.bf16 %v4297_v56, %v4296_v6 }
 0xed8   :  { %6862 = vmatpush3.bf16.msra.mxu0 %v6861_v44  ;;  %6894 = vmatpush3.bf16.msra.mxu1 %v6893_v18  ;;  %v4038_v44 = vmax.f32 %v8717_v48, 0.0  ;;  %v4040_v18 = vmax.f32 %v8720_v39, 0.0  ;;  %v4056_v48 = vmax.f32 %v8791_v30, 0.0  ;;  %v4086_v30 = vmax.f32 %v8885_v54, 0.0 }
 0xed9   :  { %6864 = vmatprep.subr.bf16.mxu0 %v6863_v57  ;;  %6896 = vmatprep.subr.bf16.mxu1 %v6895_v62  ;;  %v3929_v57 = vadd.f32 %v8860_v51, %v8748_v19  ;;  %v4018_v62 = vadd.f32 %v8862_v20, %v8819_v43  ;;  %v4070_v51 = vmax.f32 %v8855_v15, 0.0  ;;  %v4072_v20 = vmax.f32 %v8858_v49, 0.0  ;;  %v5880_v15 = vld [vmem:[%s9174_s13] ss:$0 sm:$0xff]  ;;  %s5777_s13 = sshll.u32 %s7068_s1, 4  ;;  %s5778_s13 = int_to_ptr.vmem [resolvable:$true] %s5777_s13 }
 0xeda   :  { %v4088_v19 = vmax.f32 %v8888_v12, 0.0  ;;  %s7025_s14 = scalar_lea.vmem %s5778_s13, 32  ;;  %p7030_p1 = scmp.lt.s32.totalorder %s5778_s13, %s5778_s13 }
 0xedb   :  { %v4071_v8 = vmax.f32 %v3929_v57, 0.0  ;;  %v4073_v39 = vmax.f32 %v4018_v62, 0.0  ;;  %p7026_p0 = scmp.ne.s32.totalorder %s5778_s13, %s7025_s14  ;;  %p7031_p2 = scmp.lt.s32.totalorder %s7025_s14, %s7025_s14 }
 0xedc   :  { %6866 = vmatpush3.bf16.msra.mxu0 %v6865_v13  ;;  %6898 = vmatpush3.bf16.msra.mxu1 %v6897_v47 }
 0xedd   :  { %6868 = vmatprep.subr.bf16.mxu0 %v6867_v60  ;;  %6900 = vmatprep.subr.bf16.mxu1 %v6899_v41  ;;  %p7032_p3 = por %p7031_p2, %p7030_p1 }
 0xedf   :  { %p7033_p4 = pnand %p7032_p3, %p7026_p0 }
 0xee0   :  { %6870 = vmatpush3.bf16.msra.mxu0 %v6869_v34  ;;  %6902 = vmatpush3.bf16.msra.mxu1 %v6901_v1 }
 0xee1   :  { %6872 = vmatprep.subr.bf16.mxu0 %v6871_v36  ;;  %6904 = vmatprep.subr.bf16.mxu1 %v6903_v21 }
 0xee4   :  { %6874 = vmatpush3.bf16.msra.mxu0 %v6873_v53  ;;  %6906 = vmatpush3.bf16.msra.mxu1 %v6905_v37 }
 0xee5   :  { %6551 = vmatprep.subr.mxu1 %v7049_v10 }
 0xee7   :  { %4928 = vmatmul.mubr.f32.vlgmr.msra.gmra.mrb[90].mxu0 %v4038_v44  ;;  %5013 = vmatmul.mubr.f32.vlgmr.msra.gmra.mrb[94].mxu1 %v4040_v18 }
 0xee8   :  { %4932 = vmatprep.mubr.f32.mxu0 %v4055_v4  ;;  %5017 = vmatprep.mubr.f32.mxu1 %v4057_v27 }
 0xeeb   :  { %4933 = vmatmul.mubr.f32.gmra.mrb[92].mxu0 %v4054_v3  ;;  %5018 = vmatmul.mubr.f32.gmra.mrb[96].mxu1 %v4056_v48 }
 0xeec   :  { %4937 = vmatprep.mubr.f32.mxu0 %v4071_v8  ;;  %5022 = vmatprep.mubr.f32.mxu1 %v4073_v39 }
 0xeef   :  { %4938 = vmatmul.mubr.f32.gmra.mrb[94].mxu0 %v4070_v51  ;;  %5023 = vmatmul.mubr.f32.gmra.mrb[98].mxu1 %v4072_v20 }
 0xef0   :  { %4942 = vmatprep.mubr.f32.mxu0 %v4087_v23  ;;  %5027 = vmatprep.mubr.f32.mxu1 %v4089_v24 }
 0xef3   :  { %4943 = vmatmul.mubr.f32.gmra.mrb[96].mxu0 %v4086_v30  ;;  %5028 = vmatmul.mubr.f32.gmra.mrb[100].mxu1 %v4088_v19 }
 0xef4   :  { %6553 = vmatprep.mubr.msk.f32.mxu1 %vm7050_vm1, %v7049_v10 }
 0xf3c   :  { %v6013_v43 = vpop.f32.mrb[66].mxu0  ;;  %v6057_v14 = vpop.f32.mrb[70].mxu1 }
 0xf3d   :  { %v6014_v49 = vpop.f32.mrb[67].mxu0  ;;  %v6058_v45 = vpop.f32.mrb[71].mxu1 }
 0xf3e   :  { %v6015_v17 = vadd.f32 %v6014_v49, %v6013_v43  ;;  %v6059_v46 = vadd.f32 %v6058_v45, %v6057_v14 }
 0xf40   :  { %v4420_v35 = vadd.f32 %v6015_v17, %v5880_v15  ;;  %v6016_v13 = vpop.f32.mrb[68].mxu0  ;;  %v6060_v54 = vpop.f32.mrb[72].mxu1 }
 0xf41   :  { %v6017_v47 = vpop.f32.mrb[69].mxu0  ;;  %v6061_v12 = vpop.f32.mrb[73].mxu1 }
 0xf42   :  { %v4505_v16 = vadd.f32 %v6059_v46, %v4420_v35  ;;  %v6018_v52 = vadd.f32 %v6017_v47, %v6016_v13  ;;  %v6062_v60 = vadd.f32 %v6061_v12, %v6060_v54 }
 0xf44   :  { %v4425_v41 = vadd.f32 %v6018_v52, %v5880_v15 }
 0xf46   :  { %v4510_v42 = vadd.f32 %v6062_v60, %v4425_v41 }
 0xf71   :  { %v6019_v31 = vpop.f32.mrb[70].mxu0  ;;  %v6063_v59 = vpop.f32.mrb[74].mxu1 }
 0xf72   :  { %v6020_v2 = vpop.f32.mrb[71].mxu0  ;;  %v6064_v5 = vpop.f32.mrb[75].mxu1 }
 0xf73   :  { %v6021_v50 = vadd.f32 %v6020_v2, %v6019_v31  ;;  %v6065_v34 = vadd.f32 %v6064_v5, %v6063_v59 }
 0xf75   :  { %v4430_v1 = vadd.f32 %v6021_v50, %v5880_v15  ;;  %v6022_v6 = vpop.f32.mrb[72].mxu0  ;;  %v6066_v36 = vpop.f32.mrb[76].mxu1 }
 0xf76   :  { %v6023_v21 = vpop.f32.mrb[73].mxu0  ;;  %v6067_v56 = vpop.f32.mrb[77].mxu1 }
 0xf77   :  { %v4515_v58 = vadd.f32 %v6065_v34, %v4430_v1  ;;  %v6024_v22 = vadd.f32 %v6023_v21, %v6022_v6  ;;  %v6068_v53 = vadd.f32 %v6067_v56, %v6066_v36 }
 0xf79   :  { %v4435_v37 = vadd.f32 %v6024_v22, %v5880_v15  ;;  %v6101_v33 = vpop.f32.mrb[74].mxu0  ;;  %v6145_v38 = vpop.f32.mrb[78].mxu1 }
 0xf7a   :  { %v6102_v44 = vpop.f32.mrb[75].mxu0  ;;  %v6146_v18 = vpop.f32.mrb[79].mxu1 }
 0xf7b   :  { %v4520_v4 = vadd.f32 %v6068_v53, %v4435_v37  ;;  %v6103_v27 = vadd.f32 %v6102_v44, %v6101_v33  ;;  %v6147_v57 = vadd.f32 %v6146_v18, %v6145_v38 }
 0xf7d   :  { %v4590_v62 = vadd.f32 %v6103_v27, %v4505_v16  ;;  %v6104_v3 = vpop.f32.mrb[76].mxu0  ;;  %v6148_v48 = vpop.f32.mrb[80].mxu1 }
 0xf7e   :  { %v6105_v8 = vpop.f32.mrb[77].mxu0  ;;  %v6149_v39 = vpop.f32.mrb[81].mxu1 }
 0xf7f   :  { %v4675_v61 = vadd.f32 %v6147_v57, %v4590_v62  ;;  %v6106_v0 = vadd.f32 %v6105_v8, %v6104_v3  ;;  %v6150_v51 = vadd.f32 %v6149_v39, %v6148_v48 }
 0xf81   :  { %v4595_v20 = vadd.f32 %v6106_v0, %v4510_v42  ;;  %v6107_v23 = vpop.f32.mrb[78].mxu0  ;;  %v6151_v24 = vpop.f32.mrb[82].mxu1 }
 0xf82   :  { %v6108_v30 = vpop.f32.mrb[79].mxu0  ;;  %v6152_v19 = vpop.f32.mrb[83].mxu1 }
 0xf83   :  { %v4680_v43 = vadd.f32 %v6150_v51, %v4595_v20  ;;  %v6109_v14 = vadd.f32 %v6108_v30, %v6107_v23  ;;  %v6153_v15 = vadd.f32 %v6152_v19, %v6151_v24 }
 0xf85   :  { %v4600_v49 = vadd.f32 %v6109_v14, %v4515_v58  ;;  %v6110_v45 = vpop.f32.mrb[80].mxu0  ;;  %v6154_v17 = vpop.f32.mrb[84].mxu1 }
 0xf86   :  { %v6111_v46 = vpop.f32.mrb[81].mxu0  ;;  %v6155_v35 = vpop.f32.mrb[85].mxu1 }
 0xf87   :  { %v4685_v13 = vadd.f32 %v6153_v15, %v4600_v49  ;;  %v6112_v54 = vadd.f32 %v6111_v46, %v6110_v45  ;;  %v6156_v47 = vadd.f32 %v6155_v35, %v6154_v17 }
 0xf89   :  { %v4605_v12 = vadd.f32 %v6112_v54, %v4520_v4 }
 0xf8b   :  { %v4690_v16 = vadd.f32 %v6156_v47, %v4605_v12 }
 0xf99   :  { %v6189_v52 = vpop.f32.mrb[82].mxu0  ;;  %v6233_v60 = vpop.f32.mrb[86].mxu1 }
 0xf9a   :  { %v6190_v41 = vpop.f32.mrb[83].mxu0  ;;  %v6234_v42 = vpop.f32.mrb[87].mxu1 }
 0xf9b   :  { %v6191_v31 = vadd.f32 %v6190_v41, %v6189_v52  ;;  %v6235_v59 = vadd.f32 %v6234_v42, %v6233_v60 }
 0xf9d   :  { %v4760_v2 = vadd.f32 %v6191_v31, %v4675_v61  ;;  %v6192_v5 = vpop.f32.mrb[84].mxu0  ;;  %v6236_v50 = vpop.f32.mrb[88].mxu1 }
 0xf9e   :  { %v6193_v34 = vpop.f32.mrb[85].mxu0  ;;  %v6237_v1 = vpop.f32.mrb[89].mxu1 }
 0xf9f   :  { %v4845_v6 = vadd.f32 %v6235_v59, %v4760_v2  ;;  %v6194_v36 = vadd.f32 %v6193_v34, %v6192_v5  ;;  %v6238_v21 = vadd.f32 %v6237_v1, %v6236_v50 }
 0xfa1   :  { %v4765_v56 = vadd.f32 %v6194_v36, %v4680_v43  ;;  %v6195_v58 = vpop.f32.mrb[86].mxu0  ;;  %v6239_v22 = vpop.f32.mrb[90].mxu1 }
 0xfa2   :  { %v6196_v53 = vpop.f32.mrb[87].mxu0  ;;  %v6240_v37 = vpop.f32.mrb[91].mxu1 }
 0xfa3   :  { %v4850_v33 = vadd.f32 %v6238_v21, %v4765_v56  ;;  %v6197_v38 = vadd.f32 %v6196_v53, %v6195_v58  ;;  %v6241_v44 = vadd.f32 %v6240_v37, %v6239_v22 }
 0xfa5   :  { %v4770_v18 = vadd.f32 %v6197_v38, %v4685_v13  ;;  %v6198_v4 = vpop.f32.mrb[88].mxu0  ;;  %v6242_v27 = vpop.f32.mrb[92].mxu1 }
 0xfa6   :  { %v6199_v57 = vpop.f32.mrb[89].mxu0  ;;  %v6243_v62 = vpop.f32.mrb[93].mxu1 }
 0xfa7   :  { %v4855_v3 = vadd.f32 %v6241_v44, %v4770_v18  ;;  %v6200_v48 = vadd.f32 %v6199_v57, %v6198_v4  ;;  %v6244_v8 = vadd.f32 %v6243_v62, %v6242_v27 }
 0xfa9   :  { %v4775_v39 = vadd.f32 %v6200_v48, %v4690_v16 }
 0xfab   :  { %v4860_v61 = vadd.f32 %v6244_v8, %v4775_v39 }
 0xfba   :  { %v6277_v0 = vpop.f32.mrb[90].mxu0  ;;  %v6321_v51 = vpop.f32.mrb[94].mxu1 }
 0xfbb   :  { %v6278_v20 = vpop.f32.mrb[91].mxu0  ;;  %v6322_v23 = vpop.f32.mrb[95].mxu1 }
 0xfbc   :  { %v6279_v24 = vadd.f32 %v6278_v20, %v6277_v0  ;;  %v6323_v30 = vadd.f32 %v6322_v23, %v6321_v51 }
 0xfbe   :  { %v4930_v19 = vadd.f32 %v6279_v24, %v4845_v6  ;;  %v6280_v43 = vpop.f32.mrb[92].mxu0  ;;  %v6324_v14 = vpop.f32.mrb[96].mxu1  ;;  %v5111_v24 = vld [vmem:[%s9179_s18] sm:$0xff] }
 0xfbf   :  { %v6281_v15 = vpop.f32.mrb[93].mxu0  ;;  %v6325_v49 = vpop.f32.mrb[97].mxu1 }
 0xfc0   :  { %v5015_v45 = vadd.f32 %v6323_v30, %v4930_v19  ;;  %v6282_v17 = vadd.f32 %v6281_v15, %v6280_v43  ;;  %v6326_v46 = vadd.f32 %v6325_v49, %v6324_v14  ;;  %v5112_v30 = vld [vmem:[%s9179_s18 + $0x8] sm:$0xff]  ;;  %v5113_v43 = vld [vmem:[%s9179_s18 + $0x10] sm:$0xff]  ;;  %v5114_v14 = vld [vmem:[%s9179_s18 + $0x18] sm:$0xff] }
 0xfc1   :  { %v6907_v19 = vpack.c.bf16 %v5112_v30, %v5111_v24  ;;  %v6911_v15 = vpack.c.bf16 %v5114_v14, %v5113_v43  ;;  %v5281_v49 = vld [vmem:[%s9192_s26] sm:$0xf] }
 0xfc2   :  { %v4935_v35 = vadd.f32 %v6282_v17, %v4850_v33  ;;  %v6283_v13 = vpop.f32.mrb[94].mxu0  ;;  %v6327_v54 = vpop.f32.mrb[98].mxu1  ;;  %v5033_v47 = vadd.f32 %v5015_v45, %v7689_v63  ;;  %v9079_v45 = vld [vmem:[%s9193_s7] sm:$0xf]  ;;  %v5293_v17 = vrot.slane %v5281_v49, %v8117_v9 }
 0xfc3   :  { %v6284_v12 = vpop.f32.mrb[95].mxu0  ;;  %v6328_v16 = vpop.f32.mrb[99].mxu1  ;;  %6908 = vmatprep.subr.bf16.mxu0 %v6907_v19 }
 0xfc4   :  { %v5020_v52 = vadd.f32 %v6326_v46, %v4935_v35  ;;  %v6285_v60 = vadd.f32 %v6284_v12, %v6283_v13  ;;  %v6329_v41 = vadd.f32 %v6328_v16, %v6327_v54  ;;  %v5039_v42 = vsel %vm84_vm0, %v5033_v47, 0.0  ;;  %6910 = vmatpush3.bf16.msra.mxu0 %v6907_v19 }
 0xfc5   :  { %5040 = vadd.xlane.f32.xlu1 %v5039_v42  ;;  %6912 = vmatprep.subr.bf16.mxu0 %v6911_v15  ;;  %v5286_v46 = vrot.slane %v5281_v49, %v7263_v32  ;;  %v5415_v35 = vrot.slane %v9079_v45, %v8117_v9  ;;  %v5307_v13 = vrot.slane %v5281_v49, %v8120_v11 }
 0xfc6   :  { %v4940_v31 = vadd.f32 %v6285_v60, %v4855_v3  ;;  %v6286_v59 = vpop.f32.mrb[96].mxu0  ;;  %v6330_v2 = vpop.f32.mrb[100].mxu1  ;;  %v5034_v5 = vadd.f32 %v5020_v52, %v7722_v40  ;;  %v5408_v54 = vrot.slane %v9079_v45, %v7263_v32 }
 0xfc7   :  { %v6287_v50 = vpop.f32.mrb[97].mxu0  ;;  %v6331_v34 = vpop.f32.mrb[101].mxu1 }
 0xfc8   :  { %v5025_v1 = vadd.f32 %v6329_v41, %v4940_v31  ;;  %v6288_v6 = vadd.f32 %v6287_v50, %v6286_v59  ;;  %v6332_v36 = vadd.f32 %v6331_v34, %v6330_v2  ;;  %v5042_v63 = vsel %vm84_vm0, %v5034_v5, 0.0  ;;  %6914 = vmatpush3.bf16.msra.mxu0 %v6911_v15 }
 0xfc9   :  { %5043 = vadd.xlane.f32.xlu0 %v5042_v63  ;;  %6556 = vmatprep.subr.mxu0 %v7049_v10  ;;  %v5882_v63 = vld [vmem:[%s9178_s17] ss:$0 sm:$0xff] }
 0xfca   :  { %v4945_v21 = vadd.f32 %v6288_v6, %v4860_v61  ;;  %v5035_v56 = vadd.f32 %v5025_v1, %v7732_v55  ;;  %v5881_v6 = vld [vmem:[%s9177_s16] ss:$0 sm:$0xff] }
 0xfcc   :  { %v5030_v58 = vadd.f32 %v6332_v36, %v4945_v21  ;;  %v5045_v22 = vsel %vm84_vm0, %v5035_v56, 0.0 }
 0xfcd   :  { %5046 = vadd.xlane.f32.xlu1 %v5045_v22 }
 0xfce   :  { %v5036_v53 = vadd.f32 %v5030_v58, %v7742_v25 }
 0xfd0   :  { %v5048_v37 = vsel %vm84_vm0, %v5036_v53, 0.0 }
 0xfd1   :  { %5049 = vadd.xlane.f32.xlu0 %v5048_v37 }
0x1052   :  { %v5041_v40 = vpop.xlane.xlu1 %5040 }
0x1053   :  { %v5051_v33 = vmul.f32 0.03125, %v5041_v40 }
0x1055   :  { %v9040_v38 = vsub.f32 %v5033_v47, %v5051_v33  ;;  %v5300_v47 = vrot.slane %v5281_v49, %v8109_v7 }
0x1056   :  { %v5044_v44 = vpop.xlane.xlu0 %5043 }
0x1057   :  { %v5052_v18 = vmul.f32 0.03125, %v5044_v44  ;;  %v5059_v4 = vmul.f32 %v9040_v38, %v9040_v38 }
0x1059   :  { %v9044_v27 = vsub.f32 %v5034_v5, %v5052_v18  ;;  %v5063_v55 = vsel %vm84_vm0, %v5059_v4, 0.0 }
0x105a   :  { %5064 = vadd.xlane.f32.xlu1 %v5063_v55  ;;  %v5047_v57 = vpop.xlane.xlu1 %5046 }
0x105b   :  { %v5053_v62 = vmul.f32 0.03125, %v5047_v57  ;;  %v5060_v25 = vmul.f32 %v9044_v27, %v9044_v27 }
0x105d   :  { %v9049_v3 = vsub.f32 %v5035_v56, %v5053_v62  ;;  %v5066_v48 = vsel %vm84_vm0, %v5060_v25, 0.0 }
0x105e   :  { %5067 = vadd.xlane.f32.xlu0 %v5066_v48  ;;  %v5050_v8 = vpop.xlane.xlu0 %5049  ;;  %v5883_v48 = vld [vmem:[%s9180_s19] ss:$0 sm:$0xff] }
0x105f   :  { %v5054_v39 = vmul.f32 0.03125, %v5050_v8  ;;  %v5061_v61 = vmul.f32 %v9049_v3, %v9049_v3 }
0x1061   :  { %v9054_v0 = vsub.f32 %v5036_v53, %v5054_v39  ;;  %v5069_v51 = vsel %vm84_vm0, %v5061_v61, 0.0 }
0x1062   :  { %5070 = vadd.xlane.f32.xlu1 %v5069_v51 }
0x1063   :  { %v5062_v20 = vmul.f32 %v9054_v0, %v9054_v0 }
0x1065   :  { %v5072_v23 = vsel %vm84_vm0, %v5062_v20, 0.0 }
0x1066   :  { %5073 = vadd.xlane.f32.xlu0 %v5072_v23 }
0x1073   :  { %5295 = vbcast.lane.b32.xlu1 %v5293_v17, 256 }
0x1077   :  { %5417 = vbcast.lane.b32.xlu1 %v5415_v35, 256 }
0x107b   :  { %5410 = vbcast.lane.b32.xlu1 %v5408_v54, 256 }
0x107c   :  { %5288 = vbcast.lane.b32.xlu0 %v5286_v46, 256 }
0x107f   :  { %5302 = vbcast.lane.b32.xlu1 %v5300_v47, 256 }
0x1080   :  { %5309 = vbcast.lane.b32.xlu0 %v5307_v13, 256 }
0x10e7   :  { %v5065_v12 = vpop.xlane.xlu1 %5064 }
0x10e8   :  { %v5075_v16 = vmul.f32 0.03125, %v5065_v12 }
0x10ea   :  { %v5079_v52 = vadd.f32 1e-05, %v5075_v16  ;;  %v7066_v16 = vmov 0  }
0x10eb   :  { %v5068_v60 = vpop.xlane.xlu0 %5067  ;;  %6939 = vset.pattern.permute.xlu0 %v7066_v16  ;;  %6940 = vset.pattern.permute.xlu1 %v7066_v16 }
0x10ec   :  { %7013 = vrsqrt.f32 %v5079_v52  ;;  %v5076_v41 = vmul.f32 0.03125, %v5068_v60  ;;  %v5422_v52 = vrot.slane %v9079_v45, %v8109_v7  ;;  %v5429_v60 = vrot.slane %v9079_v45, %v8120_v11 }
0x10ee   :  { %v5080_v42 = vadd.f32 1e-05, %v5076_v41 }
0x10ef   :  { %v5071_v31 = vpop.xlane.xlu1 %5070 }
0x10f0   :  { %7015 = vrsqrt.f32 %v5080_v42  ;;  %v5077_v59 = vmul.f32 0.03125, %v5071_v31 }
0x10f2   :  { %v5081_v2 = vadd.f32 1e-05, %v5077_v59 }
0x10f3   :  { %v5074_v5 = vpop.xlane.xlu0 %5073  ;;  %v5296_v41 = vpop.permute.xlu1 %5295 }
0x10f4   :  { %7017 = vrsqrt.f32 %v5081_v2  ;;  %v5078_v50 = vmul.f32 0.03125, %v5074_v5 }
0x10f6   :  { %v7014_v34 = vpop.eup %7013  ;;  %v5082_v1 = vadd.f32 1e-05, %v5078_v50 }
0x10f7   :  { %v5087_v36 = vmul.f32 %v7014_v34, %v9040_v38  ;;  %v5418_v42 = vpop.permute.xlu1 %5417  ;;  %v5289_v59 = vpop.permute.xlu0 %5288 }
0x10f8   :  { %7019 = vrsqrt.f32 %v5082_v1 }
0x10f9   :  { %v5097_v21 = vmul.f32 %v5881_v6, %v5087_v36 }
0x10fa   :  { %v7016_v56 = vpop.eup %7015 }
0x10fb   :  { %v5088_v58 = vmul.f32 %v7016_v56, %v9044_v27  ;;  %v5107_v22 = vadd.f32 %v5882_v63, %v5097_v21  ;;  %v5888_v27 = vld.sshfl [vmem:[%s9194_s0] sm:$0x33 pattern:$0x75316420]  ;;  %v5411_v31 = vpop.permute.xlu1 %5410  ;;  %v5310_v5 = vpop.permute.xlu0 %5309 }
0x10fc   :  { %v5228_v62 = vcombine.high %v5888_v27, %v5888_v27 }
0x10fd   :  { %v5098_v53 = vmul.f32 %v5881_v6, %v5088_v58  ;;  %6545 = vmatprep.mubr.msk.f32.mxu0 %vm84_vm0, %v5107_v22 }
0x10fe   :  { %v7018_v37 = vpop.eup %7017  ;;  %v5242_v25 = vrot.slane %v5228_v62, %v7256_v29  ;;  %v7067_v62 = vmov 1.0  }
0x10ff   :  { %v5108_v40 = vadd.f32 %v5882_v63, %v5098_v53  ;;  %v5089_v33 = vmul.f32 %v7018_v37, %v9049_v3  ;;  %v5235_v3 = vrot.slane %v5888_v27, %v7256_v29  ;;  %v5303_v2 = vpop.permute.xlu1 %5302 }
0x1100   :  { %v5252_v8 = vrot.slane %v5242_v25, %v7263_v32  ;;  %v5244_v24 = vcombine.high %v5242_v25, %v5242_v25 }
0x1101   :  { %6546 = vmatmul.mubr.msk.f32.vlgmr.msra.gmra.mrb[98].mxu0 %vm84_vm0, %v5108_v40  ;;  %v5099_v38 = vmul.f32 %v5881_v6, %v5089_v33  ;;  %v5248_v61 = vrot.slane %v5235_v3, %v7263_v32  ;;  %v5243_v19 = vcombine.high %v5235_v3, %v5235_v3 }
0x1102   :  { %v7020_v44 = vpop.eup %7019  ;;  %v5260_v14 = vrot.slane %v5244_v24, %v7263_v32 }
0x1103   :  { %v5109_v18 = vadd.f32 %v5882_v63, %v5099_v38  ;;  %v5090_v4 = vmul.f32 %v7020_v44, %v9054_v0  ;;  %v5256_v49 = vrot.slane %v5243_v19, %v7263_v32 }
0x1105   :  { %6548 = vmatprep.mubr.msk.f32.mxu0 %vm84_vm0, %v5109_v18  ;;  %v5100_v55 = vmul.f32 %v5881_v6, %v5090_v4 }
0x1107   :  { %v5110_v57 = vadd.f32 %v5882_v63, %v5100_v55  ;;  %v5362_v63 = vld [vmem:[%s9195_s8] sm:$0xf] }
0x1108   :  { %v5373_v45 = vrot.slane %v5362_v63, %v8117_v9  ;;  %v5366_v22 = vrot.slane %v5362_v63, %v7263_v32  ;;  %v5387_v38 = vrot.slane %v5362_v63, %v8120_v11  ;;  %v5380_v4 = vrot.slane %v5362_v63, %v8109_v7 }
0x1109   :  { %6549 = vmatmul.mubr.msk.f32.gmra.mrb[100].mxu0 %vm84_vm0, %v5110_v57  ;;  %v5336_v32 = vand.u32 127, %v507_v26 }
0x110a   :  { %6558 = vmatprep.mubr.msk.f32.mxu0 %vm7050_vm1, %v7049_v10 }
0x110b   :  { %v5339_v55 = vsub.s32 %v5336_v32, %v7253_v28 }
0x11d4   :  { %v6547_v39 = vpop.f32.mrb[98].mxu0 }
0x11d5   :  { %v5206_v0 = vadd.f32 %v6547_v39, %v5883_v48  ;;  %v5200_v51 = vpop.f32.mrb[99].mxu0 }
0x11d6   :  { %v5201_v20 = vadd.f32 %v5883_v48, %v5200_v51 }
0x11d7   :  { %v5266_v23 = vmul.f32 %v5252_v8, %v5206_v0 }
0x11d8   :  { %v5265_v30 = vmul.f32 %v5248_v61, %v5201_v20 }
0x11d9   :  { %v5272_v43 = vsel %vm84_vm0, %v5266_v23, 0.0 }
0x11da   :  { %5273 = vadd.xlane.f32.xlu1 %v5272_v43  ;;  %v5269_v29 = vsel %vm84_vm0, %v5265_v30, 0.0 }
0x11db   :  { %5270 = vadd.xlane.f32.xlu0 %v5269_v29 }
0x11dc   :  { %v6550_v15 = vpop.f32.mrb[100].mxu0 }
0x11dd   :  { %v5216_v17 = vadd.f32 %v6550_v15, %v5883_v48  ;;  %v5210_v46 = vpop.f32.mrb[101].mxu0 }
0x11de   :  { %v5211_v35 = vadd.f32 %v5883_v48, %v5210_v46 }
0x11df   :  { %v5268_v13 = vmul.f32 %v5260_v14, %v5216_v17 }
0x11e0   :  { %v5267_v54 = vmul.f32 %v5256_v49, %v5211_v35 }
0x11e1   :  { %v5278_v47 = vsel %vm84_vm0, %v5268_v13, 0.0 }
0x11e2   :  { %5279 = vadd.xlane.f32.xlu1 %v5278_v47  ;;  %v5275_v12 = vsel %vm84_vm0, %v5267_v54, 0.0 }
0x11e3   :  { %5276 = vadd.xlane.f32.xlu0 %v5275_v12 }
0x11f3   :  { %5424 = vbcast.lane.b32.xlu1 %v5422_v52, 256 }
0x11f9   :  { %5431 = vbcast.lane.b32.xlu0 %v5429_v60, 256 }
0x1267   :  { %v5274_v50 = vpop.xlane.xlu1 %5273 }
0x1268   :  { %v5316_v34 = vadd.f32 %v5296_v41, %v5274_v50  ;;  %v5271_v1 = vpop.xlane.xlu0 %5270 }
0x1269   :  { %v5315_v6 = vadd.f32 %v5289_v59, %v5271_v1 }
0x126a   :  { %v5438_v36 = vmul.f32 %v5418_v42, %v5316_v34 }
0x126b   :  { %v5437_v21 = vmul.f32 %v5411_v31, %v5315_v6 }
0x126c   :  { %5523 = vperm.xlu0 %6939, %v5438_v36  }
0x126d   :  { %5443 = vperm.xlu1 %6940, %v5437_v21  }
0x126f   :  { %v5280_v56 = vpop.xlane.xlu1 %5279 }
0x1270   :  { %v5277_v58 = vpop.xlane.xlu0 %5276  ;;  %v5318_v53 = vadd.f32 %v5310_v5, %v5280_v56 }
0x1271   :  { %5375 = vbcast.lane.b32.xlu1 %v5373_v45, 256  ;;  %v5317_v40 = vadd.f32 %v5303_v2, %v5277_v58 }
0x1273   :  { %v5425_v44 = vpop.permute.xlu1 %5424 }
0x1274   :  { %v5432_v37 = vpop.permute.xlu0 %5431  ;;  %v5439_v18 = vmul.f32 %v5425_v44, %v5317_v40 }
0x1275   :  { %v5440_v33 = vmul.f32 %v5432_v37, %v5318_v53  ;;  %5368 = vbcast.lane.b32.xlu1 %v5366_v22, 256 }
0x1277   :  { %5683 = vperm.xlu0 %6939, %v5440_v33  }
0x1279   :  { %5389 = vbcast.lane.b32.xlu1 %v5387_v38, 256 }
0x127b   :  { %5603 = vperm.xlu0 %6939, %v5439_v18  }
0x127d   :  { %5324 = vperm.xlu1 %6940, %v5315_v6  }
0x127f   :  { %5382 = vbcast.lane.b32.xlu0 %v5380_v4, 256 }
0x1281   :  { %5330 = vperm.xlu1 %6940, %v5317_v40  }
0x1283   :  { %5327 = vperm.xlu0 %6939, %v5316_v34  }
0x1287   :  { %5333 = vperm.xlu0 %6939, %v5318_v53  }
0x12eb   :  { %v5524_v57 = vpop.permute.xlu0 %5523 }
0x12ec   :  { %v5444_v9 = vpop.permute.xlu1 %5443  ;;  %v5528_v11 = vrot.slane %v5524_v57, %v5339_v55 }
0x12ed   :  { %v5448_v25 = vrot.slane %v5444_v9, %v5339_v55 }
0x12f0   :  { %v5376_v27 = vpop.permute.xlu1 %5375 }
0x12f1   :  { %vm5392_vm6 = vcmp.eq.s32.totalorder %v5376_v27, %v5336_v32 }
0x12f2   :  { %6557 = vmatpush3.msk.msra.mxu0 %vm5392_vm6, %v7067_v62 }
0x12f3   :  { %6559 = vmatmul.mubr.msk.f32.vlgmr.msra.gmra.mrb[102].mxu0 %vm185_vm2, %v5528_v11  ;;  %6566 = vmatprep.subr.mxu0 %v7049_v10 }
0x12f4   :  { %v5369_v7 = vpop.permute.xlu1 %5368  ;;  %6568 = vmatprep.mubr.msk.f32.mxu0 %vm7050_vm1, %v7049_v10 }
0x12f5   :  { %vm5391_vm7 = vcmp.eq.s32.totalorder %v5369_v7, %v5336_v32 }
0x12f6   :  { %6552 = vmatpush3.msk.msra.mxu1 %vm5391_vm7, %v7067_v62  ;;  %v5684_v26 = vpop.permute.xlu0 %5683 }
0x12f7   :  { %6554 = vmatmul.mubr.msk.f32.vlgmr.msra.gmra.mrb[102].mxu1 %vm185_vm2, %v5448_v25  ;;  %6561 = vmatprep.subr.mxu1 %v7049_v10  ;;  %v5688_v3 = vrot.slane %v5684_v26, %v5339_v55 }
0x12f8   :  { %v5390_v28 = vpop.permute.xlu1 %5389  ;;  %6563 = vmatprep.mubr.msk.f32.mxu1 %vm7050_vm1, %v7049_v10 }
0x12f9   :  { %vm5394_vm8 = vcmp.eq.s32.totalorder %v5390_v28, %v5336_v32 }
0x12fa   :  { %6567 = vmatpush3.msk.msra.mxu0 %vm5394_vm8, %v7067_v62  ;;  %v5604_v48 = vpop.permute.xlu0 %5603 }
0x12fb   :  { %6569 = vmatmul.mubr.msk.f32.vlgmr.msra.gmra.mrb[102].mxu0 %vm185_vm2, %v5688_v3  ;;  %v5608_v61 = vrot.slane %v5604_v48, %v5339_v55 }
0x12fc   :  { %v5325_v8 = vpop.permute.xlu1 %5324 }
0x12fd   :  { %v5340_v51 = vrot.slane %v5325_v8, %v5339_v55 }
0x12fe   :  { %v5383_v39 = vpop.permute.xlu0 %5382 }
0x12ff   :  { %vm5393_vm9 = vcmp.eq.s32.totalorder %v5383_v39, %v5336_v32 }
0x1300   :  { %6562 = vmatpush3.msk.msra.mxu1 %vm5393_vm9, %v7067_v62  ;;  %v5331_v20 = vpop.permute.xlu1 %5330 }
0x1301   :  { %6564 = vmatmul.mubr.msk.f32.vlgmr.msra.gmra.mrb[102].mxu1 %vm185_vm2, %v5608_v61  ;;  %v5348_v24 = vrot.slane %v5331_v20, %v5339_v55 }
0x1302   :  { %v5328_v0 = vpop.permute.xlu0 %5327 }
0x1303   :  { %v5344_v23 = vrot.slane %v5328_v0, %v5339_v55 }
0x1305   :  { %v5354_v10 = vsel %vm5353_vm10, %v5344_v23, %v5340_v51 }
0x1306   :  { %v5334_v30 = vpop.permute.xlu0 %5333  ;;  %v5356_v43 = vsel %vm5355_vm11, %v5348_v24, %v5354_v10 }
0x1307   :  { %v5352_v19 = vrot.slane %v5334_v30, %v5339_v55 }
0x1309   :  { %v5358_v29 = vsel %vm5357_vm12, %v5352_v19, %v5356_v43 }
0x130a   :  { %5361 = vst.msk [vmem:[%s9181_s20] sm:$0xf] %vm5360_vm13, %v5358_v29 }
0x13ce   :  { %v5757_v14 = vpop.f32.mrb[102].mxu0 }
0x13cf   :  { %v6570_v15 = vpop.f32.mrb[103].mxu0  ;;  %v5765_v49 = vrot.slane %v5757_v14, 7 }
0x13d4   :  { %v5677_v17 = vpop.f32.mrb[102].mxu1 }
0x13d5   :  { %v5766_v46 = vsel %vm5353_vm10, %v5765_v49, %v5677_v17  ;;  %v6565_v35 = vpop.f32.mrb[103].mxu1 }
0x13d6   :  { %5768 = vst [vmem:[#allocation3] sm:$0x3] %v5766_v46 }
0x13d7   :  { %7036 = shalt.err (!%p7033_p4)
}
0x13d8   :  { %s7037_s11 = scalar_lea.hbm %s9182_s21, 32 }
0x13d9   :  { %p7038_p5 = scmp.ne.s32.totalorder %s9182_s21, %s7037_s11  ;;  %p7041_p6 = scmp.lt.u32.totalorder %s7037_s11, %s9182_s21 }
0x13db   :  { %p7043_p7 = pnand %p7041_p6, %p7038_p5 }
0x13dd   :  { %7046 = shalt.err (!%p7043_p7)
}
0x13de   :  { %5780 = dma.vmem_to_hbm [thread:$0]  %s5778_s13, 32, %s9182_s21, [#allocation4]  }
0x13df   :  { %7047 = dma.done.wait [#allocation4], 32  }
0x13e0   :  { %7048 = vsyncadd [#allocation4], 4294967264 }
0x13e1   :  { %5786 = vsyncpa [#allocation4], 1 }

</bundles_post_ra>
